<compile_context>
chip_gen: v6e
topology: v6e:2x2x1
jax: 0.10.0
libtpu: 0.0.40
codegen_flags: <defaults>
</compile_context>

<pallas_src>
import functools

import jax
import jax.numpy as jnp
from jax import lax
from jax.experimental import pallas as pl
from jax.experimental.pallas import tpu as pltpu

H = W = 128              # mask spatial size used in this synthetic script
BIG_I32 = 1 << 30
INF_F32 = 3.0e38


def _full_reduce(a, op):
    # (H, W) -> (1, 1) via chained single-axis keepdims reductions
    return op(op(a, axis=1, keepdims=True), axis=0, keepdims=True)


def _bezier_kernel(mask_ref, eseed_ref, eanchor_ref,
                   edges_ref, prox_ref, pdf_ref, seed_lin_ref, anchor_lin_ref,
                   *, minimum_distance, num_iters):
    x = mask_ref[...]

    rows = lax.broadcasted_iota(jnp.int32, (H, W), 0)
    cols = lax.broadcasted_iota(jnp.int32, (H, W), 1)
    row_first = rows == 0
    row_last = rows == H - 1
    col_first = cols == 0
    col_last = cols == W - 1
    idx_lin = rows * W + cols
    big = jnp.int32(BIG_I32)

    # ---------------- Sobel edges (scipy.ndimage.sobel, mode='reflect') ------
    # shifts as non-negative rolls + reflect fixup at the image border
    def down(a):   # value at (i, j) <- a[i-1, j]   (reflect at top)
        return jnp.where(row_first, a, pltpu.roll(a, shift=1, axis=0))

    def up(a):     # value at (i, j) <- a[i+1, j]   (reflect at bottom)
        return jnp.where(row_last, a, pltpu.roll(a, shift=H - 1, axis=0))

    def right(a):  # value at (i, j) <- a[i, j-1]   (reflect at left)
        return jnp.where(col_first, a, pltpu.roll(a, shift=1, axis=1))

    def left(a):   # value at (i, j) <- a[i, j+1]   (reflect at right)
        return jnp.where(col_last, a, pltpu.roll(a, shift=W - 1, axis=1))

    sm_r = down(x) + 2.0 * x + up(x)            # [1,2,1] smooth over rows
    gx = left(sm_r) - right(sm_r)               # derivative over columns
    d_r = up(x) - down(x)                       # derivative over rows
    gy = right(d_r) + 2.0 * d_r + left(d_r)     # [1,2,1] smooth over columns
    edge = (gx * gx + gy * gy) != 0.0
    edges_ref[...] = edge.astype(jnp.int32)

    # -------- weighted pixel pick: argmin Exp(1)/weight ("exponential race") --
    # Picks pixel i with probability weight_i / sum(weights); ties broken by
    # the smallest linear index.  All index math stays exact in float32
    # (indices < 2^24).
    def weighted_pick_lin(weights, e):
        safe_w = jnp.where(weights > 0.0, weights, 1.0)
        score = jnp.where(weights > 0.0, e / safe_w, INF_F32)
        mn = _full_reduce(score, jnp.min)                          # (1, 1)
        cand = jnp.where(score == mn, idx_lin.astype(jnp.float32), INF_F32)
        return _full_reduce(cand, jnp.min).astype(jnp.int32)       # (1, 1)

    seed_lin = weighted_pick_lin(edge.astype(jnp.float32), eseed_ref[...])
    seed_lin_ref[...] = seed_lin

    # -------- BFS geodesic distance along the edge from the seed -------------
    # TODO(synk): the original uses a traversal-order dependent recursive DFS
    # step counter (try/except IndexError); here we compute the 8-connected BFS
    # distance along the edge, capped at minimum_distance + maximum_distance.
    dist0 = jnp.where((idx_lin == seed_lin) & edge, jnp.int32(1), jnp.int32(0))

    def body(_, dist):
        cost = jnp.where(dist > 0, dist, big)
        # separable 3x3 Chebyshev min: row pass (sublane rolls) then column
        # pass (lane rolls); including the center is safe because growth is
        # gated on dist == 0 (center maps to BIG there).
        m = jnp.minimum(cost, jnp.minimum(
            jnp.where(row_first, big, pltpu.roll(cost, shift=1, axis=0)),
            jnp.where(row_last, big, pltpu.roll(cost, shift=H - 1, axis=0))))
        m = jnp.minimum(m, jnp.minimum(
            jnp.where(col_first, big, pltpu.roll(m, shift=1, axis=1)),
            jnp.where(col_last, big, pltpu.roll(m, shift=W - 1, axis=1))))
        grow = edge & (dist == 0) & (m < big)
        return jnp.where(grow, m + 1, dist)

    prox = lax.fori_loop(0, num_iters, body, dist0)
    prox_ref[...] = prox

    # -------- pdf = (max(prox) - prox), masked, normalized --------------------
    proxf = prox.astype(jnp.float32)
    mx = _full_reduce(proxf, jnp.max)
    pdf = jnp.where(prox < minimum_distance, 0.0, mx - proxf)
    total = _full_reduce(pdf, jnp.sum)
    inv = jnp.where(total > 0.0, 1.0 / total, 0.0)   # scalar recip + vmul, /0 guard
    pdf = pdf * inv
    pdf_ref[...] = pdf

    # -------- anchor point: pixel drawn proportionally to the pdf -------------
    anchor_lin_ref[...] = weighted_pick_lin(pdf, eanchor_ref[...])


def bezier_forward(original_mask, key, *, minimum_distance, maximum_distance):
    num_iters = minimum_distance + maximum_distance
    # Exp(1) noise fields for the two in-kernel weighted picks (replaces the
    # host-side np.random.choice calls of the original).
    k1, k2 = jax.random.split(key)
    eseed = jax.random.exponential(k1, (H, W), dtype=jnp.float32)
    eanchor = jax.random.exponential(k2, (H, W), dtype=jnp.float32)

    kernel = functools.partial(_bezier_kernel,
                               minimum_distance=minimum_distance,
                               num_iters=num_iters)
    full = pl.BlockSpec((H, W), lambda i: (0, 0))
    one = pl.BlockSpec((1, 1), lambda i: (0, 0))

    edges, prox, pdf, seed_lin, anchor_lin = pl.pallas_call(
        kernel,
        out_shape=(
            jax.ShapeDtypeStruct((H, W), jnp.int32),    # edges
            jax.ShapeDtypeStruct((H, W), jnp.int32),    # proximity image
            jax.ShapeDtypeStruct((H, W), jnp.float32),  # normalized pdf
            jax.ShapeDtypeStruct((1, 1), jnp.int32),    # seed linear index
            jax.ShapeDtypeStruct((1, 1), jnp.int32),    # anchor linear index
        ),
        grid_spec=pltpu.PrefetchScalarGridSpec(
            num_scalar_prefetch=0,
            grid=(1,),
            in_specs=[full, full, full],
            out_specs=(full, full, full, one, one),
        ),
        # TODO(synk): single-mask module -> only one TensorCore is usable on
        # v7x; a batched variant would add a leading "parallel" grid axis.
        compiler_params=pltpu.CompilerParams(dimension_semantics=("arbitrary",)),
    )(original_mask.astype(jnp.float32), eseed, eanchor)

    sl = seed_lin[0, 0]
    al = anchor_lin[0, 0]
    seed = jnp.stack([sl // W, sl % W]).astype(jnp.int32)
    anchor = jnp.stack([al // W, al % W]).astype(jnp.int32)
    return edges, prox, pdf, seed, anchor


class BezierPolypExtenderPallas:
    def __init__(self, num_nodes, degree, minimum_distance=50, maximum_distance=100):
        self.num_nodes = num_nodes          # unused in forward (kept for parity)
        self.degree = degree                # unused in forward (kept for parity)
        self.minimum_distance = minimum_distance
        self.maximum_distance = maximum_distance

    def __call__(self, original_mask, key):
        # TODO(synk): matplotlib imshow/scatter/savefig calls have no Pallas
        # equivalent and are omitted; the original forward returns None.
        return bezier_forward(original_mask, key,
                              minimum_distance=self.minimum_distance,
                              maximum_distance=self.maximum_distance)


if __name__ == "__main__":
    key = jax.random.PRNGKey(0)
    kc, kr = jax.random.split(key)

    # deterministic synthetic polyp mask: a filled disk with a jittered center
    jitter = jax.random.randint(kc, (2,), -4, 5)
    cy, cx = 64 + jitter[0], 64 + jitter[1]
    yy = jnp.arange(H)[:, None]
    xx = jnp.arange(W)[None, :]
    original_mask = (((yy - cy) ** 2 + (xx - cx) ** 2) <= 30 ** 2).astype(jnp.float32)

    extender = BezierPolypExtenderPallas(
        num_nodes=8, degree=3, minimum_distance=5, maximum_distance=40)

    edges, prox, pdf, seed, anchor = extender(original_mask, kr)
    jax.block_until_ready((edges, prox, pdf, seed, anchor))

    assert edges.shape == (H, W) and edges.dtype == jnp.int32
    assert prox.shape == (H, W) and prox.dtype == jnp.int32
    assert pdf.shape == (H, W) and pdf.dtype == jnp.float32
    assert seed.shape == (2,) and anchor.shape == (2,)
    assert bool(jnp.isfinite(pdf).all())
    assert abs(float(jnp.sum(pdf)) - 1.0) < 1e-3

    sr, sc = int(seed[0]), int(seed[1])
    ar, ac = int(anchor[0]), int(anchor[1])
    assert 0 <= sr < H and 0 <= sc < W and 0 <= ar < H and 0 <= ac < W
    assert int(edges[sr, sc]) == 1          # seed lies on the edge
    assert int(prox[sr, sc]) == 1           # seed distance initialized to 1
    assert float(pdf[ar, ac]) > 0.0         # anchor drawn from nonzero pdf

    print("KERNEL_OK")
</pallas_src>

<mosaic_0001>
module attributes {stable_mosaic.version = 11 : i64} {
  func.func @_bezier_kernel(%arg0: i32, %arg1: memref<128x128xf32, #tpu.memory_space<vmem>>, %arg2: memref<128x128xf32, #tpu.memory_space<vmem>>, %arg3: memref<128x128xf32, #tpu.memory_space<vmem>>, %arg4: memref<128x128xi32, #tpu.memory_space<vmem>>, %arg5: memref<128x128xi32, #tpu.memory_space<vmem>>, %arg6: memref<128x128xf32, #tpu.memory_space<vmem>>, %arg7: memref<1x1xi32, #tpu.memory_space<vmem>>, %arg8: memref<1x1xi32, #tpu.memory_space<vmem>>) attributes {dimension_semantics = [#tpu.dimension_semantics<arbitrary>], iteration_bounds = array<i64: 1>, scalar_prefetch = 0 : i64, scratch_operands = 0 : i64, tpu.core_type = #tpu.core_type<tc>, window_params = [{pipeline_mode = #tpu.pipeline_mode<synchronous>, transform_indices = @transform_0, window_bounds = array<i64: 128, 128>}, {pipeline_mode = #tpu.pipeline_mode<synchronous>, transform_indices = @transform_1, window_bounds = array<i64: 128, 128>}, {pipeline_mode = #tpu.pipeline_mode<synchronous>, transform_indices = @transform_2, window_bounds = array<i64: 128, 128>}, {pipeline_mode = #tpu.pipeline_mode<synchronous>, transform_indices = @transform_3, window_bounds = array<i64: 128, 128>}, {pipeline_mode = #tpu.pipeline_mode<synchronous>, transform_indices = @transform_4, window_bounds = array<i64: 128, 128>}, {pipeline_mode = #tpu.pipeline_mode<synchronous>, transform_indices = @transform_5, window_bounds = array<i64: 128, 128>}, {pipeline_mode = #tpu.pipeline_mode<synchronous>, transform_indices = @transform_6, window_bounds = array<i64: 1, 1>}, {pipeline_mode = #tpu.pipeline_mode<synchronous>, transform_indices = @transform_7, window_bounds = array<i64: 1, 1>}]} {
    %c0 = arith.constant 0 : index
    %c0_0 = arith.constant 0 : index
    %0 = vector.load %arg1[%c0, %c0_0] : memref<128x128xf32, #tpu.memory_space<vmem>>, vector<128x128xf32>
    %1 = tpu.iota {dimensions = array<i32: 0>} : vector<128x128xi32>
    %2 = tpu.iota {dimensions = array<i32: 1>} : vector<128x128xi32>
    %c0_i32 = arith.constant 0 : i32
    %3 = vector.broadcast %c0_i32 : i32 to vector<128x128xi32>
    %4 = arith.cmpi eq, %1, %3 : vector<128x128xi32>
    %c127_i32 = arith.constant 127 : i32
    %5 = vector.broadcast %c127_i32 : i32 to vector<128x128xi32>
    %6 = arith.cmpi eq, %1, %5 : vector<128x128xi32>
    %c0_i32_1 = arith.constant 0 : i32
    %7 = vector.broadcast %c0_i32_1 : i32 to vector<128x128xi32>
    %8 = arith.cmpi eq, %2, %7 : vector<128x128xi32>
    %c127_i32_2 = arith.constant 127 : i32
    %9 = vector.broadcast %c127_i32_2 : i32 to vector<128x128xi32>
    %10 = arith.cmpi eq, %2, %9 : vector<128x128xi32>
    %c128_i32 = arith.constant 128 : i32
    %11 = vector.broadcast %c128_i32 : i32 to vector<128x128xi32>
    %12 = arith.muli %1, %11 : vector<128x128xi32>
    %13 = arith.addi %12, %2 : vector<128x128xi32>
    %c1_i32 = arith.constant 1 : i32
    %14 = tpu.dynamic_rotate %0 by %c1_i32 dim 0 : vector<128x128xf32>, i32 -> vector<128x128xf32>
    %15 = arith.select %4, %0, %14 : vector<128x128xi1>, vector<128x128xf32>
    %cst = arith.constant 2.000000e+00 : f32
    %16 = vector.broadcast %cst : f32 to vector<128x128xf32>
    %17 = arith.mulf %16, %0 : vector<128x128xf32>
    %18 = arith.addf %15, %17 : vector<128x128xf32>
    %c127_i32_3 = arith.constant 127 : i32
    %19 = tpu.dynamic_rotate %0 by %c127_i32_3 dim 0 : vector<128x128xf32>, i32 -> vector<128x128xf32>
    %20 = arith.select %6, %0, %19 : vector<128x128xi1>, vector<128x128xf32>
    %21 = arith.addf %18, %20 : vector<128x128xf32>
    %c127_i32_4 = arith.constant 127 : i32
    %22 = tpu.dynamic_rotate %21 by %c127_i32_4 dim 1 : vector<128x128xf32>, i32 -> vector<128x128xf32>
    %23 = arith.select %10, %21, %22 : vector<128x128xi1>, vector<128x128xf32>
    %c1_i32_5 = arith.constant 1 : i32
    %24 = tpu.dynamic_rotate %21 by %c1_i32_5 dim 1 : vector<128x128xf32>, i32 -> vector<128x128xf32>
    %25 = arith.select %8, %21, %24 : vector<128x128xi1>, vector<128x128xf32>
    %26 = arith.subf %23, %25 : vector<128x128xf32>
    %c127_i32_6 = arith.constant 127 : i32
    %27 = tpu.dynamic_rotate %0 by %c127_i32_6 dim 0 : vector<128x128xf32>, i32 -> vector<128x128xf32>
    %28 = arith.select %6, %0, %27 : vector<128x128xi1>, vector<128x128xf32>
    %c1_i32_7 = arith.constant 1 : i32
    %29 = tpu.dynamic_rotate %0 by %c1_i32_7 dim 0 : vector<128x128xf32>, i32 -> vector<128x128xf32>
    %30 = arith.select %4, %0, %29 : vector<128x128xi1>, vector<128x128xf32>
    %31 = arith.subf %28, %30 : vector<128x128xf32>
    %c1_i32_8 = arith.constant 1 : i32
    %32 = tpu.dynamic_rotate %31 by %c1_i32_8 dim 1 : vector<128x128xf32>, i32 -> vector<128x128xf32>
    %33 = arith.select %8, %31, %32 : vector<128x128xi1>, vector<128x128xf32>
    %cst_9 = arith.constant 2.000000e+00 : f32
    %34 = vector.broadcast %cst_9 : f32 to vector<128x128xf32>
    %35 = arith.mulf %34, %31 : vector<128x128xf32>
    %36 = arith.addf %33, %35 : vector<128x128xf32>
    %c127_i32_10 = arith.constant 127 : i32
    %37 = tpu.dynamic_rotate %31 by %c127_i32_10 dim 1 : vector<128x128xf32>, i32 -> vector<128x128xf32>
    %38 = arith.select %10, %31, %37 : vector<128x128xi1>, vector<128x128xf32>
    %39 = arith.addf %36, %38 : vector<128x128xf32>
    %40 = arith.mulf %26, %26 : vector<128x128xf32>
    %41 = arith.mulf %39, %39 : vector<128x128xf32>
    %42 = arith.addf %40, %41 : vector<128x128xf32>
    %cst_11 = arith.constant 0.000000e+00 : f32
    %43 = vector.broadcast %cst_11 : f32 to vector<128x128xf32>
    %44 = arith.cmpf one, %42, %43 : vector<128x128xf32>
    %45 = arith.extui %44 : vector<128x128xi1> to vector<128x128xi32>
    %c0_12 = arith.constant 0 : index
    %c0_13 = arith.constant 0 : index
    %46 = vector.load %arg4[%c0_12, %c0_13] : memref<128x128xi32, #tpu.memory_space<vmem>>, vector<128x128xi32>
    tpu.vector_store %arg4[%c0_12, %c0_13], %45 {strides = array<i32>} : memref<128x128xi32, #tpu.memory_space<vmem>>, vector<128x128xi32>,
    %47 = arith.extui %44 : vector<128x128xi1> to vector<128x128xi32>
    %48 = arith.sitofp %47 : vector<128x128xi32> to vector<128x128xf32>
    %c0_14 = arith.constant 0 : index
    %c0_15 = arith.constant 0 : index
    %49 = vector.load %arg2[%c0_14, %c0_15] : memref<128x128xf32, #tpu.memory_space<vmem>>, vector<128x128xf32>
    %cst_16 = arith.constant 0.000000e+00 : f32
    %50 = vector.broadcast %cst_16 : f32 to vector<128x128xf32>
    %51 = arith.cmpf ogt, %48, %50 : vector<128x128xf32>
    %cst_17 = arith.constant 1.000000e+00 : f32
    %52 = vector.broadcast %cst_17 : f32 to vector<128x128xf32>
    %53 = arith.select %51, %48, %52 : vector<128x128xi1>, vector<128x128xf32>
    %cst_18 = arith.constant 0.000000e+00 : f32
    %54 = vector.broadcast %cst_18 : f32 to vector<128x128xf32>
    %55 = arith.cmpf ogt, %48, %54 : vector<128x128xf32>
    %56 = arith.divf %49, %53 : vector<128x128xf32>
    %cst_19 = arith.constant 3.000000e+38 : f32
    %57 = vector.broadcast %cst_19 : f32 to vector<128x128xf32>
    %58 = arith.select %55, %56, %57 : vector<128x128xi1>, vector<128x128xf32>
    %cst_20 = arith.constant dense<0x7F800000> : vector<128xf32>
    %59 = vector.multi_reduction <minimumf>, %58, %cst_20 [1] : vector<128x128xf32> to vector<128xf32>
    %60 = vector.shape_cast %59 : vector<128xf32> to vector<128x1xf32>
    %cst_21 = arith.constant dense<0x7F800000> : vector<1xf32>
    %61 = vector.multi_reduction <minimumf>, %60, %cst_21 [0] : vector<128x1xf32> to vector<1xf32>
    %62 = vector.shape_cast %61 : vector<1xf32> to vector<1x1xf32>
    %63 = vector.broadcast %62 : vector<1x1xf32> to vector<128x128xf32>
    %64 = arith.cmpf oeq, %58, %63 : vector<128x128xf32>
    %65 = arith.sitofp %13 : vector<128x128xi32> to vector<128x128xf32>
    %cst_22 = arith.constant 3.000000e+38 : f32
    %66 = vector.broadcast %cst_22 : f32 to vector<128x128xf32>
    %67 = arith.select %64, %65, %66 : vector<128x128xi1>, vector<128x128xf32>
    %cst_23 = arith.constant dense<0x7F800000> : vector<128xf32>
    %68 = vector.multi_reduction <minimumf>, %67, %cst_23 [1] : vector<128x128xf32> to vector<128xf32>
    %69 = vector.shape_cast %68 : vector<128xf32> to vector<128x1xf32>
    %cst_24 = arith.constant dense<0x7F800000> : vector<1xf32>
    %70 = vector.multi_reduction <minimumf>, %69, %cst_24 [0] : vector<128x1xf32> to vector<1xf32>
    %71 = vector.shape_cast %70 : vector<1xf32> to vector<1x1xf32>
    %72 = arith.fptosi %71 : vector<1x1xf32> to vector<1x1xi32>
    %c0_25 = arith.constant 0 : index
    %c0_26 = arith.constant 0 : index
    %73 = vector.load %arg7[%c0_25, %c0_26] : memref<1x1xi32, #tpu.memory_space<vmem>>, vector<1x1xi32>
    tpu.vector_store %arg7[%c0_25, %c0_26], %72 {strides = array<i32>} : memref<1x1xi32, #tpu.memory_space<vmem>>, vector<1x1xi32>,
    %74 = vector.broadcast %72 : vector<1x1xi32> to vector<128x128xi32>
    %75 = arith.cmpi eq, %13, %74 : vector<128x128xi32>
    %76 = arith.andi %75, %44 : vector<128x128xi1>
    %c1_i32_27 = arith.constant 1 : i32
    %c0_i32_28 = arith.constant 0 : i32
    %77 = vector.broadcast %c1_i32_27 : i32 to vector<128x128xi32>
    %78 = vector.broadcast %c0_i32_28 : i32 to vector<128x128xi32>
    %79 = arith.select %76, %77, %78 : vector<128x128xi1>, vector<128x128xi32>
    %c1073741824_i32 = arith.constant 1073741824 : i32
    %c0_i32_29 = arith.constant 0 : i32
    %c45_i32 = arith.constant 45 : i32
    %80 = arith.addi %c0_i32_29, %c45_i32 : i32
    %c1_i32_30 = arith.constant 1 : i32
    %81 = scf.for %arg9 = %c0_i32_29 to %80 step %c1_i32_30 iter_args(%arg10 = %79) -> (vector<128x128xi32>)  : i32 {
      %c0_i32_56 = arith.constant 0 : i32
      %132 = vector.broadcast %c0_i32_56 : i32 to vector<128x128xi32>
      %133 = arith.cmpi sgt, %arg10, %132 : vector<128x128xi32>
      %134 = vector.broadcast %c1073741824_i32 : i32 to vector<128x128xi32>
      %135 = arith.select %133, %arg10, %134 : vector<128x128xi1>, vector<128x128xi32>
      %c1_i32_57 = arith.constant 1 : i32
      %136 = tpu.dynamic_rotate %135 by %c1_i32_57 dim 0 : vector<128x128xi32>, i32 -> vector<128x128xi32>
      %137 = vector.broadcast %c1073741824_i32 : i32 to vector<128x128xi32>
      %138 = arith.select %4, %137, %136 : vector<128x128xi1>, vector<128x128xi32>
      %c127_i32_58 = arith.constant 127 : i32
      %139 = tpu.dynamic_rotate %135 by %c127_i32_58 dim 0 : vector<128x128xi32>, i32 -> vector<128x128xi32>
      %140 = vector.broadcast %c1073741824_i32 : i32 to vector<128x128xi32>
      %141 = arith.select %6, %140, %139 : vector<128x128xi1>, vector<128x128xi32>
      %142 = arith.minsi %138, %141 : vector<128x128xi32>
      %143 = arith.minsi %135, %142 : vector<128x128xi32>
      %c1_i32_59 = arith.constant 1 : i32
      %144 = tpu.dynamic_rotate %143 by %c1_i32_59 dim 1 : vector<128x128xi32>, i32 -> vector<128x128xi32>
      %145 = vector.broadcast %c1073741824_i32 : i32 to vector<128x128xi32>
      %146 = arith.select %8, %145, %144 : vector<128x128xi1>, vector<128x128xi32>
      %c127_i32_60 = arith.constant 127 : i32
      %147 = tpu.dynamic_rotate %143 by %c127_i32_60 dim 1 : vector<128x128xi32>, i32 -> vector<128x128xi32>
      %148 = vector.broadcast %c1073741824_i32 : i32 to vector<128x128xi32>
      %149 = arith.select %10, %148, %147 : vector<128x128xi1>, vector<128x128xi32>
      %150 = arith.minsi %146, %149 : vector<128x128xi32>
      %151 = arith.minsi %143, %150 : vector<128x128xi32>
      %c0_i32_61 = arith.constant 0 : i32
      %152 = vector.broadcast %c0_i32_61 : i32 to vector<128x128xi32>
      %153 = arith.cmpi eq, %arg10, %152 : vector<128x128xi32>
      %154 = arith.andi %44, %153 : vector<128x128xi1>
      %155 = vector.broadcast %c1073741824_i32 : i32 to vector<128x128xi32>
      %156 = arith.cmpi slt, %151, %155 : vector<128x128xi32>
      %157 = arith.andi %154, %156 : vector<128x128xi1>
      %c1_i32_62 = arith.constant 1 : i32
      %158 = vector.broadcast %c1_i32_62 : i32 to vector<128x128xi32>
      %159 = arith.addi %151, %158 : vector<128x128xi32>
      %160 = arith.select %157, %159, %arg10 : vector<128x128xi1>, vector<128x128xi32>
      scf.yield %160 : vector<128x128xi32>
    }
    %c0_31 = arith.constant 0 : index
    %c0_32 = arith.constant 0 : index
    %82 = vector.load %arg5[%c0_31, %c0_32] : memref<128x128xi32, #tpu.memory_space<vmem>>, vector<128x128xi32>
    tpu.vector_store %arg5[%c0_31, %c0_32], %81 {strides = array<i32>} : memref<128x128xi32, #tpu.memory_space<vmem>>, vector<128x128xi32>,
    %83 = arith.sitofp %81 : vector<128x128xi32> to vector<128x128xf32>
    %cst_33 = arith.constant dense<0xFF800000> : vector<128xf32>
    %84 = vector.multi_reduction <maximumf>, %83, %cst_33 [1] : vector<128x128xf32> to vector<128xf32>
    %85 = vector.shape_cast %84 : vector<128xf32> to vector<128x1xf32>
    %cst_34 = arith.constant dense<0xFF800000> : vector<1xf32>
    %86 = vector.multi_reduction <maximumf>, %85, %cst_34 [0] : vector<128x1xf32> to vector<1xf32>
    %87 = vector.shape_cast %86 : vector<1xf32> to vector<1x1xf32>
    %c5_i32 = arith.constant 5 : i32
    %88 = vector.broadcast %c5_i32 : i32 to vector<128x128xi32>
    %89 = arith.cmpi slt, %81, %88 : vector<128x128xi32>
    %90 = vector.broadcast %87 : vector<1x1xf32> to vector<128x128xf32>
    %91 = arith.subf %90, %83 : vector<128x128xf32>
    %cst_35 = arith.constant 0.000000e+00 : f32
    %92 = vector.broadcast %cst_35 : f32 to vector<128x128xf32>
    %93 = arith.select %89, %92, %91 : vector<128x128xi1>, vector<128x128xf32>
    %cst_36 = arith.constant dense<0.000000e+00> : vector<128xf32>
    %94 = vector.multi_reduction <add>, %93, %cst_36 [1] : vector<128x128xf32> to vector<128xf32>
    %95 = vector.shape_cast %94 : vector<128xf32> to vector<128x1xf32>
    %cst_37 = arith.constant dense<0.000000e+00> : vector<1xf32>
    %96 = vector.multi_reduction <add>, %95, %cst_37 [0] : vector<128x1xf32> to vector<1xf32>
    %97 = vector.shape_cast %96 : vector<1xf32> to vector<1x1xf32>
    %cst_38 = arith.constant 0.000000e+00 : f32
    %98 = vector.broadcast %cst_38 : f32 to vector<1x1xf32>
    %99 = arith.cmpf ogt, %97, %98 : vector<1x1xf32>
    %cst_39 = arith.constant 1.000000e+00 : f32
    %100 = vector.broadcast %cst_39 : f32 to vector<1x1xf32>
    %101 = arith.divf %100, %97 : vector<1x1xf32>
    %cst_40 = arith.constant 0.000000e+00 : f32
    %102 = vector.broadcast %cst_40 : f32 to vector<1x1xf32>
    %103 = arith.select %99, %101, %102 : vector<1x1xi1>, vector<1x1xf32>
    %104 = vector.broadcast %103 : vector<1x1xf32> to vector<128x128xf32>
    %105 = arith.mulf %93, %104 : vector<128x128xf32>
    %c0_41 = arith.constant 0 : index
    %c0_42 = arith.constant 0 : index
    %106 = vector.load %arg6[%c0_41, %c0_42] : memref<128x128xf32, #tpu.memory_space<vmem>>, vector<128x128xf32>
    tpu.vector_store %arg6[%c0_41, %c0_42], %105 {strides = array<i32>} : memref<128x128xf32, #tpu.memory_space<vmem>>, vector<128x128xf32>,
    %c0_43 = arith.constant 0 : index
    %c0_44 = arith.constant 0 : index
    %107 = vector.load %arg3[%c0_43, %c0_44] : memref<128x128xf32, #tpu.memory_space<vmem>>, vector<128x128xf32>
    %cst_45 = arith.constant 0.000000e+00 : f32
    %108 = vector.broadcast %cst_45 : f32 to vector<128x128xf32>
    %109 = arith.cmpf ogt, %105, %108 : vector<128x128xf32>
    %cst_46 = arith.constant 1.000000e+00 : f32
    %110 = vector.broadcast %cst_46 : f32 to vector<128x128xf32>
    %111 = arith.select %109, %105, %110 : vector<128x128xi1>, vector<128x128xf32>
    %cst_47 = arith.constant 0.000000e+00 : f32
    %112 = vector.broadcast %cst_47 : f32 to vector<128x128xf32>
    %113 = arith.cmpf ogt, %105, %112 : vector<128x128xf32>
    %114 = arith.divf %107, %111 : vector<128x128xf32>
    %cst_48 = arith.constant 3.000000e+38 : f32
    %115 = vector.broadcast %cst_48 : f32 to vector<128x128xf32>
    %116 = arith.select %113, %114, %115 : vector<128x128xi1>, vector<128x128xf32>
    %cst_49 = arith.constant dense<0x7F800000> : vector<128xf32>
    %117 = vector.multi_reduction <minimumf>, %116, %cst_49 [1] : vector<128x128xf32> to vector<128xf32>
    %118 = vector.shape_cast %117 : vector<128xf32> to vector<128x1xf32>
    %cst_50 = arith.constant dense<0x7F800000> : vector<1xf32>
    %119 = vector.multi_reduction <minimumf>, %118, %cst_50 [0] : vector<128x1xf32> to vector<1xf32>
    %120 = vector.shape_cast %119 : vector<1xf32> to vector<1x1xf32>
    %121 = vector.broadcast %120 : vector<1x1xf32> to vector<128x128xf32>
    %122 = arith.cmpf oeq, %116, %121 : vector<128x128xf32>
    %123 = arith.sitofp %13 : vector<128x128xi32> to vector<128x128xf32>
    %cst_51 = arith.constant 3.000000e+38 : f32
    %124 = vector.broadcast %cst_51 : f32 to vector<128x128xf32>
    %125 = arith.select %122, %123, %124 : vector<128x128xi1>, vector<128x128xf32>
    %cst_52 = arith.constant dense<0x7F800000> : vector<128xf32>
    %126 = vector.multi_reduction <minimumf>, %125, %cst_52 [1] : vector<128x128xf32> to vector<128xf32>
    %127 = vector.shape_cast %126 : vector<128xf32> to vector<128x1xf32>
    %cst_53 = arith.constant dense<0x7F800000> : vector<1xf32>
    %128 = vector.multi_reduction <minimumf>, %127, %cst_53 [0] : vector<128x1xf32> to vector<1xf32>
    %129 = vector.shape_cast %128 : vector<1xf32> to vector<1x1xf32>
    %130 = arith.fptosi %129 : vector<1x1xf32> to vector<1x1xi32>
    %c0_54 = arith.constant 0 : index
    %c0_55 = arith.constant 0 : index
    %131 = vector.load %arg8[%c0_54, %c0_55] : memref<1x1xi32, #tpu.memory_space<vmem>>, vector<1x1xi32>
    tpu.vector_store %arg8[%c0_54, %c0_55], %130 {strides = array<i32>} : memref<1x1xi32, #tpu.memory_space<vmem>>, vector<1x1xi32>,
    return
  }
  func.func @transform_0(%arg0: i32) -> (i32, i32) {
    %c0_i32 = arith.constant 0 : i32
    %c0_i32_0 = arith.constant 0 : i32
    %c0_i32_1 = arith.constant 0 : i32
    return %c0_i32, %c0_i32_0 : i32, i32
  }
  func.func @transform_1(%arg0: i32) -> (i32, i32) {
    %c0_i32 = arith.constant 0 : i32
    %c0_i32_0 = arith.constant 0 : i32
    %c0_i32_1 = arith.constant 0 : i32
    return %c0_i32, %c0_i32_0 : i32, i32
  }
  func.func @transform_2(%arg0: i32) -> (i32, i32) {
    %c0_i32 = arith.constant 0 : i32
    %c0_i32_0 = arith.constant 0 : i32
    %c0_i32_1 = arith.constant 0 : i32
    return %c0_i32, %c0_i32_0 : i32, i32
  }
  func.func @transform_3(%arg0: i32) -> (i32, i32) {
    %c0_i32 = arith.constant 0 : i32
    %c0_i32_0 = arith.constant 0 : i32
    %c0_i32_1 = arith.constant 0 : i32
    return %c0_i32, %c0_i32_0 : i32, i32
  }
  func.func @transform_4(%arg0: i32) -> (i32, i32) {
    %c0_i32 = arith.constant 0 : i32
    %c0_i32_0 = arith.constant 0 : i32
    %c0_i32_1 = arith.constant 0 : i32
    return %c0_i32, %c0_i32_0 : i32, i32
  }
  func.func @transform_5(%arg0: i32) -> (i32, i32) {
    %c0_i32 = arith.constant 0 : i32
    %c0_i32_0 = arith.constant 0 : i32
    %c0_i32_1 = arith.constant 0 : i32
    return %c0_i32, %c0_i32_0 : i32, i32
  }
  func.func @transform_6(%arg0: i32) -> (i32, i32) {
    %c0_i32 = arith.constant 0 : i32
    %c0_i32_0 = arith.constant 0 : i32
    %c0_i32_1 = arith.constant 0 : i32
    return %c0_i32, %c0_i32_0 : i32, i32
  }
  func.func @transform_7(%arg0: i32) -> (i32, i32) {
    %c0_i32 = arith.constant 0 : i32
    %c0_i32_0 = arith.constant 0 : i32
    %c0_i32_1 = arith.constant 0 : i32
    return %c0_i32, %c0_i32_0 : i32, i32
  }
}

</mosaic_0001>

<bundles_post_ra>
// kernel: tpu_custom_call.1
= control target key start
LH: loop header
LB: loop body
LE: loop exit
PB: predicated region body
PF: predicated region fallthrough
CT: control target
= control target key end

     0   :  { %13 = vsyncpa [#allocation3], 0  ;;  %s4939_s0 = inlined_call_operand.hbm [shape: f32[128,128], index: 0, kind: input, shape index: {}]   ;;  %s4940_s1 = inlined_call_operand.hbm [shape: f32[128,128], index: 1, kind: input, shape index: {}]   ;;  %s4941_s2 = inlined_call_operand.hbm [shape: f32[128,128], index: 2, kind: input, shape index: {}]   ;;  %s4942_s3 = inlined_call_operand.hbm [shape: s32[128,128], index: 3, kind: output, shape index: {0}]   ;;  %s4943_s4 = inlined_call_operand.hbm [shape: s32[128,128], index: 4, kind: output, shape index: {1}]   ;;  %s4944_s5 = inlined_call_operand.hbm [shape: f32[128,128], index: 5, kind: output, shape index: {2}]   ;;  %s4945_s6 = inlined_call_operand.hbm [shape: s32[1,1], index: 6, kind: output, shape index: {3}]   ;;  %s4946_s7 = inlined_call_operand.hbm [shape: s32[1,1], index: 7, kind: output, shape index: {4}]  }
   0x1   :  { %14 = vsyncpa [#allocation6], 0 }
   0x2   :  { %15 = vsyncpa [#allocation4], 0 }
   0x3   :  { %16 = vsyncpa [#allocation10], 0 }
   0x4   :  { %17 = vsyncpa [#allocation13], 0  ;;  %s2596_s24 = smov [#allocation5]   ;;  %s2597_s26 = smov [#allocation2]  }
   0x5   :  { %s35_s25 = sshll.u32 %s2596_s24, 4  ;;  %s23_s27 = sshll.u32 %s2597_s26, 4  ;;  %s36_s25 = int_to_ptr.vmem [resolvable:$true] %s35_s25  ;;  %s24_s27 = int_to_ptr.vmem [resolvable:$true] %s23_s27 }
   0x6   :  { %s2298_s28 = scalar_lea.vmem %s36_s25, 2048  ;;  %p2303_p1 = scmp.lt.s32.totalorder %s36_s25, %s36_s25 }
   0x7   :  { %p2299_p0 = scmp.ne.s32.totalorder %s36_s25, %s2298_s28  ;;  %p2304_p2 = scmp.lt.s32.totalorder %s2298_s28, %s2298_s28 }
   0x9   :  { %p2305_p3 = por %p2304_p2, %p2303_p1 }
   0xb   :  { %p2306_p4 = pnand %p2305_p3, %p2299_p0 }
   0xd   :  { %2309 = shalt.err (!%p2306_p4)
}
   0xe   :  { %s2598_s29 = smov 128   ;;  %s2599_s30 = smov 8  }
   0xf   :  { %41 = dma.hbm_to_vmem [thread:$0]  %s4940_s1, 2048, %s36_s25, [#allocation6], %s2598_s29, %s2598_s29, %s2599_s30  }
  0x10   :  { %s2318_s10 = scalar_lea.vmem %s24_s27, 2048  ;;  %p2323_p6 = scmp.lt.s32.totalorder %s24_s27, %s24_s27 }
  0x11   :  { %p2319_p5 = scmp.ne.s32.totalorder %s24_s27, %s2318_s10  ;;  %p2324_p7 = scmp.lt.s32.totalorder %s2318_s10, %s2318_s10 }
  0x13   :  { %p2325_p8 = por %p2324_p7, %p2323_p6 }
  0x15   :  { %p2326_p9 = pnand %p2325_p8, %p2319_p5 }
  0x17   :  { %2329 = shalt.err (!%p2326_p9)
}
  0x18   :  { %29 = dma.hbm_to_vmem [thread:$0]  %s4939_s0, 2048, %s24_s27, [#allocation3], %s2598_s29, %s2598_s29, %s2599_s30  }
  0x19   :  { %s2600_s13 = smov [#allocation7]  }
  0x1a   :  { %s47_s14 = sshll.u32 %s2600_s13, 4  ;;  %s48_s14 = int_to_ptr.vmem [resolvable:$true] %s47_s14 }
  0x1b   :  { %s2338_s15 = scalar_lea.vmem %s48_s14, 2048  ;;  %p2343_p11 = scmp.lt.s32.totalorder %s48_s14, %s48_s14 }
  0x1c   :  { %p2339_p10 = scmp.ne.s32.totalorder %s48_s14, %s2338_s15  ;;  %p2344_p12 = scmp.lt.s32.totalorder %s2338_s15, %s2338_s15 }
  0x1e   :  { %p2345_p13 = por %p2344_p12, %p2343_p11 }
  0x20   :  { %p2346_p0 = pnand %p2345_p13, %p2339_p10 }
  0x22   :  { %2349 = shalt.err (!%p2346_p0)
}
  0x23   :  { %53 = dma.hbm_to_vmem [thread:$0]  %s4941_s2, 2048, %s48_s14, [#allocation6], %s2598_s29, %s2598_s29, %s2599_s30  }
  0x24   :  { %2518 = dma.done.wait [#allocation3], 2048  }
  0x25   :  { %2519 = vsyncadd [#allocation3], 4294965248 }
  0x26   :  { %2520 = dma.done.wait [#allocation6], 4096  }
  0x27   :  { %2521 = vsyncadd [#allocation6], 4294963200  ;;  %v79_v0 = vlaneseq  ;;  %v64_v2 = vld [vmem:[#allocation2 + $0x8] sm:$0xff]  ;;  %v2673_v3 = vld [vmem:[#allocation2 + $0x10] sm:$0xff]  ;;  %s2601_s0 = smov 1   ;;  %s2602_s2 = smov 127  }
  0x28   :  { %v66_v4 = vld [vmem:[#allocation2 + $0x18] sm:$0xff]  ;;  %v165_v5 = vrot.slane %v64_v2, 7  ;;  %v166_v6 = vrot.slane %v2673_v3, 7  ;;  %v247_v7 = vrot.slane %v2673_v3, 1  ;;  %v2679_v9 = vld [vmem:[#allocation2] sm:$0xff]  ;;  %v246_v12 = vrot.slane %v64_v2, 1 }
  0x29   :  { %v2671_v1 = vshrl.u32 %v79_v0, 7  ;;  %v248_v8 = vrot.slane %v66_v4, 1  ;;  %v67_v10 = vld [vmem:[#allocation2 + $0x20] sm:$0xff]  ;;  %v164_v11 = vrot.slane %v2679_v9, 7  ;;  %v167_v13 = vrot.slane %v66_v4, 7  ;;  %v68_v15 = vld [vmem:[#allocation2 + $0x28] sm:$0xff] }
  0x2a   :  { %v249_v14 = vrot.slane %v67_v10, 1  ;;  %v168_v18 = vrot.slane %v67_v10, 7  ;;  %v250_v19 = vrot.slane %v68_v15, 1  ;;  %v69_v20 = vld [vmem:[#allocation2 + $0x30] sm:$0xff]  ;;  %v2697_v25 = vld [vmem:[#allocation2 + $0x38] sm:$0xff]  ;;  %v2699_v26 = vld [vmem:[#allocation2 + $0x40] sm:$0xff] }
  0x2b   :  { %5048 = vst [vmem:[#allocation20_spill] sm:$0xff] %v2671_v1  ;;  %vm4978_vm0 = vcmp.lt.s32.totalorder %v2671_v1, 1  ;;  %vm4977_vm1 = vcmp.lt.s32.totalorder %v2671_v1, 7  ;;  %v2711_v31 = vld [vmem:[#allocation2 + $0x78] sm:$0xff]  ;;  %v169_v34 = vrot.slane %v68_v15, 7  ;;  %v251_v35 = vrot.slane %v69_v20, 1 }
  0x2c   :  { %v194_v16 = vsel %vm4978_vm0, %v165_v5, %v166_v6  ;;  %v2686_v17 = vsel %vm4977_vm1, %v247_v7, %v248_v8  ;;  %v195_v22 = vsel %vm4978_vm0, %v164_v11, %v165_v5  ;;  %v275_v23 = vsel %vm4977_vm1, %v246_v12, %v247_v7  ;;  %s3821_s17 = smov 0  }
  0x2d   :  { %v2689_v21 = vsub.f32 %v2686_v17, %v194_v16  ;;  %v193_v24 = vsel %vm4978_vm0, %v166_v6, %v167_v13  ;;  %v2701_v27 = vsub.f32 %v275_v23, %v195_v22  ;;  %v273_v28 = vsel %vm4977_vm1, %v248_v8, %v249_v14  ;;  %v2784_v8 = vld [vmem:[#allocation2 + $0x60] sm:$0xff] }
  0x2e   :  { %v192_v29 = vsel %vm4978_vm0, %v167_v13, %v168_v18  ;;  %v2709_v30 = vsel %vm4977_vm1, %v249_v14, %v250_v19  ;;  %v2715_v32 = vsub.f32 %v273_v28, %v193_v24  ;;  %v170_v36 = vrot.slane %v69_v20, 7 }
  0x2f   :  { %442 = vrot.lane.b32.xlu1 %v2689_v21, %s2601_s0  ;;  %v2718_v33 = vsub.f32 %v2709_v30, %v192_v29  ;;  %440 = vrot.lane.b32.xlu0 %v2701_v27, %s2601_s0  ;;  %v252_v37 = vrot.slane %v2697_v25, 1  ;;  %v171_v38 = vrot.slane %v2697_v25, 7  ;;  %v253_v39 = vrot.slane %v2699_v26, 1 }
  0x30   :  { %v191_v40 = vsel %vm4978_vm0, %v168_v18, %v169_v34  ;;  %v271_v41 = vsel %vm4977_vm1, %v250_v19, %v251_v35  ;;  %v179_v42 = vrot.slane %v2711_v31, 7  ;;  %v245_v43 = vrot.slane %v2679_v9, 1 }
  0x31   :  { %v190_v44 = vsel %vm4978_vm0, %v169_v34, %v170_v36  ;;  %v270_v45 = vsel %vm4977_vm1, %v251_v35, %v252_v37  ;;  %vm4976_vm2 = vcmp.eq.s32.totalorder %v2671_v1, 0  ;;  %v2738_v46 = vsub.f32 %v271_v41, %v191_v40 }
  0x32   :  { %v189_v47 = vsel %vm4978_vm0, %v170_v36, %v171_v38  ;;  %v196_v48 = vsel %vm4978_vm0, %v179_v42, %v164_v11  ;;  %v2750_v49 = vsub.f32 %v270_v45, %v190_v44  ;;  %v269_v50 = vsel %vm4977_vm1, %v252_v37, %v253_v39 }
  0x33   :  { %444 = vrot.lane.b32.xlu1 %v2715_v32, %s2601_s0  ;;  %446 = vrot.lane.b32.xlu0 %v2718_v33, %s2601_s0  ;;  %v213_v51 = vmul.f32 2.0, %v2679_v9  ;;  %v214_v52 = vmul.f32 2.0, %v64_v2  ;;  %v197_v53 = vsel %vm4976_vm2, %v2679_v9, %v196_v48  ;;  %v276_v54 = vsel %vm4977_vm1, %v245_v43, %v246_v12 }
  0x34   :  { %v2766_v55 = vsub.f32 %v269_v50, %v189_v47  ;;  %v215_v57 = vmul.f32 2.0, %v2673_v3  ;;  %v216_v58 = vmul.f32 2.0, %v66_v4  ;;  %v2771_v59 = vsub.f32 %v276_v54, %v197_v53  ;;  %v2782_v4 = vld [vmem:[#allocation2 + $0x58] sm:$0xff] }
  0x35   :  { %v230_v56 = vadd.f32 %v214_v52, %v195_v22  ;;  %v229_v60 = vadd.f32 %v213_v51, %v197_v53  ;;  %v217_v61 = vmul.f32 2.0, %v67_v10  ;;  %v218_v62 = vmul.f32 2.0, %v68_v15  ;;  %v76_v10 = vld [vmem:[#allocation2 + $0x68] sm:$0xff] }
  0x36   :  { %v219_v63 = vmul.f32 2.0, %v69_v20  ;;  %v231_v5 = vadd.f32 %v215_v57, %v194_v16  ;;  %v232_v6 = vadd.f32 %v216_v58, %v193_v24  ;;  %v220_v7 = vmul.f32 2.0, %v2697_v25  ;;  %v77_v24 = vld [vmem:[#allocation2 + $0x70] sm:$0xff] }
  0x37   :  { %448 = vrot.lane.b32.xlu1 %v2738_v46, %s2601_s0  ;;  %450 = vrot.lane.b32.xlu0 %v2750_v49, %s2601_s0  ;;  %v2775_v2 = vadd.f32 %v275_v23, %v230_v56  ;;  %v2780_v3 = vadd.f32 %v276_v54, %v229_v60  ;;  %v233_v11 = vadd.f32 %v217_v61, %v192_v29  ;;  %v2787_v13 = vadd.s32 120, %v2671_v1 }
  0x38   :  { %v234_v12 = vadd.f32 %v218_v62, %v191_v40  ;;  %v2792_v14 = vadd.f32 %v2686_v17, %v231_v5  ;;  %v2794_v15 = vadd.f32 %v273_v28, %v232_v6  ;;  %v235_v16 = vadd.f32 %v219_v63, %v190_v44 }
  0x39   :  { %5049 = vst [vmem:[#allocation21_spill] sm:$0xff] %v2787_v13  ;;  %v236_v18 = vadd.f32 %v220_v7, %v189_v47  ;;  %v175_v19 = vrot.slane %v2782_v4, 7  ;;  %v257_v20 = vrot.slane %v2784_v8, 1  ;;  %v176_v22 = vrot.slane %v2784_v8, 7 }
  0x3a   :  { %v258_v23 = vrot.slane %v76_v10, 1  ;;  %v177_v29 = vrot.slane %v76_v10, 7  ;;  %vm4975_vm3 = vcmp.eq.s32.totalorder %v2787_v13, 127  ;;  %v2813_v34 = vadd.f32 %v2709_v30, %v233_v11  ;;  %v73_v11 = vld [vmem:[#allocation2 + $0x50] sm:$0xff] }
  0x3b   :  { %452 = vrot.lane.b32.xlu1 %v2766_v55, %s2601_s0  ;;  %438 = vrot.lane.b32.xlu0 %v2771_v59, %s2601_s0  ;;  %v184_v17 = vsel %vm4978_vm0, %v175_v19, %v176_v22  ;;  %v2815_v35 = vadd.f32 %v271_v41, %v234_v12  ;;  %v2817_v36 = vadd.f32 %v270_v45, %v235_v16  ;;  %v259_v47 = vrot.slane %v77_v24, 1 }
  0x3c   :  { %v264_v28 = vsel %vm4977_vm1, %v257_v20, %v258_v23  ;;  %v2823_v40 = vadd.f32 %v269_v50, %v236_v18  ;;  %v183_v44 = vsel %vm4978_vm0, %v176_v22, %v177_v29  ;;  %v178_v48 = vrot.slane %v77_v24, 7 }
  0x3d   :  { %v2819_v37 = vsub.f32 %v264_v28, %v184_v17  ;;  %v260_v51 = vrot.slane %v2711_v31, 1  ;;  %v225_v30 = vmul.f32 2.0, %v2784_v8  ;;  %v226_v41 = vmul.f32 2.0, %v76_v10 }
  0x3e   :  { %v227_v52 = vmul.f32 2.0, %v77_v24  ;;  %v263_v45 = vsel %vm4977_vm1, %v258_v23, %v259_v47  ;;  %v182_v53 = vsel %vm4978_vm0, %v177_v29, %v178_v48  ;;  %v181_v50 = vsel %vm4978_vm0, %v178_v48, %v179_v42 }
  0x3f   :  { %312 = vrot.lane.b32.xlu1 %v2775_v2, %s2602_s2  ;;  %310 = vrot.lane.b32.xlu0 %v2780_v3, %s2602_s2  ;;  %5050 = vst [vmem:[#allocation22_spill] sm:$0xff] %v2819_v37  ;;  %v228_v54 = vmul.f32 2.0, %v2711_v31  ;;  %v2840_v56 = vsub.f32 %v263_v45, %v183_v44  ;;  %v262_v57 = vsel %vm4977_vm1, %v259_v47, %v260_v51  ;;  %v172_v12 = vrot.slane %v2699_v26, 7 }
  0x40   :  { %v277_v58 = vsel %vm4977_vm1, %v260_v51, %v245_v43  ;;  %v241_v60 = vadd.f32 %v225_v30, %v184_v17  ;;  %v2850_v42 = vsub.f32 %v262_v57, %v182_v53  ;;  %v242_v62 = vadd.f32 %v226_v41, %v183_v44 }
  0x41   :  { %5051 = vst [vmem:[#allocation23_spill] sm:$0xff] %v2840_v56  ;;  %v293_v61 = vsel %vm4975_vm3, %v2711_v31, %v277_v58  ;;  %v243_v63 = vadd.f32 %v227_v52, %v182_v53  ;;  %v244_v9 = vadd.f32 %v228_v54, %v181_v50  ;;  %v72_v31 = vld [vmem:[#allocation2 + $0x48] sm:$0xff]  ;;  %v255_v22 = vrot.slane %v73_v11, 1 }
  0x42   :  { %5052 = vst [vmem:[#allocation24_spill] sm:$0xff] %v2850_v42  ;;  %v2855_v5 = vsub.f32 %v293_v61, %v181_v50  ;;  %v2857_v6 = vadd.f32 %v264_v28, %v241_v60  ;;  %v2859_v7 = vadd.f32 %v263_v45, %v242_v62  ;;  %v254_v16 = vrot.slane %v72_v31, 1 }
  0x43   :  { %316 = vrot.lane.b32.xlu1 %v2794_v15, %s2602_s2  ;;  %314 = vrot.lane.b32.xlu0 %v2792_v14, %s2602_s2  ;;  %v2861_v43 = vadd.f32 %v262_v57, %v243_v63  ;;  %v2865_v10 = vadd.f32 %v293_v61, %v244_v9  ;;  %v173_v18 = vrot.slane %v72_v31, 7  ;;  %v174_v17 = vrot.slane %v73_v11, 7 }
  0x44   :  { %5053 = vst [vmem:[#allocation25_spill] sm:$0xff] %v2855_v5  ;;  %5054 = vst [vmem:[#allocation26_spill] sm:$0xff] %v2857_v6  ;;  %v267_v24 = vsel %vm4977_vm1, %v254_v16, %v255_v22  ;;  %v256_v28 = vrot.slane %v2782_v4, 1  ;;  %v188_v29 = vsel %vm4978_vm0, %v171_v38, %v172_v12  ;;  %v268_v44 = vsel %vm4977_vm1, %v253_v39, %v254_v16 }
  0x45   :  { %5055 = vst [vmem:[#allocation27_spill] sm:$0xff] %v2859_v7  ;;  %5056 = vst [vmem:[#allocation28_spill] sm:$0xff] %v2861_v43  ;;  %v187_v23 = vsel %vm4978_vm0, %v172_v12, %v173_v18  ;;  %v2901_v48 = vsub.f32 %v268_v44, %v188_v29  ;;  %v185_v25 = vsel %vm4978_vm0, %v174_v17, %v175_v19  ;;  %v222_v8 = vmul.f32 2.0, %v72_v31 }
  0x46   :  { %5057 = vst [vmem:[#allocation29_spill] sm:$0xff] %v2865_v10  ;;  %v2897_v47 = vsub.f32 %v267_v24, %v187_v23  ;;  %v265_v38 = vsel %vm4977_vm1, %v256_v28, %v257_v20  ;;  %v186_v39 = vsel %vm4978_vm0, %v173_v18, %v174_v17  ;;  %v266_v51 = vsel %vm4977_vm1, %v255_v22, %v256_v28 }
  0x47   :  { %320 = vrot.lane.b32.xlu1 %v2815_v35, %s2602_s2  ;;  %318 = vrot.lane.b32.xlu0 %v2813_v34, %s2602_s2  ;;  %v2917_v30 = vsub.f32 %v265_v38, %v185_v25  ;;  %v2921_v19 = vsub.f32 %v266_v51, %v186_v39  ;;  %v221_v20 = vmul.f32 2.0, %v2699_v26  ;;  %v238_v41 = vadd.f32 %v222_v8, %v187_v23 }
  0x48   :  { %v224_v52 = vmul.f32 2.0, %v2782_v4  ;;  %v223_v53 = vmul.f32 2.0, %v73_v11  ;;  %v491_v13 = vmul.f32 2.0, %v2738_v46  ;;  %v492_v1 = vmul.f32 2.0, %v2750_v49 }
  0x49   :  { %5058 = vst [vmem:[#allocation30_spill] sm:$0xff] %v2921_v19  ;;  %v237_v45 = vadd.f32 %v221_v20, %v188_v29  ;;  %v2943_v50 = vadd.f32 %v267_v24, %v238_v41  ;;  %v3012_v20 = vand.u32 127, %v79_v0  ;;  %v493_v0 = vmul.f32 2.0, %v2766_v55 }
  0x4a   :  { %v240_v54 = vadd.f32 %v224_v52, %v185_v25  ;;  %v239_v57 = vadd.f32 %v223_v53, %v186_v39  ;;  %v487_v53 = vmul.f32 2.0, %v2701_v27 }
  0x4b   :  { %324 = vrot.lane.b32.xlu1 %v2823_v40, %s2602_s2  ;;  %322 = vrot.lane.b32.xlu0 %v2817_v36, %s2602_s2  ;;  %v2947_v26 = vadd.f32 %v268_v44, %v237_v45  ;;  %vm4982_vm4 = vcmp.eq.s32.totalorder %v3012_v20, 0  ;;  %v488_v45 = vmul.f32 2.0, %v2689_v21  ;;  %vm4981_vm5 = vcmp.eq.s32.totalorder %v3012_v20, 127 }
  0x4c   :  { %v2951_v4 = vadd.f32 %v265_v38, %v240_v54  ;;  %v2955_v58 = vadd.f32 %v266_v51, %v239_v57  ;;  %v489_v54 = vmul.f32 2.0, %v2715_v32  ;;  %v490_v57 = vmul.f32 2.0, %v2718_v33 }
  0x4d   :  { %5059 = vst [vmem:[#allocation31_spill] sm:$0xff] %v2947_v26 }
  0x4e   :  { %5060 = vst [vmem:[#allocation32_spill] sm:$0xff] %v2951_v4  ;;  %5061 = vst [vmem:[#allocation33_spill] sm:$0xff] %v2955_v58 }
  0x4f   :  { %360 = vrot.lane.b32.xlu1 %v2775_v2, %s2601_s0  ;;  %358 = vrot.lane.b32.xlu0 %v2780_v3, %s2601_s0 }
  0x53   :  { %364 = vrot.lane.b32.xlu1 %v2794_v15, %s2601_s0  ;;  %362 = vrot.lane.b32.xlu0 %v2792_v14, %s2601_s0 }
  0x57   :  { %368 = vrot.lane.b32.xlu1 %v2815_v35, %s2601_s0  ;;  %366 = vrot.lane.b32.xlu0 %v2813_v34, %s2601_s0 }
  0x5b   :  { %372 = vrot.lane.b32.xlu1 %v2823_v40, %s2601_s0  ;;  %370 = vrot.lane.b32.xlu0 %v2817_v36, %s2601_s0 }
  0x5f   :  { %456 = vrot.lane.b32.xlu1 %v2897_v47, %s2601_s0  ;;  %454 = vrot.lane.b32.xlu0 %v2901_v48, %s2601_s0 }
  0x63   :  { %460 = vrot.lane.b32.xlu1 %v2917_v30, %s2601_s0  ;;  %458 = vrot.lane.b32.xlu0 %v2921_v19, %s2601_s0 }
  0x67   :  { %520 = vrot.lane.b32.xlu1 %v2701_v27, %s2602_s2  ;;  %518 = vrot.lane.b32.xlu0 %v2771_v59, %s2602_s2 }
  0x6b   :  { %524 = vrot.lane.b32.xlu1 %v2715_v32, %s2602_s2  ;;  %522 = vrot.lane.b32.xlu0 %v2689_v21, %s2602_s2 }
  0x6f   :  { %528 = vrot.lane.b32.xlu1 %v2738_v46, %s2602_s2  ;;  %526 = vrot.lane.b32.xlu0 %v2718_v33, %s2602_s2 }
  0x73   :  { %532 = vrot.lane.b32.xlu1 %v2766_v55, %s2602_s2  ;;  %530 = vrot.lane.b32.xlu0 %v2750_v49, %s2602_s2 }
  0x77   :  { %328 = vrot.lane.b32.xlu1 %v2943_v50, %s2602_s2  ;;  %326 = vrot.lane.b32.xlu0 %v2947_v26, %s2602_s2 }
  0x7b   :  { %332 = vrot.lane.b32.xlu1 %v2951_v4, %s2602_s2  ;;  %330 = vrot.lane.b32.xlu0 %v2955_v58, %s2602_s2 }
  0x7f   :  { %376 = vrot.lane.b32.xlu1 %v2943_v50, %s2601_s0  ;;  %374 = vrot.lane.b32.xlu0 %v2947_v26, %s2601_s0 }
  0x83   :  { %380 = vrot.lane.b32.xlu1 %v2951_v4, %s2601_s0  ;;  %378 = vrot.lane.b32.xlu0 %v2955_v58, %s2601_s0 }
  0x87   :  { %464 = vrot.lane.b32.xlu1 %v2840_v56, %s2601_s0  ;;  %462 = vrot.lane.b32.xlu0 %v2819_v37, %s2601_s0 }
  0x8b   :  { %468 = vrot.lane.b32.xlu1 %v2855_v5, %s2601_s0  ;;  %466 = vrot.lane.b32.xlu0 %v2850_v42, %s2601_s0 }
  0x8f   :  { %536 = vrot.lane.b32.xlu1 %v2897_v47, %s2602_s2  ;;  %534 = vrot.lane.b32.xlu0 %v2901_v48, %s2602_s2 }
  0x93   :  { %540 = vrot.lane.b32.xlu1 %v2917_v30, %s2602_s2  ;;  %538 = vrot.lane.b32.xlu0 %v2921_v19, %s2602_s2 }
  0x97   :  { %336 = vrot.lane.b32.xlu1 %v2859_v7, %s2602_s2  ;;  %334 = vrot.lane.b32.xlu0 %v2857_v6, %s2602_s2 }
  0x9b   :  { %340 = vrot.lane.b32.xlu1 %v2865_v10, %s2602_s2  ;;  %338 = vrot.lane.b32.xlu0 %v2861_v43, %s2602_s2 }
  0x9f   :  { %384 = vrot.lane.b32.xlu1 %v2859_v7, %s2601_s0  ;;  %382 = vrot.lane.b32.xlu0 %v2857_v6, %s2601_s0 }
  0xa1   :  { %v443_v60 = vpop.permute.xlu1 %442  ;;  %v441_v61 = vpop.permute.xlu0 %440 }
  0xa2   :  { %v471_v6 = vsel %vm4982_vm4, %v2701_v27, %v441_v61 }
  0xa3   :  { %388 = vrot.lane.b32.xlu1 %v2865_v10, %s2601_s0  ;;  %386 = vrot.lane.b32.xlu0 %v2861_v43, %s2601_s0  ;;  %v472_v10 = vsel %vm4982_vm4, %v2689_v21, %v443_v60 }
  0xa4   :  { %v504_v4 = vadd.f32 %v488_v45, %v472_v10 }
  0xa5   :  { %v445_v62 = vpop.permute.xlu1 %444  ;;  %v447_v63 = vpop.permute.xlu0 %446 }
  0xa6   :  { %v473_v7 = vsel %vm4982_vm4, %v2715_v32, %v445_v62 }
  0xa7   :  { %544 = vrot.lane.b32.xlu1 %v2840_v56, %s2602_s2  ;;  %542 = vrot.lane.b32.xlu0 %v2819_v37, %s2602_s2  ;;  %v474_v56 = vsel %vm4982_vm4, %v2718_v33, %v447_v63  ;;  %v503_v63 = vadd.f32 %v487_v53, %v471_v6  ;;  %v505_v58 = vadd.f32 %v489_v54, %v473_v7 }
  0xa8   :  { %v3061_v26 = vadd.f32 %v490_v57, %v474_v56 }
  0xa9   :  { %v449_v9 = vpop.permute.xlu1 %448  ;;  %v451_v31 = vpop.permute.xlu0 %450 }
  0xaa   :  { %v475_v60 = vsel %vm4982_vm4, %v2738_v46, %v449_v9  ;;  %v476_v61 = vsel %vm4982_vm4, %v2750_v49, %v451_v31 }
  0xab   :  { %548 = vrot.lane.b32.xlu1 %v2855_v5, %s2602_s2  ;;  %546 = vrot.lane.b32.xlu0 %v2850_v42, %s2602_s2  ;;  %v486_v42 = vmul.f32 2.0, %v2771_v59  ;;  %v507_v31 = vadd.f32 %v491_v13, %v475_v60  ;;  %v3071_v6 = vadd.f32 %v492_v1, %v476_v61 }
  0xad   :  { %v453_v11 = vpop.permute.xlu1 %452  ;;  %v439_v12 = vpop.permute.xlu0 %438 }
  0xae   :  { %v477_v62 = vsel %vm4982_vm4, %v2766_v55, %v453_v11  ;;  %v470_v37 = vsel %vm4982_vm4, %v2771_v59, %v439_v12 }
  0xaf   :  { %v3073_v7 = vadd.f32 %v493_v0, %v477_v62 }
  0xb1   :  { %v313_v16 = vpop.permute.xlu1 %312  ;;  %v311_v18 = vpop.permute.xlu0 %310 }
  0xb2   :  { %v343_v56 = vsel %vm4981_vm5, %v2775_v2, %v313_v16  ;;  %v342_v13 = vsel %vm4981_vm5, %v2780_v3, %v311_v18 }
  0xb5   :  { %v317_v22 = vpop.permute.xlu1 %316  ;;  %v315_v23 = vpop.permute.xlu0 %314 }
  0xb9   :  { %v321_v24 = vpop.permute.xlu1 %320  ;;  %v319_v17 = vpop.permute.xlu0 %318 }
  0xba   :  { %v347_v16 = vsel %vm4981_vm5, %v2815_v35, %v321_v24 }
  0xbd   :  { %v325_v28 = vpop.permute.xlu1 %324  ;;  %v3009_v29 = vpop.permute.xlu0 %322 }
  0xc1   :  { %v361_v44 = vpop.permute.xlu1 %360  ;;  %v359_v25 = vpop.permute.xlu0 %358 }
  0xc2   :  { %v391_v9 = vsel %vm4982_vm4, %v2775_v2, %v361_v44  ;;  %v390_v11 = vsel %vm4982_vm4, %v2780_v3, %v359_v25  ;;  %v502_v44 = vadd.f32 %v486_v42, %v470_v37  ;;  %v345_v25 = vsel %vm4981_vm5, %v2794_v15, %v317_v22 }
  0xc3   :  { %v406_v45 = vsub.f32 %v342_v13, %v390_v11  ;;  %v346_v42 = vsel %vm4981_vm5, %v2813_v34, %v319_v17 }
  0xc5   :  { %v365_v38 = vpop.permute.xlu1 %364  ;;  %v363_v39 = vpop.permute.xlu0 %362 }
  0xc6   :  { %v393_v12 = vsel %vm4982_vm4, %v2794_v15, %v365_v38  ;;  %v407_v38 = vsub.f32 %v343_v56, %v391_v9  ;;  %v392_v1 = vsel %vm4982_vm4, %v2792_v14, %v363_v39  ;;  %v344_v15 = vsel %vm4981_vm5, %v2792_v14, %v315_v23 }
  0xc7   :  { %v409_v53 = vsub.f32 %v345_v25, %v393_v12  ;;  %v349_v39 = vsel %vm4981_vm5, %v2823_v40, %v325_v28 }
  0xc9   :  { %v369_v51 = vpop.permute.xlu1 %368  ;;  %v367_v8 = vpop.permute.xlu0 %366  ;;  %v585_v54 = vmul.f32 %v409_v53, %v409_v53 }
  0xca   :  { %v394_v37 = vsel %vm4982_vm4, %v2813_v34, %v367_v8  ;;  %v395_v2 = vsel %vm4982_vm4, %v2815_v35, %v369_v51  ;;  %v408_v51 = vsub.f32 %v344_v15, %v392_v1  ;;  %v348_v34 = vsel %vm4981_vm5, %v2817_v36, %v3009_v29 }
  0xcb   :  { %v410_v35 = vsub.f32 %v346_v42, %v394_v37  ;;  %v411_v24 = vsub.f32 %v347_v16, %v395_v2  ;;  %v582_v8 = vmul.f32 %v406_v45, %v406_v45 }
  0xcc   :  { %v584_v62 = vmul.f32 %v408_v51, %v408_v51 }
  0xcd   :  { %v3014_v41 = vpop.permute.xlu1 %372  ;;  %v3016_v52 = vpop.permute.xlu0 %370 }
  0xce   :  { %v396_v28 = vsel %vm4982_vm4, %v2817_v36, %v3016_v52  ;;  %v586_v36 = vmul.f32 %v410_v35, %v410_v35  ;;  %v3131_v52 = vmul.f32 %v411_v24, %v411_v24 }
  0xd1   :  { %v3026_v43 = vpop.permute.xlu1 %456  ;;  %v3038_v5 = vpop.permute.xlu0 %454 }
  0xd5   :  { %v3059_v19 = vpop.permute.xlu1 %460  ;;  %v3069_v10 = vpop.permute.xlu0 %458 }
  0xd9   :  { %v521_v3 = vpop.permute.xlu1 %520  ;;  %v519_v18 = vpop.permute.xlu0 %518 }
  0xda   :  { %v551_v22 = vsel %vm4981_vm5, %v2701_v27, %v521_v3  ;;  %v550_v14 = vsel %vm4981_vm5, %v2771_v59, %v519_v18  ;;  %v583_v27 = vmul.f32 %v407_v38, %v407_v38  ;;  %v397_v59 = vsel %vm4982_vm4, %v2823_v40, %v3014_v41 }
  0xdb   :  { %v567_v23 = vadd.f32 %v551_v22, %v503_v63  ;;  %v566_v17 = vadd.f32 %v550_v14, %v502_v44  ;;  %v412_v40 = vsub.f32 %v348_v34, %v396_v28  ;;  %v413_v41 = vsub.f32 %v349_v39, %v397_v59 }
  0xdd   :  { %v599_v57 = vmul.f32 %v567_v23, %v567_v23  ;;  %v525_v0 = vpop.permute.xlu1 %524  ;;  %v598_v60 = vmul.f32 %v566_v17, %v566_v17  ;;  %v523_v29 = vpop.permute.xlu0 %522 }
  0xde   :  { %v553_v61 = vsel %vm4981_vm5, %v2715_v32, %v525_v0  ;;  %v552_v63 = vsel %vm4981_vm5, %v2689_v21, %v523_v29 }
  0xdf   :  { %v569_v9 = vadd.f32 %v553_v61, %v505_v58  ;;  %v3129_v11 = vadd.f32 %v599_v57, %v583_v27  ;;  %v568_v12 = vadd.f32 %v552_v63, %v504_v4  ;;  %v3133_v44 = vadd.f32 %v598_v60, %v582_v8 }
  0xe0   :  { %v2603_v58 = vmov 0.0   ;;  %v4985_v4 = vmov 0   ;;  %v589_v8 = vmul.f32 %v413_v41, %v413_v41 }
  0xe1   :  { %v601_v56 = vmul.f32 %v569_v9, %v569_v9  ;;  %v529_v13 = vpop.permute.xlu1 %528  ;;  %vm5012_vm6 = vcmp.ne.f32.partialorder %v3129_v11, 0.0  ;;  %v600_v32 = vmul.f32 %v568_v12, %v568_v12  ;;  %v527_v25 = vpop.permute.xlu0 %526  ;;  %vm5047_vm8 = vcmp.ne.f32.partialorder %v3133_v44, 0.0  ;;  %v695_v12 = vld [vmem:[#allocation5 + $0x8] sm:$0xff] }
  0xe2   :  { %v555_v21 = vsel %vm4981_vm5, %v2738_v46, %v529_v13  ;;  %v3142_v38 = vsel %vm5012_vm6, 1.0, %v2603_v58  ;;  %v647_v1 = vsel %vm5012_vm6, 1, %v4985_v4  ;;  %v554_v45 = vsel %vm4981_vm5, %v2718_v33, %v527_v25 }
  0xe3   :  { %v571_v53 = vadd.f32 %v555_v21, %v507_v31  ;;  %vm711_vm7 = vcmp.gt.f32.partialorder %v3142_v38, 0.0  ;;  %663 = vst [vmem:[#allocation8 + $0x8] sm:$0xff] %v647_v1  ;;  %v570_v46 = vadd.f32 %v554_v45, %v3061_v26  ;;  %v3156_v2 = vadd.f32 %v600_v32, %v584_v62 }
  0xe4   :  { %v727_v37 = vsel %vm711_vm7, %v3142_v38, 1.0  ;;  %v646_v3 = vsel %vm5047_vm8, 1, %v4985_v4  ;;  %v3164_v31 = vsel %vm5047_vm8, 1.0, %v2603_v58  ;;  %v3166_v26 = vadd.f32 %v601_v56, %v585_v54 }
  0xe5   :  { %v603_v15 = vmul.f32 %v571_v53, %v571_v53  ;;  %v533_v33 = vpop.permute.xlu1 %532  ;;  %2224 = vrcp.f32 %v727_v37  ;;  %662 = vst [vmem:[#allocation8] sm:$0xff] %v646_v3  ;;  %v602_v42 = vmul.f32 %v570_v46, %v570_v46  ;;  %v531_v16 = vpop.permute.xlu0 %530  ;;  %vm5013_vm9 = vcmp.ne.f32.partialorder %v3156_v2, 0.0  ;;  %v696_v3 = vld [vmem:[#allocation5 + $0x10] sm:$0xff] }
  0xe6   :  { %v557_v18 = vsel %vm4981_vm5, %v2766_v55, %v533_v33  ;;  %vm710_vm10 = vcmp.gt.f32.partialorder %v3164_v31, 0.0  ;;  %v556_v22 = vsel %vm4981_vm5, %v2750_v49, %v531_v16  ;;  %v3180_v51 = vsel %vm5013_vm9, 1.0, %v2603_v58  ;;  %v694_v16 = vld [vmem:[#allocation5] sm:$0xff] }
  0xe7   :  { %v573_v39 = vadd.f32 %v557_v18, %v3073_v7  ;;  %v648_v14 = vsel %vm5013_vm9, 1, %v4985_v4  ;;  %v572_v55 = vadd.f32 %v556_v22, %v3071_v6  ;;  %vm712_vm11 = vcmp.gt.f32.partialorder %v3180_v51, 0.0 }
  0xe8   :  { %664 = vst [vmem:[#allocation8 + $0x10] sm:$0xff] %v648_v14  ;;  %v726_v49 = vsel %vm710_vm10, %v3164_v31, 1.0  ;;  %v3190_v23 = vadd.f32 %v602_v42, %v586_v36  ;;  %v728_v35 = vsel %vm712_vm11, %v3180_v51, 1.0  ;;  %vm5015_vm12 = vcmp.ne.f32.partialorder %v3166_v26, 0.0 }
  0xe9   :  { %v605_v7 = vmul.f32 %v573_v39, %v573_v39  ;;  %v3192_v34 = vpop.permute.xlu1 %328  ;;  %2226 = vrcp.f32 %v726_v49  ;;  %v588_v6 = vmul.f32 %v412_v40, %v412_v40  ;;  %v604_v24 = vmul.f32 %v572_v55, %v572_v55  ;;  %v3198_v17 = vpop.permute.xlu0 %326  ;;  %v698_v39 = vld [vmem:[#allocation5 + $0x20] sm:$0xff] }
  0xea   :  { %2228 = vrcp.f32 %v728_v35  ;;  %vm4980_vm13 = vcmp.ne.f32.partialorder %v3190_v23, 0.0  ;;  %v3212_v57 = vsel %vm5015_vm12, 1.0, %v2603_v58  ;;  %v649_v28 = vsel %vm5015_vm12, 1, %v4985_v4 }
  0xeb   :  { %v650_v27 = vsel %vm4980_vm13, 1, %v4985_v4  ;;  %v3207_v54 = vsel %vm4980_vm13, 1.0, %v2603_v58  ;;  %v3215_v0 = vadd.f32 %v604_v24, %v588_v6  ;;  %vm713_vm15 = vcmp.gt.f32.partialorder %v3212_v57, 0.0  ;;  %665 = vst [vmem:[#allocation8 + $0x18] sm:$0xff] %v649_v28  ;;  %v697_v6 = vld [vmem:[#allocation5 + $0x18] sm:$0xff] }
  0xec   :  { %666 = vst [vmem:[#allocation8 + $0x20] sm:$0xff] %v650_v27  ;;  %vm714_vm14 = vcmp.gt.f32.partialorder %v3207_v54, 0.0  ;;  %v729_v29 = vsel %vm713_vm15, %v3212_v57, 1.0  ;;  %v3230_v61 = vadd.f32 %v603_v15, %v3131_v52  ;;  %v3232_v62 = vadd.f32 %v605_v7, %v589_v8 }
  0xed   :  { %v3221_v59 = vpop.permute.xlu1 %332  ;;  %v730_v60 = vsel %vm714_vm14, %v3207_v54, 1.0  ;;  %v3234_v63 = vpop.permute.xlu0 %330  ;;  %vm4979_vm3 = vcmp.ne.f32.partialorder %v3215_v0, 0.0  ;;  %v494_v7 = vmul.f32 2.0, %v2901_v48  ;;  %v495_v35 = vmul.f32 2.0, %v2897_v47 }
  0xee   :  { %2230 = vrcp.f32 %v730_v60  ;;  %v652_v9 = vsel %vm4979_vm3, 1, %v4985_v4  ;;  %v3243_v36 = vsel %vm4979_vm3, 1.0, %v2603_v58  ;;  %vm5014_vm1 = vcmp.ne.f32.partialorder %v3230_v61, 0.0 }
  0xef   :  { %2232 = vrcp.f32 %v729_v29  ;;  %668 = vst [vmem:[#allocation8 + $0x30] sm:$0xff] %v652_v9  ;;  %vm716_vm2 = vcmp.gt.f32.partialorder %v3243_v36, 0.0  ;;  %vm5011_vm0 = vcmp.ne.f32.partialorder %v3232_v62, 0.0  ;;  %v3254_v41 = vsel %vm5014_vm1, 1.0, %v2603_v58 }
  0xf0   :  { %v732_v40 = vsel %vm716_vm2, %v3243_v36, 1.0  ;;  %v651_v56 = vsel %vm5014_vm1, 1, %v4985_v4  ;;  %v3262_v13 = vsel %vm5011_vm0, 1.0, %v2603_v58  ;;  %vm715_vm3 = vcmp.gt.f32.partialorder %v3254_v41, 0.0  ;;  %v5065_v36 = vld [vmem:[#allocation32_spill] sm:$0xff] }
  0xf1   :  { %v377_v52 = vpop.permute.xlu1 %376  ;;  %v375_v25 = vpop.permute.xlu0 %374  ;;  %2234 = vrcp.f32 %v732_v40  ;;  %667 = vst [vmem:[#allocation8 + $0x28] sm:$0xff] %v651_v56  ;;  %vm717_vm13 = vcmp.gt.f32.partialorder %v3262_v13, 0.0  ;;  %v731_v1 = vsel %vm715_vm3, %v3254_v41, 1.0  ;;  %v653_v53 = vsel %vm5011_vm0, 1, %v4985_v4 }
  0xf2   :  { %v2225_v32 = vpop.eup %2224  ;;  %2236 = vrcp.f32 %v731_v1  ;;  %v733_v45 = vsel %vm717_vm13, %v3262_v13, 1.0  ;;  %669 = vst [vmem:[#allocation8 + $0x38] sm:$0xff] %v653_v53  ;;  %v478_v8 = vsel %vm4982_vm4, %v2901_v48, %v3038_v5  ;;  %v479_v51 = vsel %vm4982_vm4, %v2897_v47, %v3026_v43  ;;  %v700_v5 = vld [vmem:[#allocation5 + $0x30] sm:$0xff] }
  0xf3   :  { %v745_v21 = vmul.f32 %v2225_v32, %v695_v12  ;;  %2238 = vrcp.f32 %v733_v45  ;;  %v497_v28 = vmul.f32 2.0, %v2917_v30  ;;  %v481_v60 = vsel %vm4982_vm4, %v2917_v30, %v3059_v19  ;;  %v5062_v12 = vld [vmem:[#allocation31_spill] sm:$0xff]  ;;  %v5063_v45 = vld [vmem:[#allocation30_spill] sm:$0xff] }
  0xf4   :  { %v399_v29 = vsel %vm4982_vm4, %v2943_v50, %v377_v52  ;;  %v398_v40 = vsel %vm4982_vm4, %v5062_v12, %v375_v25  ;;  %v510_v52 = vadd.f32 %v494_v7, %v478_v8  ;;  %v511_v1 = vadd.f32 %v495_v35, %v479_v51  ;;  %v699_v25 = vld [vmem:[#allocation5 + $0x28] sm:$0xff] }
  0xf5   :  { %v3275_v46 = vpop.permute.xlu1 %380  ;;  %v3279_v37 = vsel %vm711_vm7, %v745_v21, 3e+38  ;;  %v379_v33 = vpop.permute.xlu0 %378  ;;  %v496_v53 = vmul.f32 2.0, %v5063_v45  ;;  %v480_v31 = vsel %vm4982_vm4, %v5063_v45, %v3069_v10  ;;  %v350_v54 = vsel %vm4981_vm5, %v5062_v12, %v3198_v17 }
  0xf6   :  { %v2227_v15 = vpop.eup %2226  ;;  %792 = vmin.xlane.f32.xlu1 %v3279_v37  ;;  %v353_v51 = vsel %vm4981_vm5, %v5065_v36, %v3221_v59 }
  0xf7   :  { %v2229_v42 = vpop.eup %2228  ;;  %v743_v55 = vmul.f32 %v2227_v15, %v694_v16  ;;  %v513_v16 = vadd.f32 %v497_v28, %v481_v60 }
  0xf8   :  { %v747_v18 = vmul.f32 %v2229_v42, %v696_v3  ;;  %v351_v3 = vsel %vm4981_vm5, %v2943_v50, %v3192_v34 }
  0xf9   :  { %v3282_v22 = vpop.permute.xlu1 %464  ;;  %v3284_v14 = vpop.permute.xlu0 %462  ;;  %v3318_v56 = vsel %vm710_vm10, %v743_v55, 3e+38  ;;  %v5064_v55 = vld [vmem:[#allocation33_spill] sm:$0xff] }
  0xfa   :  { %v3288_v38 = vsel %vm712_vm11, %v747_v18, 3e+38  ;;  %v414_v18 = vsub.f32 %v350_v54, %v398_v40  ;;  %v352_v57 = vsel %vm4981_vm5, %v5064_v55, %v3234_v63 }
  0xfb   :  { %v2231_v49 = vpop.eup %2230  ;;  %794 = vmin.xlane.f32.xlu0 %v3288_v38 }
  0xfc   :  { %v2233_v24 = vpop.eup %2232  ;;  %v751_v27 = vmul.f32 %v2231_v49, %v698_v39  ;;  %v415_v39 = vsub.f32 %v351_v3, %v399_v29  ;;  %v400_v49 = vsel %vm4982_vm4, %v5064_v55, %v379_v33  ;;  %v590_v28 = vmul.f32 %v414_v18, %v414_v18 }
  0xfd   :  { %v3309_v9 = vpop.permute.xlu1 %468  ;;  %v3314_v43 = vpop.permute.xlu0 %466  ;;  %v749_v32 = vmul.f32 %v2233_v24, %v697_v6  ;;  %v512_v24 = vadd.f32 %v496_v53, %v480_v31  ;;  %v416_v29 = vsub.f32 %v352_v57, %v400_v49 }
  0xfe   :  { %v3322_v19 = vsel %vm714_vm14, %v751_v27, 3e+38  ;;  %v2235_v21 = vpop.eup %2234  ;;  %v591_v60 = vmul.f32 %v415_v39, %v415_v39 }
  0xff   :  { %790 = vmin.xlane.f32.xlu0 %v3318_v56  ;;  %798 = vmin.xlane.f32.xlu1 %v3322_v19  ;;  %v755_v15 = vmul.f32 %v2235_v21, %v700_v5  ;;  %v2237_v42 = vpop.eup %2236  ;;  %v3351_v50 = vsel %vm713_vm15, %v749_v32, 3e+38  ;;  %v592_v54 = vmul.f32 %v416_v29, %v416_v29 }
 0x100   :  { %v753_v34 = vmul.f32 %v2237_v42, %v699_v25  ;;  %v2239_v6 = vpop.eup %2238 }
 0x101   :  { %v537_v10 = vpop.permute.xlu1 %536  ;;  %v535_v7 = vpop.permute.xlu0 %534  ;;  %v3347_v35 = vsel %vm716_vm2, %v755_v15, 3e+38 }
 0x102   :  { %v559_v17 = vsel %vm4981_vm5, %v2897_v47, %v537_v10  ;;  %v558_v33 = vsel %vm4981_vm5, %v2901_v48, %v535_v7  ;;  %v701_v47 = vld [vmem:[#allocation5 + $0x38] sm:$0xff]  ;;  %v401_v48 = vsel %vm4982_vm4, %v5065_v36, %v3275_v46  ;;  %v3375_v59 = vsel %vm715_vm3, %v753_v34, 3e+38 }
 0x103   :  { %v575_v8 = vadd.f32 %v559_v17, %v511_v1  ;;  %802 = vmin.xlane.f32.xlu1 %v3347_v35  ;;  %796 = vmin.xlane.f32.xlu0 %v3351_v50  ;;  %v574_v27 = vadd.f32 %v558_v33, %v510_v52  ;;  %v757_v21 = vmul.f32 %v2239_v6, %v701_v47 }
 0x104   :  { %v417_v1 = vsub.f32 %v353_v51, %v401_v48  ;;  %v5066_v48 = vld [vmem:[#allocation22_spill] sm:$0xff] }
 0x105   :  { %v607_v5 = vmul.f32 %v575_v8, %v575_v8  ;;  %v541_v12 = vpop.permute.xlu1 %540  ;;  %v606_v40 = vmul.f32 %v574_v27, %v574_v27  ;;  %v539_v32 = vpop.permute.xlu0 %538  ;;  %v3388_v42 = vsel %vm717_vm13, %v757_v21, 3e+38  ;;  %v498_v27 = vmul.f32 2.0, %v5066_v48 }
 0x106   :  { %v561_v63 = vsel %vm4981_vm5, %v2917_v30, %v541_v12  ;;  %v560_v46 = vsel %vm4981_vm5, %v5063_v45, %v539_v32  ;;  %v482_v29 = vsel %vm4982_vm4, %v5066_v48, %v3284_v14  ;;  %v5068_v12 = vld [vmem:[#allocation25_spill] sm:$0xff] }
 0x107   :  { %v577_v52 = vadd.f32 %v561_v63, %v513_v16  ;;  %800 = vmin.xlane.f32.xlu0 %v3375_v59  ;;  %v3381_v53 = vadd.f32 %v607_v5, %v591_v60  ;;  %v576_v25 = vadd.f32 %v560_v46, %v512_v24  ;;  %v3383_v31 = vadd.f32 %v606_v40, %v590_v28  ;;  %v5067_v28 = vld [vmem:[#allocation23_spill] sm:$0xff]  ;;  %v5069_v63 = vld [vmem:[#allocation24_spill] sm:$0xff] }
 0x108   :  { %v593_v16 = vmul.f32 %v417_v1, %v417_v1  ;;  %v499_v60 = vmul.f32 2.0, %v5067_v28  ;;  %v483_v5 = vsel %vm4982_vm4, %v5067_v28, %v3282_v22  ;;  %v501_v40 = vmul.f32 2.0, %v5068_v12  ;;  %v5070_v46 = vld [vmem:[#allocation27_spill] sm:$0xff] }
 0x109   :  { %v609_v30 = vmul.f32 %v577_v52, %v577_v52  ;;  %v337_v3 = vpop.permute.xlu1 %336  ;;  %vm5008_vm2 = vcmp.ne.f32.partialorder %v3381_v53, 0.0  ;;  %v608_v41 = vmul.f32 %v576_v25, %v576_v25  ;;  %v335_v15 = vpop.permute.xlu0 %334  ;;  %vm5010_vm3 = vcmp.ne.f32.partialorder %v3383_v31, 0.0  ;;  %v5071_v25 = vld [vmem:[#allocation26_spill] sm:$0xff] }
 0x10a   :  { %v3394_v45 = vsel %vm5008_vm2, 1.0, %v2603_v58  ;;  %v654_v18 = vsel %vm5010_vm3, 1, %v4985_v4  ;;  %v3403_v13 = vsel %vm5010_vm3, 1.0, %v2603_v58  ;;  %v655_v55 = vsel %vm5008_vm2, 1, %v4985_v4 }
 0x10b   :  { %804 = vmin.xlane.f32.xlu0 %v3388_v42  ;;  %vm719_vm7 = vcmp.gt.f32.partialorder %v3394_v45, 0.0  ;;  %670 = vst [vmem:[#allocation8 + $0x40] sm:$0xff] %v654_v18  ;;  %vm718_vm10 = vcmp.gt.f32.partialorder %v3403_v13, 0.0  ;;  %v3413_v49 = vadd.f32 %v608_v41, %v592_v54  ;;  %671 = vst [vmem:[#allocation8 + $0x48] sm:$0xff] %v655_v55  ;;  %v3418_v17 = vadd.f32 %v609_v30, %v593_v16  ;;  %v703_v16 = vld [vmem:[#allocation5 + $0x48] sm:$0xff] }
 0x10c   :  { %v735_v39 = vsel %vm719_vm7, %v3394_v45, 1.0  ;;  %v734_v7 = vsel %vm718_vm10, %v3403_v13, 1.0  ;;  %v500_v21 = vmul.f32 2.0, %v5069_v63  ;;  %v485_v1 = vsel %vm4982_vm4, %v5068_v12, %v3309_v9 }
 0x10d   :  { %v341_v10 = vpop.permute.xlu1 %340  ;;  %2240 = vrcp.f32 %v735_v39  ;;  %v339_v34 = vpop.permute.xlu0 %338  ;;  %vm5007_vm11 = vcmp.ne.f32.partialorder %v3413_v49, 0.0  ;;  %vm5006_vm13 = vcmp.ne.f32.partialorder %v3418_v17, 0.0  ;;  %v484_v22 = vsel %vm4982_vm4, %v5069_v63, %v3314_v43 }
 0x10e   :  { %2242 = vrcp.f32 %v734_v7  ;;  %v656_v6 = vsel %vm5007_vm11, 1, %v4985_v4  ;;  %v3427_v24 = vsel %vm5007_vm11, 1.0, %v2603_v58  ;;  %v3434_v33 = vsel %vm5006_vm13, 1.0, %v2603_v58  ;;  %v5072_v7 = vld [vmem:[#allocation29_spill] sm:$0xff] }
 0x10f   :  { %672 = vst [vmem:[#allocation8 + $0x50] sm:$0xff] %v656_v6  ;;  %vm720_vm14 = vcmp.gt.f32.partialorder %v3427_v24, 0.0  ;;  %v657_v8 = vsel %vm5006_vm13, 1, %v4985_v4  ;;  %vm721_vm15 = vcmp.gt.f32.partialorder %v3434_v33, 0.0  ;;  %v514_v30 = vadd.f32 %v498_v27, %v482_v29 }
 0x110   :  { %v736_v57 = vsel %vm720_vm14, %v3427_v24, 1.0  ;;  %673 = vst [vmem:[#allocation8 + $0x58] sm:$0xff] %v657_v8  ;;  %v737_v51 = vsel %vm721_vm15, %v3434_v33, 1.0  ;;  %v515_v41 = vadd.f32 %v499_v60, %v483_v5  ;;  %v355_v9 = vsel %vm4981_vm5, %v5070_v46, %v337_v3  ;;  %v702_v8 = vld [vmem:[#allocation5 + $0x40] sm:$0xff] }
 0x111   :  { %v385_v47 = vpop.permute.xlu1 %384  ;;  %v383_v36 = vpop.permute.xlu0 %382  ;;  %2244 = vrcp.f32 %v736_v57  ;;  %v517_v18 = vadd.f32 %v501_v40, %v485_v1  ;;  %v354_v39 = vsel %vm4981_vm5, %v5071_v25, %v335_v15  ;;  %v516_v57 = vadd.f32 %v500_v21, %v484_v22 }
 0x112   :  { %2246 = vrcp.f32 %v737_v51  ;;  %v403_v52 = vsel %vm4982_vm4, %v5070_v46, %v385_v47  ;;  %v402_v54 = vsel %vm4982_vm4, %v5071_v25, %v383_v36  ;;  %v5073_v51 = vld [vmem:[#allocation28_spill] sm:$0xff]  ;;  %v357_v29 = vsel %vm4981_vm5, %v5072_v7, %v341_v10 }
 0x113   :  { %v419_v55 = vsub.f32 %v355_v9, %v403_v52  ;;  %v418_v36 = vsub.f32 %v354_v39, %v402_v54  ;;  %v356_v21 = vsel %vm4981_vm5, %v5073_v51, %v339_v34  ;;  %v704_v54 = vld [vmem:[#allocation5 + $0x50] sm:$0xff] }
 0x115   :  { %v389_v32 = vpop.permute.xlu1 %388  ;;  %v387_v14 = vpop.permute.xlu0 %386  ;;  %v594_v9 = vmul.f32 %v418_v36, %v418_v36 }
 0x116   :  { %v405_v43 = vsel %vm4982_vm4, %v5072_v7, %v389_v32  ;;  %v404_v3 = vsel %vm4982_vm4, %v5073_v51, %v387_v14  ;;  %v595_v14 = vmul.f32 %v419_v55, %v419_v55 }
 0x117   :  { %v421_v1 = vsub.f32 %v357_v29, %v405_v43 }
 0x119   :  { %v545_v6 = vpop.permute.xlu1 %544  ;;  %v543_v27 = vpop.permute.xlu0 %542 }
 0x11a   :  { %v2241_v47 = vpop.eup %2240  ;;  %v563_v60 = vsel %vm4981_vm5, %v5067_v28, %v545_v6  ;;  %v562_v5 = vsel %vm4981_vm5, %v5066_v48, %v543_v27  ;;  %v420_v28 = vsub.f32 %v356_v21, %v404_v3  ;;  %v597_v6 = vmul.f32 %v421_v1, %v421_v1 }
 0x11b   :  { %v2243_v15 = vpop.eup %2242  ;;  %v579_v40 = vadd.f32 %v563_v60, %v515_v41  ;;  %v761_v32 = vmul.f32 %v2241_v47, %v703_v16  ;;  %v578_v46 = vadd.f32 %v562_v5, %v514_v30  ;;  %v705_v30 = vld [vmem:[#allocation5 + $0x58] sm:$0xff] }
 0x11c   :  { %v759_v52 = vmul.f32 %v2243_v15, %v702_v8  ;;  %v596_v47 = vmul.f32 %v420_v28, %v420_v28  ;;  %v706_v28 = vld [vmem:[#allocation5 + $0x60] sm:$0xff] }
 0x11d   :  { %v611_v22 = vmul.f32 %v579_v40, %v579_v40  ;;  %v549_v25 = vpop.permute.xlu1 %548  ;;  %v3498_v10 = vsel %vm719_vm7, %v761_v32, 3e+38  ;;  %v610_v48 = vmul.f32 %v578_v46, %v578_v46  ;;  %v547_v41 = vpop.permute.xlu0 %546 }
 0x11e   :  { %v565_v16 = vsel %vm4981_vm5, %v5068_v12, %v549_v25  ;;  %v3505_v34 = vsel %vm718_vm10, %v759_v52, 3e+38  ;;  %808 = vmin.xlane.f32.xlu0 %v3498_v10  ;;  %v2245_v39 = vpop.eup %2244  ;;  %v564_v45 = vsel %vm4981_vm5, %v5069_v63, %v547_v41 }
 0x11f   :  { %v581_v55 = vadd.f32 %v565_v16, %v517_v18  ;;  %806 = vmin.xlane.f32.xlu1 %v3505_v34  ;;  %v3512_v7 = vadd.f32 %v611_v22, %v595_v14  ;;  %v2247_v43 = vpop.eup %2246  ;;  %v580_v12 = vadd.f32 %v564_v45, %v516_v57  ;;  %v763_v8 = vmul.f32 %v2245_v39, %v704_v54  ;;  %v707_v14 = vld [vmem:[#allocation5 + $0x68] sm:$0xff]  ;;  %v709_v16 = vld [vmem:[#allocation5 + $0x78] sm:$0xff] }
 0x120   :  { %v3514_v13 = vadd.f32 %v610_v48, %v594_v9  ;;  %v765_v51 = vmul.f32 %v2247_v43, %v705_v30  ;;  %v708_v48 = vld [vmem:[#allocation5 + $0x70] sm:$0xff] }
 0x121   :  { %5074 = vst [vmem:[#allocation31_spill] sm:$0xff] %v3512_v7  ;;  %v613_v36 = vmul.f32 %v581_v55, %v581_v55  ;;  %vm4983_vm7 = vcmp.ne.f32.partialorder %v3512_v7, 0.0  ;;  %v612_v3 = vmul.f32 %v580_v12, %v580_v12  ;;  %v3519_v63 = vsel %vm720_vm14, %v763_v8, 3e+38 }
 0x122   :  { %5075 = vst [vmem:[#allocation30_spill] sm:$0xff] %v3514_v13  ;;  %vm4984_vm10 = vcmp.ne.f32.partialorder %v3514_v13, 0.0  ;;  %v2065_v18 = vsel %vm4983_vm7, 1.0, %v2603_v58  ;;  %v3528_v57 = vsel %vm721_vm15, %v765_v51, 3e+38  ;;  %v659_v33 = vsel %vm4983_vm7, 1, %v4985_v4 }
 0x123   :  { %810 = vmin.xlane.f32.xlu1 %v3519_v63  ;;  %v658_v27 = vsel %vm4984_vm10, 1, %v4985_v4  ;;  %v2064_v24 = vsel %vm4984_vm10, 1.0, %v2603_v58  ;;  %vm723_vm14 = vcmp.gt.f32.partialorder %v2065_v18, 0.0  ;;  %812 = vmin.xlane.f32.xlu0 %v3528_v57  ;;  %v3541_v15 = vadd.f32 %v612_v3, %v596_v47  ;;  %675 = vst [vmem:[#allocation8 + $0x68] sm:$0xff] %v659_v33 }
 0x124   :  { %674 = vst [vmem:[#allocation8 + $0x60] sm:$0xff] %v658_v27  ;;  %vm722_vm5 = vcmp.gt.f32.partialorder %v2064_v24, 0.0  ;;  %v739_v60 = vsel %vm723_vm14, %v2065_v18, 1.0  ;;  %v3544_v5 = vadd.f32 %v613_v36, %v597_v6 }
 0x125   :  { %5076 = vst [vmem:[#allocation33_spill] sm:$0xff] %v3541_v15  ;;  %v738_v29 = vsel %vm722_vm5, %v2064_v24, 1.0  ;;  %2248 = vrcp.f32 %v739_v60  ;;  %vm5005_vm15 = vcmp.ne.f32.partialorder %v3541_v15, 0.0 }
 0x126   :  { %5077 = vst [vmem:[#allocation32_spill] sm:$0xff] %v3544_v5  ;;  %2250 = vrcp.f32 %v738_v29  ;;  %v660_v40 = vsel %vm5005_vm15, 1, %v4985_v4  ;;  %v2066_v32 = vsel %vm5005_vm15, 1.0, %v2603_v58  ;;  %vm5004_vm4 = vcmp.ne.f32.partialorder %v3544_v5, 0.0 }
 0x127   :  { %676 = vst [vmem:[#allocation8 + $0x70] sm:$0xff] %v660_v40  ;;  %vm724_vm7 = vcmp.gt.f32.partialorder %v2066_v32, 0.0  ;;  %v2067_v21 = vsel %vm5004_vm4, 1.0, %v2603_v58  ;;  %v661_v1 = vsel %vm5004_vm4, 1, %v4985_v4  ;;  %v5078_v4 = vld [vmem:[#allocation20_spill] sm:$0xff] }
 0x128   :  { %v740_v46 = vsel %vm724_vm7, %v2066_v32, 1.0  ;;  %vm725_vm10 = vcmp.gt.f32.partialorder %v2067_v21, 0.0  ;;  %677 = vst [vmem:[#allocation8 + $0x78] sm:$0xff] %v661_v1  ;;  %v81_v5 = vadd.s32 8, %v5078_v4 }
 0x129   :  { %2252 = vrcp.f32 %v740_v46  ;;  %v741_v52 = vsel %vm725_vm10, %v2067_v21, 1.0 }
 0x12a   :  { %2254 = vrcp.f32 %v741_v52 }
 0x132   :  { %v2249_v22 = vpop.eup %2248 }
 0x133   :  { %v2251_v25 = vpop.eup %2250  ;;  %v769_v54 = vmul.f32 %v2249_v22, %v707_v14 }
 0x134   :  { %v767_v9 = vmul.f32 %v2251_v25, %v706_v28 }
 0x135   :  { %v3563_v58 = vsel %vm723_vm14, %v769_v54, 3e+38 }
 0x136   :  { %v3566_v41 = vsel %vm722_vm5, %v767_v9, 3e+38  ;;  %816 = vmin.xlane.f32.xlu0 %v3563_v58  ;;  %v2253_v30 = vpop.eup %2252 }
 0x137   :  { %814 = vmin.xlane.f32.xlu1 %v3566_v41  ;;  %v2255_v39 = vpop.eup %2254  ;;  %v771_v45 = vmul.f32 %v2253_v30, %v708_v48 }
 0x138   :  { %v773_v55 = vmul.f32 %v2255_v39, %v709_v16 }
 0x139   :  { %v3571_v43 = vsel %vm724_vm7, %v771_v45, 3e+38 }
 0x13a   :  { %v3575_v6 = vsel %vm725_vm10, %v773_v55, 3e+38 }
 0x13b   :  { %818 = vmin.xlane.f32.xlu1 %v3571_v43  ;;  %820 = vmin.xlane.f32.xlu0 %v3575_v6 }
 0x17f   :  { %v793_v36 = vpop.xlane.xlu1 %792 }
 0x184   :  { %v795_v12 = vpop.xlane.xlu0 %794 }
 0x188   :  { %v791_v8 = vpop.xlane.xlu0 %790  ;;  %v799_v3 = vpop.xlane.xlu1 %798 }
 0x189   :  { %v822_v32 = vmin.f32 %v791_v8, %v799_v3 }
 0x18c   :  { %v797_v47 = vpop.xlane.xlu0 %796  ;;  %v803_v27 = vpop.xlane.xlu1 %802 }
 0x18d   :  { %v824_v46 = vmin.f32 %v795_v12, %v803_v27  ;;  %v132_v12 = vmul.u32 128, %v5078_v4  ;;  %v85_v27 = vadd.s32 40, %v5078_v4 }
 0x190   :  { %v801_v51 = vpop.xlane.xlu0 %800 }
 0x191   :  { %v823_v1 = vmin.f32 %v793_v36, %v801_v51  ;;  %v133_v36 = vmul.u32 128, %v81_v5  ;;  %v82_v51 = vadd.s32 16, %v5078_v4 }
 0x193   :  { %v134_v5 = vmul.u32 128, %v82_v51 }
 0x194   :  { %v805_v18 = vpop.xlane.xlu0 %804 }
 0x195   :  { %v825_v52 = vmin.f32 %v797_v47, %v805_v18  ;;  %v83_v47 = vadd.s32 24, %v5078_v4 }
 0x1a7   :  { %v809_v24 = vpop.xlane.xlu0 %808 }
 0x1a8   :  { %v807_v60 = vpop.xlane.xlu1 %806  ;;  %v827_v14 = vmin.f32 %v823_v1, %v809_v24  ;;  %v84_v24 = vadd.s32 32, %v5078_v4  ;;  %v86_v1 = vadd.s32 48, %v5078_v4 }
 0x1a9   :  { %v826_v28 = vmin.f32 %v822_v32, %v807_v60  ;;  %v3585_v60 = vadd.s32 %v133_v36, %v3012_v20  ;;  %v87_v32 = vadd.s32 56, %v5078_v4 }
 0x1ab   :  { %5079 = vst [vmem:[#allocation22_spill] sm:$0xff] %v3585_v60 }
 0x1ac   :  { %v813_v33 = vpop.xlane.xlu0 %812  ;;  %v811_v29 = vpop.xlane.xlu1 %810 }
 0x1ad   :  { %v828_v22 = vmin.f32 %v824_v46, %v811_v29  ;;  %v829_v25 = vmin.f32 %v825_v52, %v813_v33  ;;  %v3588_v33 = vadd.s32 %v132_v12, %v3012_v20  ;;  %v135_v29 = vmul.u32 128, %v83_v47 }
 0x1ae   :  { %v136_v46 = vmul.u32 128, %v84_v24  ;;  %v5016_v52 = vcvt.s32.f32 %v3585_v60 }
 0x1af   :  { %5080 = vst [vmem:[#allocation23_spill] sm:$0xff] %v3588_v33 }
 0x1bf   :  { %v817_v40 = vpop.xlane.xlu0 %816 }
 0x1c0   :  { %v815_v21 = vpop.xlane.xlu1 %814  ;;  %v831_v54 = vmin.f32 %v827_v14, %v817_v40  ;;  %v5003_v14 = vcvt.s32.f32 %v3588_v33 }
 0x1c1   :  { %v830_v9 = vmin.f32 %v826_v28, %v815_v21  ;;  %v3595_v28 = vadd.s32 %v135_v29, %v3012_v20  ;;  %v93_v29 = vadd.s32 104, %v5078_v4 }
 0x1c3   :  { %v834_v45 = vmin.f32 %v830_v9, %v831_v54  ;;  %5081 = vst [vmem:[#allocation25_spill] sm:$0xff] %v3595_v28  ;;  %v139_v54 = vmul.u32 128, %v87_v32  ;;  %v138_v9 = vmul.u32 128, %v86_v1 }
 0x1c4   :  { %v819_v48 = vpop.xlane.xlu1 %818  ;;  %v821_v16 = vpop.xlane.xlu0 %820 }
 0x1c5   :  { %v832_v30 = vmin.f32 %v828_v22, %v819_v48  ;;  %v833_v39 = vmin.f32 %v829_v25, %v821_v16  ;;  %v3598_v22 = vadd.s32 %v134_v5, %v3012_v20  ;;  %v89_v48 = vadd.s32 72, %v5078_v4 }
 0x1c6   :  { %v88_v16 = vadd.s32 64, %v5078_v4  ;;  %v3630_v47 = vadd.s32 %v138_v9, %v3012_v20 }
 0x1c7   :  { %v835_v55 = vmin.f32 %v832_v30, %v833_v39  ;;  %5082 = vst [vmem:[#allocation24_spill] sm:$0xff] %v3598_v22  ;;  %v3612_v39 = vadd.s32 %v136_v46, %v3012_v20  ;;  %v5001_v36 = vcvt.s32.f32 %v3598_v22  ;;  %v141_v51 = vmul.u32 128, %v89_v48 }
 0x1c8   :  { %5086 = vst [vmem:[#allocation28_spill] sm:$0xff] %v3630_v47  ;;  %v4997_v5 = vcvt.s32.f32 %v3630_v47  ;;  %v145_v46 = vmul.u32 128, %v93_v29 }
 0x1c9   :  { %v836_v15 = vmin.f32 %v834_v45, %v835_v55  ;;  %5084 = vst [vmem:[#allocation26_spill] sm:$0xff] %v3612_v39 }
 0x1cb   :  { %v837_v8 = vrot.slane %v836_v15, 4 }
 0x1cd   :  { %v838_v3 = vmin.f32 %v836_v15, %v837_v8  ;;  %v137_v15 = vmul.u32 128, %v85_v27  ;;  %v5002_v8 = vcvt.s32.f32 %v3595_v28  ;;  %v140_v27 = vmul.u32 128, %v88_v16 }
 0x1ce   :  { %v94_v16 = vadd.s32 112, %v5078_v4 }
 0x1cf   :  { %v839_v18 = vrot.slane %v838_v3, 2  ;;  %v3609_v30 = vadd.s32 %v137_v15, %v3012_v20  ;;  %v3653_v15 = vadd.s32 %v140_v27, %v3012_v20 }
 0x1d0   :  { %v146_v29 = vmul.u32 128, %v94_v16 }
 0x1d1   :  { %v840_v40 = vmin.f32 %v838_v3, %v839_v18  ;;  %5083 = vst [vmem:[#allocation27_spill] sm:$0xff] %v3609_v30  ;;  %v5000_v12 = vcvt.s32.f32 %v3609_v30  ;;  %v90_v3 = vadd.s32 80, %v5078_v4  ;;  %5088 = vst [vmem:[#allocation35_spill] sm:$0xff] %v3653_v15 }
 0x1d3   :  { %v841_v21 = vrot.slane %v840_v40, 1  ;;  %v142_v1 = vmul.u32 128, %v90_v3  ;;  %v5092_v3 = vld [vmem:[#allocation21_spill] sm:$0xff] }
 0x1d5   :  { %v3600_v25 = vmin.f32 %v840_v40, %v841_v21  ;;  %v3646_v40 = vadd.s32 %v141_v51, %v3012_v20  ;;  %v3665_v48 = vadd.s32 %v142_v1, %v3012_v20  ;;  %v3680_v51 = vadd.s32 %v145_v46, %v3012_v20 }
 0x1d7   :  { %vm844_vm5 = vcmp.eq.f32.partialorder %v3279_v37, %v3600_v25  ;;  %vm843_vm7 = vcmp.eq.f32.partialorder %v3318_v56, %v3600_v25  ;;  %vm846_vm10 = vcmp.eq.f32.partialorder %v3351_v50, %v3600_v25  ;;  %vm845_vm14 = vcmp.eq.f32.partialorder %v3288_v38, %v3600_v25  ;;  %5087 = vst [vmem:[#allocation34_spill] sm:$0xff] %v3646_v40 }
 0x1d8   :  { %v876_v45 = vsel %vm844_vm5, %v5016_v52, 3e+38  ;;  %v875_v55 = vsel %vm843_vm7, %v5003_v14, 3e+38  ;;  %v3625_v37 = vadd.s32 %v139_v54, %v3012_v20  ;;  %v91_v56 = vadd.s32 88, %v5078_v4  ;;  %5090 = vst [vmem:[#allocation37_spill] sm:$0xff] %v3665_v48 }
 0x1d9   :  { %893 = vmin.xlane.f32.xlu0 %v876_v45  ;;  %891 = vmin.xlane.f32.xlu1 %v875_v55  ;;  %v878_v18 = vsel %vm846_vm10, %v5002_v8, 3e+38  ;;  %v877_v50 = vsel %vm845_vm14, %v5001_v36, 3e+38  ;;  %v4999_v38 = vcvt.s32.f32 %v3612_v39  ;;  %vm848_vm5 = vcmp.eq.f32.partialorder %v3375_v59, %v3600_v25  ;;  %5091 = vst [vmem:[#allocation38_spill] sm:$0xff] %v3680_v51 }
 0x1da   :  { %5085 = vst [vmem:[#allocation29_spill] sm:$0xff] %v3625_v37  ;;  %vm847_vm7 = vcmp.eq.f32.partialorder %v3322_v19, %v3600_v25  ;;  %v4998_v24 = vcvt.s32.f32 %v3625_v37  ;;  %v143_v32 = vmul.u32 128, %v91_v56  ;;  %v880_v21 = vsel %vm848_vm5, %v5000_v12, 3e+38 }
 0x1db   :  { %v879_v59 = vsel %vm847_vm7, %v4999_v38, 3e+38  ;;  %v92_v19 = vadd.s32 96, %v5078_v4  ;;  %vm850_vm10 = vcmp.eq.f32.partialorder %v3388_v42, %v3600_v25  ;;  %vm849_vm14 = vcmp.eq.f32.partialorder %v3347_v35, %v3600_v25 }
 0x1dc   :  { %v4996_v54 = vcvt.s32.f32 %v3646_v40  ;;  %v3662_v9 = vadd.s32 %v143_v32, %v3012_v20  ;;  %v882_v45 = vsel %vm850_vm10, %v4998_v24, 3e+38  ;;  %v881_v42 = vsel %vm849_vm14, %v4997_v5, 3e+38 }
 0x1dd   :  { %897 = vmin.xlane.f32.xlu0 %v878_v18  ;;  %895 = vmin.xlane.f32.xlu1 %v877_v50  ;;  %v4995_v55 = vcvt.s32.f32 %v3653_v15  ;;  %v144_v35 = vmul.u32 128, %v92_v19  ;;  %vm852_vm5 = vcmp.eq.f32.partialorder %v3498_v10, %v3600_v25  ;;  %vm851_vm7 = vcmp.eq.f32.partialorder %v3505_v34, %v3600_v25 }
 0x1de   :  { %5089 = vst [vmem:[#allocation36_spill] sm:$0xff] %v3662_v9  ;;  %v4994_v56 = vcvt.s32.f32 %v3662_v9  ;;  %v4993_v4 = vcvt.s32.f32 %v3665_v48  ;;  %v147_v18 = vmul.u32 128, %v5092_v3  ;;  %v884_v50 = vsel %vm852_vm5, %v4996_v54, 3e+38 }
 0x1df   :  { %v883_v27 = vsel %vm851_vm7, %v4995_v55, 3e+38  ;;  %v3688_v10 = vadd.s32 %v144_v35, %v3012_v20  ;;  %vm854_vm10 = vcmp.eq.f32.partialorder %v3528_v57, %v3600_v25  ;;  %vm853_vm14 = vcmp.eq.f32.partialorder %v3519_v63, %v3600_v25 }
 0x1e0   :  { %v4992_v34 = vcvt.s32.f32 %v3680_v51  ;;  %v3696_v32 = vadd.s32 %v147_v18, %v3012_v20  ;;  %v886_v1 = vsel %vm854_vm10, %v4994_v56, 3e+38  ;;  %v3704_v19 = vadd.s32 %v146_v29, %v3012_v20 }
 0x1e1   :  { %901 = vmin.xlane.f32.xlu0 %v880_v21  ;;  %899 = vmin.xlane.f32.xlu1 %v879_v59  ;;  %5093 = vst [vmem:[#allocation39_spill] sm:$0xff] %v3688_v10  ;;  %v885_v21 = vsel %vm853_vm14, %v4993_v4, 3e+38  ;;  %v4990_v59 = vcvt.s32.f32 %v3688_v10  ;;  %vm856_vm5 = vcmp.eq.f32.partialorder %v3563_v58, %v3600_v25  ;;  %vm855_vm7 = vcmp.eq.f32.partialorder %v3566_v41, %v3600_v25 }
 0x1e2   :  { %5094 = vst [vmem:[#allocation40_spill] sm:$0xff] %v3696_v32  ;;  %5095 = vst [vmem:[#allocation41_spill] sm:$0xff] %v3704_v19  ;;  %v888_v63 = vsel %vm856_vm5, %v4992_v34, 3e+38  ;;  %v4989_v46 = vcvt.s32.f32 %v3696_v32  ;;  %v4991_v16 = vcvt.s32.f32 %v3704_v19  ;;  %vm858_vm10 = vcmp.eq.f32.partialorder %v3575_v6, %v3600_v25 }
 0x1e3   :  { %v887_v57 = vsel %vm855_vm7, %v4990_v59, 3e+38  ;;  %vm857_vm14 = vcmp.eq.f32.partialorder %v3571_v43, %v3600_v25  ;;  %vm5009_vm5 = vcmask 0  }
 0x1e4   :  { %v890_v58 = vsel %vm858_vm10, %v4989_v46, 3e+38  ;;  %v889_v41 = vsel %vm857_vm14, %v4991_v16, 3e+38 }
 0x1e5   :  { %905 = vmin.xlane.f32.xlu0 %v882_v45  ;;  %903 = vmin.xlane.f32.xlu1 %v881_v42 }
 0x1e9   :  { %909 = vmin.xlane.f32.xlu0 %v884_v50  ;;  %907 = vmin.xlane.f32.xlu1 %v883_v27 }
 0x1ed   :  { %913 = vmin.xlane.f32.xlu0 %v886_v1  ;;  %911 = vmin.xlane.f32.xlu1 %v885_v21 }
 0x1f1   :  { %917 = vmin.xlane.f32.xlu0 %v888_v63  ;;  %915 = vmin.xlane.f32.xlu1 %v887_v57 }
 0x1f5   :  { %921 = vmin.xlane.f32.xlu0 %v890_v58  ;;  %919 = vmin.xlane.f32.xlu1 %v889_v41 }
 0x262   :  { %v894_v45 = vpop.xlane.xlu0 %893  ;;  %v892_v42 = vpop.xlane.xlu1 %891 }
 0x266   :  { %v898_v35 = vpop.xlane.xlu0 %897  ;;  %v896_v3 = vpop.xlane.xlu1 %895 }
 0x26a   :  { %v902_v18 = vpop.xlane.xlu0 %901  ;;  %v900_v50 = vpop.xlane.xlu1 %899 }
 0x26b   :  { %v924_v25 = vmin.f32 %v894_v45, %v902_v18  ;;  %v923_v63 = vmin.f32 %v892_v42, %v900_v50 }
 0x26e   :  { %v906_v27 = vpop.xlane.xlu0 %905  ;;  %v904_v29 = vpop.xlane.xlu1 %903 }
 0x26f   :  { %v926_v59 = vmin.f32 %v898_v35, %v906_v27  ;;  %v925_v16 = vmin.f32 %v896_v3, %v904_v29 }
 0x272   :  { %v910_v6 = vpop.xlane.xlu0 %909  ;;  %v908_v1 = vpop.xlane.xlu1 %907 }
 0x273   :  { %v928_v58 = vmin.f32 %v924_v25, %v910_v6  ;;  %v927_v41 = vmin.f32 %v923_v63, %v908_v1  ;;  %v5108_v6 = vld [vmem:[#allocation32_spill] sm:$0xff] }
 0x276   :  { %v914_v21 = vpop.xlane.xlu0 %913  ;;  %v912_v43 = vpop.xlane.xlu1 %911 }
 0x277   :  { %v930_v34 = vmin.f32 %v926_v59, %v914_v21  ;;  %v929_v4 = vmin.f32 %v925_v16, %v912_v43  ;;  %v5106_v16 = vld [vmem:[#allocation33_spill] sm:$0xff] }
 0x27a   :  { %v918_v57 = vpop.xlane.xlu0 %917  ;;  %v916_v46 = vpop.xlane.xlu1 %915 }
 0x27b   :  { %v932_v56 = vmin.f32 %v928_v58, %v918_v57  ;;  %v931_v55 = vmin.f32 %v927_v41, %v916_v46 }
 0x27d   :  { %v935_v12 = vmin.f32 %v931_v55, %v932_v56 }
 0x27e   :  { %v922_v54 = vpop.xlane.xlu0 %921  ;;  %v920_v5 = vpop.xlane.xlu1 %919 }
 0x27f   :  { %v934_v24 = vmin.f32 %v930_v34, %v922_v54  ;;  %v933_v38 = vmin.f32 %v929_v4, %v920_v5 }
 0x281   :  { %v936_v36 = vmin.f32 %v933_v38, %v934_v24 }
 0x283   :  { %v937_v8 = vmin.f32 %v935_v12, %v936_v36 }
 0x285   :  { %v938_v14 = vrot.slane %v937_v8, 4 }
 0x287   :  { %v939_v45 = vmin.f32 %v937_v8, %v938_v14  ;;  %v5096_v14 = vmov 0  }
 0x289   :  { %v940_v42 = vrot.slane %v939_v45, 2 }
 0x28b   :  { %v941_v18 = vmin.f32 %v939_v45, %v940_v42 }
 0x28d   :  { %v942_v50 = vrot.slane %v941_v18, 1 }
 0x28f   :  { %v943_v35 = vmin.f32 %v941_v18, %v942_v50 }
 0x291   :  { %v2068_v3 = vtrunc.f32 %v943_v35 }
 0x293   :  { %v2069_v27 = vcvt.f32.s32 %v2068_v3 }
 0x295   :  { %946 = vst.msk [vmem:[#allocation12] sm:$0x1] %vm5009_vm5, %v2069_v27  ;;  %vm947_vm7 = vcmp.eq.s32.totalorder %v3588_v33, %v2069_v27  ;;  %vm948_vm10 = vcmp.eq.s32.totalorder %v3585_v60, %v2069_v27  ;;  %vm949_vm14 = vcmp.eq.s32.totalorder %v3598_v22, %v2069_v27  ;;  %vm950_vm4 = vcmp.eq.s32.totalorder %v3595_v28, %v2069_v27 }
 0x296   :  { %vm963_vm15 = vmand %vm947_vm7, %vm5047_vm8  ;;  %vm951_vm13 = vcmp.eq.s32.totalorder %v3612_v39, %v2069_v27  ;;  %vm952_vm2 = vcmp.eq.s32.totalorder %v3609_v30, %v2069_v27  ;;  %vm953_vm3 = vcmp.eq.s32.totalorder %v3630_v47, %v2069_v27  ;;  %vm954_vm7 = vcmp.eq.s32.totalorder %v3625_v37, %v2069_v27 }
 0x297   :  { %vm964_vm11 = vmand %vm948_vm10, %vm5012_vm6  ;;  %v979_v8 = vsel %vm963_vm15, 1, %v5096_v14   ;;  %vm5097_vm10 = vcmp.ne.f32.partialorder %v3190_v23, 0.0 }
 0x298   :  { %vm965_vm5 = vmand %vm949_vm14, %vm5013_vm9  ;;  %v980_v36 = vsel %vm964_vm11, 1, %v5096_v14   ;;  %vm955_vm14 = vcmp.eq.s32.totalorder %v3653_v15, %v2069_v27  ;;  %vm5098_vm11 = vcmp.ne.f32.partialorder %v3215_v0, 0.0 }
 0x299   :  { %vm966_vm0 = vmand %vm950_vm4, %vm5015_vm12  ;;  %v981_v12 = vsel %vm965_vm5, 1, %v5096_v14   ;;  %vm956_vm4 = vcmp.eq.s32.totalorder %v3646_v40, %v2069_v27  ;;  %vm957_vm5 = vcmp.eq.s32.totalorder %v3665_v48, %v2069_v27 }
 0x29a   :  { %vm967_vm6 = vmand %vm951_vm13, %vm5097_vm10  ;;  %v982_v38 = vsel %vm966_vm0, 1, %v5096_v14   ;;  %vm5099_vm13 = vcmp.ne.f32.partialorder %v3232_v62, 0.0  ;;  %vm958_vm0 = vcmp.eq.s32.totalorder %v3662_v9, %v2069_v27 }
 0x29b   :  { %vm968_vm9 = vmand %vm952_vm2, %vm5014_vm1  ;;  %v983_v24 = vsel %vm967_vm6, 1, %v5096_v14   ;;  %vm5100_vm2 = vcmp.ne.f32.partialorder %v3383_v31, 0.0  ;;  %vm959_vm6 = vcmp.eq.s32.totalorder %v3688_v10, %v2069_v27 }
 0x29c   :  { %vm969_vm15 = vmand %vm953_vm3, %vm5098_vm11  ;;  %v984_v5 = vsel %vm968_vm9, 1, %v5096_v14   ;;  %vm5101_vm3 = vcmp.ne.f32.partialorder %v3381_v53, 0.0  ;;  %vm960_vm9 = vcmp.eq.s32.totalorder %v3680_v51, %v2069_v27 }
 0x29d   :  { %vm970_vm10 = vmand %vm954_vm7, %vm5099_vm13  ;;  %v985_v54 = vsel %vm969_vm15, 1, %v5096_v14   ;;  %vm5102_vm7 = vcmp.ne.f32.partialorder %v3413_v49, 0.0  ;;  %vm961_vm15 = vcmp.eq.s32.totalorder %v3704_v19, %v2069_v27 }
 0x29e   :  { %vm971_vm1 = vmand %vm955_vm14, %vm5100_vm2  ;;  %v986_v55 = vsel %vm970_vm10, 1, %v5096_v14   ;;  %vm5103_vm14 = vcmp.ne.f32.partialorder %v3418_v17, 0.0  ;;  %vm962_vm10 = vcmp.eq.s32.totalorder %v3696_v32, %v2069_v27 }
 0x29f   :  { %vm972_vm11 = vmand %vm956_vm4, %vm5101_vm3  ;;  %v987_v56 = vsel %vm971_vm1, 1, %v5096_v14   ;;  %vm5104_vm4 = vcmp.ne.f32.partialorder %v3514_v13, 0.0  ;;  %vm5105_vm1 = vcmp.ne.f32.partialorder %v3512_v7, 0.0 }
 0x2a0   :  { %vm973_vm13 = vmand %vm957_vm5, %vm5102_vm7  ;;  %v988_v4 = vsel %vm972_vm11, 1, %v5096_v14   ;;  %vm5107_vm5 = vcmp.ne.f32.partialorder %v5106_v16, 0.0 }
 0x2a1   :  { %vm974_vm2 = vmand %vm958_vm0, %vm5103_vm14  ;;  %v989_v34 = vsel %vm973_vm13, 1, %v5096_v14   ;;  %vm5109_vm0 = vcmp.ne.f32.partialorder %v5108_v6, 0.0 }
 0x2a2   :  { %vm975_vm3 = vmand %vm959_vm6, %vm5104_vm4  ;;  %v990_v59 = vsel %vm974_vm2, 1, %v5096_v14  }
 0x2a3   :  { %vm976_vm12 = vmand %vm960_vm9, %vm5105_vm1  ;;  %v991_v46 = vsel %vm975_vm3, 1, %v5096_v14  }
 0x2a4   :  { %vm977_vm11 = vmand %vm961_vm15, %vm5107_vm5  ;;  %v992_v29 = vsel %vm976_vm12, 1, %v5096_v14  }
 0x2a5   :  { %vm978_vm7 = vmand %vm962_vm10, %vm5109_vm0  ;;  %v993_v1 = vsel %vm977_vm11, 1, %v5096_v14  }
 0x2a6   :  { %v994_v21 = vsel %vm978_vm7, 1, %v5096_v14  }
 0x2a7 LB: > { %vm1017_vm12 = vcmp.gt.s32.totalorder %v2590_v8, 0  ;;  %vm1018_vm6 = vcmp.gt.s32.totalorder %v2586_v36, 0  ;;  %vm1019_vm9 = vcmp.gt.s32.totalorder %v2582_v12, 0  ;;  %vm1020_vm13 = vcmp.gt.s32.totalorder %v2578_v38, 0  ;;  %v5110_v3 = vld [vmem:[#allocation20_spill] sm:$0xff]  ;;  %s2605_s18 = smov 1   ;;  %s2594_s17 = sphi %s3821_s17, %s1000_s17   ;;  %v2590_v8 = vphi %v979_v8, %v5268_v8   ;;  %v2586_v36 = vphi %v980_v36, %v5267_v36   ;;  %v2582_v12 = vphi %v981_v12, %v5266_v12   ;;  %v2578_v38 = vphi %v982_v38, %v5265_v38   ;;  %v2574_v24 = vphi %v983_v24, %v5264_v24   ;;  %v2570_v5 = vphi %v984_v5, %v5263_v5   ;;  %v2566_v54 = vphi %v985_v54, %v5262_v54   ;;  %v2562_v55 = vphi %v986_v55, %v5261_v55   ;;  %v2558_v56 = vphi %v987_v56, %v5260_v56   ;;  %v2554_v4 = vphi %v988_v4, %v5259_v4   ;;  %v2550_v34 = vphi %v989_v34, %v5258_v34   ;;  %v2546_v59 = vphi %v990_v59, %v5257_v59   ;;  %v2542_v46 = vphi %v991_v46, %v5256_v46   ;;  %v2538_v29 = vphi %v992_v29, %v5255_v29   ;;  %v2534_v1 = vphi %v993_v1, %v5254_v1   ;;  %v2530_v21 = vphi %v994_v21, %v5253_v21  }
 0x2a8   : > { %v3879_v43 = vsel %vm1017_vm12, %v2590_v8, 1073741824  ;;  %v3882_v25 = vsel %vm1018_vm6, %v2586_v36, 1073741824  ;;  %v1035_v63 = vsel %vm1019_vm9, %v2582_v12, 1073741824  ;;  %v1036_v57 = vsel %vm1020_vm13, %v2578_v38, 1073741824  ;;  %s2606_s19 = smov 127   ;;  %s1000_s17 = sadd.s32 1, %s2594_s17  }
 0x2a9   : > { %v5018_v58 = vrot.slane %v3879_v43, 7  ;;  %v1050_v41 = vrot.slane %v3882_v25, 7  ;;  %v5020_v45 = vrot.slane %v3882_v25, 1  ;;  %v1099_v42 = vrot.slane %v1035_v63, 1  ;;  %p4442_p1 = scmp.ge.s32.totalorder %s1000_s17, 45  }
 0x2aa   : > { %v1051_v18 = vrot.slane %v1035_v63, 7  ;;  %v1100_v50 = vrot.slane %v1036_v57, 1  ;;  %v1052_v35 = vrot.slane %v1036_v57, 7  ;;  %vm5111_vm15 = vcmp.lt.s32.totalorder %v5110_v3, 1  ;;  %s2607_s21 = smov (%p4442_p1), [#allocation9]   ;;  %s2608_s23 = smov (%p4442_p1), [#allocation12]  }
 0x2ab   : > { %v1079_v27 = vsel %vm5111_vm15, %v5018_v58, %v1050_v41  ;;  %vm5112_vm14 = vcmp.lt.s32.totalorder %v5110_v3, 7  ;;  %vm5113_vm10 = vmmov %vm5111_vm15  ;;  %vm1021_vm3 = vcmp.gt.s32.totalorder %v2574_v24, 0  ;;  %vm1022_vm7 = vcmp.gt.s32.totalorder %v2570_v5, 0  ;;  %s1940_s22 = sshll.u32 (%p4442_p1), %s2607_s21, 4  ;;  %s1965_s24 = sshll.u32 (%p4442_p1), %s2608_s23, 4  ;;  %s1941_s22 = int_to_ptr.vmem [resolvable:$true] %s1940_s22  ;;  %s1966_s24 = int_to_ptr.vmem [resolvable:$true] %s1965_s24 }
 0x2ac   : > { %v1126_v14 = vsel %vm5112_vm14, %v5020_v45, %v1099_v42  ;;  %v1078_v16 = vsel %vm5113_vm10, %v1050_v41, %v1051_v18  ;;  %vm5114_vm4 = vmmov %vm5112_vm14  ;;  %v1037_v19 = vsel %vm1021_vm3, %v2574_v24, 1073741824  ;;  %vm1023_vm13 = vcmp.gt.s32.totalorder %v2566_v54, 0  ;;  %s2350_s25 = scalar_lea.vmem (%p4442_p1), %s1941_s22, 2048  ;;  %p2355_p3 = scmp.lt.s32.totalorder (%p4442_p1), %s1941_s22, %s1941_s22 }
 0x2ad   : > { %vm1147_vm2 = vcmp.lt.s32.totalorder %v1079_v27, %v1126_v14  ;;  %v1125_v6 = vsel %vm5114_vm4, %v1099_v42, %v1100_v50  ;;  %vm5115_vm5 = vmmov %vm5113_vm10  ;;  %v1101_v45 = vrot.slane %v1037_v19, 1  ;;  %v1053_v41 = vrot.slane %v1037_v19, 7  ;;  %p2351_p2 = scmp.ne.s32.totalorder (%p4442_p1), %s1941_s22, %s2350_s25  ;;  %p2356_p4 = scmp.lt.s32.totalorder (%p4442_p1), %s2350_s25, %s2350_s25 }
 0x2ae   : > { %v1148_v52 = vsel %vm1147_vm2, %v1079_v27, %v1126_v14  ;;  %vm1149_vm1 = vcmp.lt.s32.totalorder %v1078_v16, %v1125_v6  ;;  %v1077_v58 = vsel %vm5115_vm5, %v1051_v18, %v1052_v35  ;;  %vm5116_vm12 = vmmov %vm5114_vm4  ;;  %v1038_v27 = vsel %vm1022_vm7, %v2570_v5, 1073741824 }
 0x2af   : > { %vm1179_vm11 = vcmp.lt.s32.totalorder %v3882_v25, %v1148_v52  ;;  %v1150_v32 = vsel %vm1149_vm1, %v1078_v16, %v1125_v6  ;;  %v1124_v18 = vsel %vm5116_vm12, %v1100_v50, %v1101_v45  ;;  %vm5117_vm9 = vmmov %vm5115_vm5  ;;  %v1102_v14 = vrot.slane %v1038_v27, 1  ;;  %p2357_p5 = por (%p4442_p1), %p2356_p4, %p2355_p3 }
 0x2b0   : > { %v3907_v10 = vsel %vm1179_vm11, %v3882_v25, %v1148_v52  ;;  %vm1181_vm0 = vcmp.lt.s32.totalorder %v1035_v63, %v1150_v32  ;;  %vm1151_vm6 = vcmp.lt.s32.totalorder %v1077_v58, %v1124_v18  ;;  %v1076_v52 = vsel %vm5117_vm9, %v1052_v35, %v1053_v41  ;;  %vm5118_vm14 = vmmov %vm5114_vm4 }
 0x2b1   : > { %1211 = vrot.lane.b32.xlu0 %v3907_v10, %s2605_s18  ;;  %v3912_v42 = vsel %vm1181_vm0, %v1035_v63, %v1150_v32  ;;  %v1152_v16 = vsel %vm1151_vm6, %v1077_v58, %v1124_v18  ;;  %v1054_v6 = vrot.slane %v1038_v27, 7  ;;  %v1123_v32 = vsel %vm5118_vm14, %v1101_v45, %v1102_v14  ;;  %vm5119_vm10 = vmmov %vm5115_vm5  ;;  %p2358_p6 = pnand (%p4442_p1), %p2357_p5, %p2351_p2 }
 0x2b2   : > { %1213 = vrot.lane.b32.xlu1 %v3912_v42, %s2605_s18  ;;  %vm1183_vm15 = vcmp.lt.s32.totalorder %v1036_v57, %v1152_v16  ;;  %v1039_v63 = vsel %vm1023_vm13, %v2566_v54, 1073741824  ;;  %vm1153_vm2 = vcmp.lt.s32.totalorder %v1076_v52, %v1123_v32  ;;  %vm1024_vm4 = vcmp.gt.s32.totalorder %v2562_v55, 0  ;;  %vm5120_vm1 = vmmov %vm5116_vm12 }
 0x2b3   : > { %v3925_v50 = vsel %vm1183_vm15, %v1036_v57, %v1152_v16  ;;  %v1075_v51 = vsel %vm5119_vm10, %v1053_v41, %v1054_v6  ;;  %v1103_v48 = vrot.slane %v1039_v63, 1  ;;  %v1154_v58 = vsel %vm1153_vm2, %v1076_v52, %v1123_v32  ;;  %vm5121_vm11 = vmmov %vm5117_vm9 }
 0x2b4   : > { %v1055_v35 = vrot.slane %v1039_v63, 7  ;;  %vm1185_vm3 = vcmp.lt.s32.totalorder %v1037_v19, %v1154_v58  ;;  %v1040_v18 = vsel %vm1024_vm4, %v2562_v55, 1073741824  ;;  %vm1025_vm0 = vcmp.gt.s32.totalorder %v2558_v56, 0  ;;  %vm5122_vm12 = vmmov %vm5120_vm1 }
 0x2b5   : > { %v1122_v45 = vsel %vm5120_vm1, %v1102_v14, %v1103_v48  ;;  %v3935_v57 = vsel %vm1185_vm3, %v1037_v19, %v1154_v58  ;;  %v1104_v16 = vrot.slane %v1040_v18, 1  ;;  %v1056_v32 = vrot.slane %v1040_v18, 7  ;;  %vm5123_vm14 = vmmov %vm5120_vm1 }
 0x2b6   : > { %1215 = vrot.lane.b32.xlu1 %v3925_v50, %s2605_s18  ;;  %vm1155_vm5 = vcmp.lt.s32.totalorder %v1075_v51, %v1122_v45  ;;  %v1074_v41 = vsel %vm5121_vm11, %v1054_v6, %v1055_v35  ;;  %1217 = vrot.lane.b32.xlu0 %v3935_v57, %s2605_s18  ;;  %v1041_v9 = vsel %vm1025_vm0, %v2558_v56, 1073741824  ;;  %vm1032_vm13 = vcmp.gt.s32.totalorder %v2530_v21, 0  ;;  %vm5125_vm10 = vmmov %vm5120_vm1 }
 0x2b7   : > { %v1156_v52 = vsel %vm1155_vm5, %v1075_v51, %v1122_v45  ;;  %v1121_v14 = vsel %vm5122_vm12, %v1103_v48, %v1104_v16  ;;  %v1073_v6 = vsel %vm5117_vm9, %v1055_v35, %v1056_v32  ;;  %v1105_v58 = vrot.slane %v1041_v9, 1  ;;  %vm5127_vm3 = vmmov %vm5117_vm9 }
 0x2b8   : > { %vm1187_vm7 = vcmp.lt.s32.totalorder %v1038_v27, %v1156_v52  ;;  %vm1157_vm6 = vcmp.lt.s32.totalorder %v1074_v41, %v1121_v14  ;;  %v5027_v45 = vrot.slane %v3879_v43, 1  ;;  %v5124_v15 = vrot.slane %v3882_v25, 1  ;;  %vm5131_vm9 = vmmov %vm5125_vm10 }
 0x2b9   : > { %v3945_v19 = vsel %vm1187_vm7, %v1038_v27, %v1156_v52  ;;  %v1158_v51 = vsel %vm1157_vm6, %v1074_v41, %v1121_v14  ;;  %v1120_v48 = vsel %vm5123_vm14, %v1104_v16, %v1105_v58  ;;  %v3956_v27 = vsel %vm1032_vm13, %v2530_v21, 1073741824  ;;  %vm5129_vm7 = vmmov %vm5127_vm3 }
 0x2ba   : > { %1219 = vrot.lane.b32.xlu1 %v3945_v19, %s2605_s18  ;;  %vm1189_vm15 = vcmp.lt.s32.totalorder %v1039_v63, %v1158_v51  ;;  %vm1159_vm2 = vcmp.lt.s32.totalorder %v1073_v6, %v1120_v48  ;;  %v5028_v35 = vrot.slane %v3956_v27, 7  ;;  %v1127_v41 = vsel %vm5125_vm10, %v5027_v45, %v5124_v15  ;;  %vm5130_vm6 = vmmov %vm5127_vm3 }
 0x2bb   : > { %v3958_v52 = vsel %vm1189_vm15, %v1039_v63, %v1158_v51  ;;  %v1160_v14 = vsel %vm1159_vm2, %v1073_v6, %v1120_v48  ;;  %v1057_v16 = vrot.slane %v1041_v9, 7  ;;  %v5126_v40 = vrot.slane %v3879_v43, 7  ;;  %vm5132_vm13 = vmmov %vm5131_vm9 }
 0x2bc   : > { %1221 = vrot.lane.b32.xlu0 %v3958_v52, %s2605_s18  ;;  %vm1191_vm4 = vcmp.lt.s32.totalorder %v1040_v18, %v1160_v14  ;;  %vm1026_vm1 = vcmp.gt.s32.totalorder %v2554_v4, 0  ;;  %vm1027_vm5 = vcmp.gt.s32.totalorder %v2550_v34, 0  ;;  %vm5128_vm11 = vcmp.eq.s32.totalorder %v5110_v3, 0 }
 0x2bd   : > { %v1080_v63 = vsel %vm5127_vm3, %v5028_v35, %v5126_v40  ;;  %v3977_v25 = vsel %vm1191_vm4, %v1040_v18, %v1160_v14  ;;  %v1042_v6 = vsel %vm1026_vm1, %v2554_v4, 1073741824  ;;  %v1043_v51 = vsel %vm1027_vm5, %v2550_v34, 1073741824  ;;  %vm5133_vm1 = vmmov %vm5130_vm6 }
 0x2be   : > { %v1081_v15 = vsel %vm5128_vm11, 1073741824, %v1080_v63  ;;  %1223 = vrot.lane.b32.xlu1 %v3977_v25, %s2605_s18  ;;  %v1058_v48 = vrot.slane %v1042_v6, 7  ;;  %v1106_v45 = vrot.slane %v1042_v6, 1  ;;  %v1107_v40 = vrot.slane %v1043_v51, 1  ;;  %vm5134_vm5 = vmmov %vm5133_vm1 }
 0x2bf   : > { %vm1145_vm0 = vcmp.lt.s32.totalorder %v1081_v15, %v1127_v41  ;;  %v1072_v47 = vsel %vm5129_vm7, %v1056_v32, %v1057_v16  ;;  %vm1028_vm2 = vcmp.gt.s32.totalorder %v2546_v59, 0  ;;  %vm1029_vm3 = vcmp.gt.s32.totalorder %v2542_v46, 0  ;;  %vm5135_vm11 = vmmov %vm5131_vm9 }
 0x2c0   : > { %v1146_v35 = vsel %vm1145_vm0, %v1081_v15, %v1127_v41  ;;  %v1071_v18 = vsel %vm5130_vm6, %v1057_v16, %v1058_v48  ;;  %v1118_v14 = vsel %vm5131_vm9, %v1106_v45, %v1107_v40  ;;  %v1119_v63 = vsel %vm5132_vm13, %v1105_v58, %v1106_v45  ;;  %vm5136_vm0 = vmmov %vm5131_vm9 }
 0x2c1   : > { %vm1177_vm12 = vcmp.lt.s32.totalorder %v3879_v43, %v1146_v35  ;;  %vm1163_vm15 = vcmp.lt.s32.totalorder %v1071_v18, %v1118_v14  ;;  %vm1161_vm14 = vcmp.lt.s32.totalorder %v1072_v47, %v1119_v63  ;;  %v1044_v16 = vsel %vm1028_vm2, %v2546_v59, 1073741824  ;;  %vm5138_vm2 = vmmov %vm5133_vm1 }
 0x2c2   : > { %v3995_v37 = vsel %vm1177_vm12, %v3879_v43, %v1146_v35  ;;  %v1164_v32 = vsel %vm1163_vm15, %v1071_v18, %v1118_v14  ;;  %v1162_v41 = vsel %vm1161_vm14, %v1072_v47, %v1119_v63  ;;  %v1045_v45 = vsel %vm1029_vm3, %v2542_v46, 1073741824  ;;  %vm5137_vm14 = vmmov %vm5133_vm1 }
 0x2c3   : > { %1209 = vrot.lane.b32.xlu0 %v3995_v37, %s2605_s18  ;;  %vm1195_vm10 = vcmp.lt.s32.totalorder %v1042_v6, %v1164_v32  ;;  %vm1193_vm4 = vcmp.lt.s32.totalorder %v1041_v9, %v1162_v41  ;;  %v1059_v35 = vrot.slane %v1043_v51, 7  ;;  %v1060_v18 = vrot.slane %v1044_v16, 7 }
 0x2c4   : > { %v4002_v15 = vsel %vm1195_vm10, %v1042_v6, %v1164_v32  ;;  %v4004_v58 = vsel %vm1193_vm4, %v1041_v9, %v1162_v41  ;;  %v1108_v47 = vrot.slane %v1044_v16, 1  ;;  %v1109_v14 = vrot.slane %v1045_v45, 1  ;;  %vm5139_vm10 = vmmov %vm5136_vm0 }
 0x2c5   : > { %1227 = vrot.lane.b32.xlu1 %v4002_v15, %s2605_s18  ;;  %v1070_v63 = vsel %vm5133_vm1, %v1058_v48, %v1059_v35  ;;  %v1061_v39 = vrot.slane %v1045_v45, 7  ;;  %v1069_v9 = vsel %vm5134_vm5, %v1059_v35, %v1060_v18  ;;  %vm1030_vm6 = vcmp.gt.s32.totalorder %v2538_v29, 0  ;;  %vm5140_vm4 = vmmov %vm5136_vm0 }
 0x2c6   : > { %v1116_v6 = vsel %vm5135_vm11, %v1108_v47, %v1109_v14  ;;  %v1117_v32 = vsel %vm5136_vm0, %v1107_v40, %v1108_v47  ;;  %vm1031_vm9 = vcmp.gt.s32.totalorder %v2534_v1, 0  ;;  %v1046_v48 = vsel %vm1030_vm6, %v2538_v29, 1073741824  ;;  %vm5141_vm5 = vmmov %vm5138_vm2 }
 0x2c7   : > { %1225 = vrot.lane.b32.xlu0 %v4004_v58, %s2605_s18  ;;  %vm1167_vm7 = vcmp.lt.s32.totalorder %v1069_v9, %v1116_v6  ;;  %vm1165_vm12 = vcmp.lt.s32.totalorder %v1070_v63, %v1117_v32  ;;  %v1047_v22 = vsel %vm1031_vm9, %v2534_v1, 1073741824  ;;  %v1062_v35 = vrot.slane %v1046_v48, 7  ;;  %vm5142_vm11 = vmmov %vm5136_vm0 }
 0x2c8   : > { %v1168_v41 = vsel %vm1167_vm7, %v1069_v9, %v1116_v6  ;;  %v1166_v30 = vsel %vm1165_vm12, %v1070_v63, %v1117_v32  ;;  %v1110_v28 = vrot.slane %v1046_v48, 1  ;;  %v1111_v40 = vrot.slane %v1047_v22, 1  ;;  %vm5144_vm12 = vmmov %vm5138_vm2 }
 0x2c9   : > { %vm1199_vm13 = vcmp.lt.s32.totalorder %v1044_v16, %v1168_v41  ;;  %vm1197_vm15 = vcmp.lt.s32.totalorder %v1043_v51, %v1166_v30  ;;  %v1068_v47 = vsel %vm5137_vm14, %v1060_v18, %v1061_v39  ;;  %v1067_v63 = vsel %vm5138_vm2, %v1061_v39, %v1062_v35  ;;  %vm5147_vm9 = vmmov %vm5140_vm4 }
 0x2ca   : > { %v4023_v33 = vsel %vm1199_vm13, %v1044_v16, %v1168_v41  ;;  %v4025_v60 = vsel %vm1197_vm15, %v1043_v51, %v1166_v30  ;;  %v1115_v9 = vsel %vm5139_vm10, %v1109_v14, %v1110_v28  ;;  %v1063_v16 = vrot.slane %v1047_v22, 7 }
 0x2cb   : > { %1231 = vrot.lane.b32.xlu1 %v4023_v33, %s2605_s18  ;;  %1229 = vrot.lane.b32.xlu0 %v4025_v60, %s2605_s18  ;;  %v1112_v30 = vrot.slane %v3956_v27, 1  ;;  %v1114_v51 = vsel %vm5140_vm4, %v1110_v28, %v1111_v40  ;;  %vm1169_vm3 = vcmp.lt.s32.totalorder %v1068_v47, %v1115_v9  ;;  %v5143_v39 = vrot.slane %v3956_v27, 7 }
 0x2cc   : > { %vm1171_vm1 = vcmp.lt.s32.totalorder %v1067_v63, %v1114_v51  ;;  %v1170_v18 = vsel %vm1169_vm3, %v1068_v47, %v1115_v9  ;;  %v1066_v6 = vsel %vm5141_vm5, %v1062_v35, %v1063_v16  ;;  %v5146_v47 = vrot.slane %v3879_v43, 1 }
 0x2cd   : > { %v1113_v32 = vsel %vm5142_vm11, %v1111_v40, %v1112_v30  ;;  %v1172_v41 = vsel %vm1171_vm1, %v1067_v63, %v1114_v51  ;;  %vm1201_vm0 = vcmp.lt.s32.totalorder %v1045_v45, %v1170_v18  ;;  %v1065_v14 = vsel %vm5144_vm12, %v1063_v16, %v5143_v39  ;;  %v5149_v40 = vld [vmem:[#allocation21_spill] sm:$0xff] }
 0x2ce   : > { %vm1173_vm7 = vcmp.lt.s32.totalorder %v1066_v6, %v1113_v32  ;;  %vm1203_vm6 = vcmp.lt.s32.totalorder %v1046_v48, %v1172_v41  ;;  %v4048_v7 = vsel %vm1201_vm0, %v1045_v45, %v1170_v18  ;;  %v1128_v35 = vsel %vm5147_vm9, %v1112_v30, %v5146_v47 }
 0x2cf   : > { %5145 = vst [vmem:[#allocation42_spill] sm:$0xff] %v4048_v7  ;;  %v1174_v28 = vsel %vm1173_vm7, %v1066_v6, %v1113_v32  ;;  %v4054_v9 = vsel %vm1203_vm6, %v1046_v48, %v1172_v41  ;;  %1233 = vrot.lane.b32.xlu0 %v4048_v7, %s2605_s18  ;;  %vm5150_vm15 = vcmp.eq.s32.totalorder %v5149_v40, 127  ;;  %vm1369_vm10 = vcmp.eq.s32.totalorder %v2590_v8, 0 }
 0x2d0   : > { %5148 = vst [vmem:[#allocation43_spill] sm:$0xff] %v4054_v9  ;;  %vm1205_vm13 = vcmp.lt.s32.totalorder %v1047_v22, %v1174_v28  ;;  %v1144_v63 = vsel %vm5150_vm15, 1073741824, %v1128_v35  ;;  %1235 = vrot.lane.b32.xlu1 %v4054_v9, %s2605_s18  ;;  %vm1370_vm4 = vcmp.eq.s32.totalorder %v2586_v36, 0  ;;  %vm1371_vm3 = vcmp.eq.s32.totalorder %v2582_v12, 0 }
 0x2d1   : > { %v4062_v45 = vsel %vm1205_vm13, %v1047_v22, %v1174_v28  ;;  %vm1175_vm14 = vcmp.lt.s32.totalorder %v1065_v14, %v1144_v63  ;;  %vm1372_vm1 = vcmp.eq.s32.totalorder %v2578_v38, 0  ;;  %vm5154_vm5 = vcmp.eq.s32.totalorder %v3012_v20, 0 }
 0x2d2   : > { %5151 = vst [vmem:[#allocation44_spill] sm:$0xff] %v4062_v45  ;;  %v1176_v16 = vsel %vm1175_vm14, %v1065_v14, %v1144_v63  ;;  %vm5155_vm11 = vmmov %vm5154_vm5  ;;  %vm5157_vm7 = vcmp.eq.s32.totalorder %v3012_v20, 127  ;;  %vm1373_vm12 = vcmp.eq.s32.totalorder %v2574_v24, 0  ;;  %vm5164_vm8 = vcmp.ne.f32.partialorder %v3133_v44, 0.0 }
 0x2d3   : > { %vm1207_vm2 = vcmp.lt.s32.totalorder %v3956_v27, %v1176_v16  ;;  %1237 = vrot.lane.b32.xlu0 %v4062_v45, %s2605_s18  ;;  %vm5156_vm0 = vmmov %vm5154_vm5 }
 0x2d4   : > { %v4068_v43 = vsel %vm1207_vm2, %v3956_v27, %v1176_v16  ;;  %vm5158_vm6 = vmmov %vm5156_vm0 }
 0x2d5   : > { %5152 = vst [vmem:[#allocation45_spill] sm:$0xff] %v4068_v43  ;;  %1239 = vrot.lane.b32.xlu1 %v4068_v43, %s2605_s18  ;;  %vm5159_vm9 = vmmov %vm5156_vm0 }
 0x2d6   : > { %vm5160_vm15 = vmmov %vm5157_vm7 }
 0x2d7   : > { %1257 = vrot.lane.b32.xlu0 %v3995_v37, %s2606_s19  ;;  %vm5161_vm14 = vmmov %vm5156_vm0 }
 0x2d8   : > { %vm5162_vm2 = vmmov %vm5156_vm0 }
 0x2d9   : > { %1259 = vrot.lane.b32.xlu1 %v3907_v10, %s2606_s19 }
 0x2db   : > { %1261 = vrot.lane.b32.xlu0 %v3912_v42, %s2606_s19 }
 0x2dd   : > { %1263 = vrot.lane.b32.xlu1 %v3925_v50, %s2606_s19 }
 0x2df   : > { %1265 = vrot.lane.b32.xlu0 %v3935_v57, %s2606_s19 }
 0x2e1   : > { %1267 = vrot.lane.b32.xlu1 %v3945_v19, %s2606_s19 }
 0x2e3   : > { %1269 = vrot.lane.b32.xlu0 %v3958_v52, %s2606_s19 }
 0x2e5   : > { %1271 = vrot.lane.b32.xlu1 %v3977_v25, %s2606_s19 }
 0x2e7   : > { %1273 = vrot.lane.b32.xlu0 %v4004_v58, %s2606_s19 }
 0x2e9   : > { %1275 = vrot.lane.b32.xlu1 %v4002_v15, %s2606_s19 }
 0x2eb   : > { %1277 = vrot.lane.b32.xlu0 %v4025_v60, %s2606_s19 }
 0x2ed   : > { %1279 = vrot.lane.b32.xlu1 %v4023_v33, %s2606_s19 }
 0x2ef   : > { %1281 = vrot.lane.b32.xlu0 %v4048_v7, %s2606_s19 }
 0x2f1   : > { %1283 = vrot.lane.b32.xlu1 %v4054_v9, %s2606_s19 }
 0x2f3   : > { %1285 = vrot.lane.b32.xlu0 %v4062_v45, %s2606_s19 }
 0x2f5   : > { %1287 = vrot.lane.b32.xlu1 %v4068_v43, %s2606_s19 }
 0x323   : > { %v1212_v3 = vpop.permute.xlu0 %1211 }
 0x324   : > { %v1214_v22 = vpop.permute.xlu1 %1213  ;;  %v1242_v16 = vsel %vm5154_vm5, 1073741824, %v1212_v3 }
 0x325   : > { %v1243_v43 = vsel %vm5155_vm11, 1073741824, %v1214_v22  ;;  %vm1374_vm11 = vcmp.eq.s32.totalorder %v2570_v5, 0 }
 0x328   : > { %v1216_v27 = vpop.permute.xlu1 %1215  ;;  %v1218_v48 = vpop.permute.xlu0 %1217 }
 0x329   : > { %v1244_v13 = vsel %vm5158_vm6, 1073741824, %v1216_v27  ;;  %vm4138_vm6 = vmand %vm5164_vm8, %vm1369_vm10  ;;  %vm5175_vm8 = vcmp.eq.s32.totalorder %v3012_v20, 127 }
 0x32c   : > { %v1220_v30 = vpop.permute.xlu1 %1219 }
 0x32d   : > { %v4119_v22 = vsel %vm5161_vm14, 1073741824, %v1220_v30 }
 0x32e   : > { %v1222_v51 = vpop.permute.xlu0 %1221 }
 0x330   : > { %v1224_v18 = vpop.permute.xlu1 %1223 }
 0x331   : > { %v4128_v27 = vsel %vm5156_vm0, 1073741824, %v1224_v18 }
 0x335   : > { %v1210_v6 = vpop.permute.xlu0 %1209 }
 0x336   : > { %v1241_v45 = vsel %vm5156_vm0, 1073741824, %v1210_v6  ;;  %v4123_v6 = vsel %vm5162_vm2, 1073741824, %v1222_v51  ;;  %vm5171_vm2 = vcmp.eq.s32.totalorder %v3012_v20, 127 }
 0x337   : > { %v1228_v32 = vpop.permute.xlu1 %1227 }
 0x339   : > { %v1226_v41 = vpop.permute.xlu0 %1225 }
 0x33d   : > { %v1232_v39 = vpop.permute.xlu1 %1231  ;;  %v4088_v14 = vpop.permute.xlu0 %1229 }
 0x341   : > { %v4090_v28 = vpop.permute.xlu0 %1233 }
 0x342   : > { %v4092_v47 = vpop.permute.xlu1 %1235 }
 0x345   : > { %v4094_v35 = vpop.permute.xlu0 %1237 }
 0x347   : > { %v4096_v40 = vpop.permute.xlu1 %1239 }
 0x348   : > { %5153 = vst [vmem:[#allocation46_spill] sm:$0xff] %v4096_v40  ;;  %v1245_v40 = vsel %vm5159_vm9, 1073741824, %v1218_v48 }
 0x349   : > { %v1258_v63 = vpop.permute.xlu0 %1257 }
 0x34a   : > { %v1289_v9 = vsel %vm5157_vm7, 1073741824, %v1258_v63  ;;  %vm5163_vm7 = vmmov %vm5156_vm0 }
 0x34b   : > { %v1260_v7 = vpop.permute.xlu1 %1259  ;;  %vm1305_vm13 = vcmp.lt.s32.totalorder %v1241_v45, %v1289_v9  ;;  %v4132_v48 = vsel %vm5163_vm7, 1073741824, %v1228_v32  ;;  %vm5172_vm7 = vcmp.ne.f32.partialorder %v3156_v2, 0.0 }
 0x34c   : > { %v1290_v3 = vsel %vm5160_vm15, 1073741824, %v1260_v7  ;;  %v1306_v63 = vsel %vm1305_vm13, %v1241_v45, %v1289_v9  ;;  %vm5167_vm13 = vmmov %vm5156_vm0  ;;  %vm5168_vm15 = vcmp.ne.f32.partialorder %v3129_v11, 0.0 }
 0x34d   : > { %vm1307_vm5 = vcmp.lt.s32.totalorder %v1242_v16, %v1290_v3  ;;  %vm1337_vm9 = vcmp.lt.s32.totalorder %v3995_v37, %v1306_v63  ;;  %v1262_v45 = vpop.permute.xlu0 %1261  ;;  %v4145_v30 = vsel %vm5167_vm13, 1073741824, %v1226_v41  ;;  %vm4152_vm14 = vmand %vm5168_vm15, %vm1370_vm4 }
 0x34e   : > { %v1308_v9 = vsel %vm1307_vm5, %v1242_v16, %v1290_v3  ;;  %v1338_v51 = vsel %vm1337_vm9, %v3995_v37, %v1306_v63  ;;  %v1291_v32 = vsel %vm5171_vm2, 1073741824, %v1262_v45  ;;  %vm1375_vm5 = vcmp.eq.s32.totalorder %v2566_v54, 0  ;;  %vm4165_vm4 = vmand %vm5172_vm7, %vm1371_vm3 }
 0x34f   : > { %vm1339_vm10 = vcmp.lt.s32.totalorder %v3907_v10, %v1308_v9  ;;  %v1264_v16 = vpop.permute.xlu1 %1263  ;;  %vm1401_vm0 = vcmp.lt.s32.totalorder %v1338_v51, 1073741824  ;;  %v1433_v41 = vadd.s32 1, %v1338_v51  ;;  %vm1309_vm9 = vcmp.lt.s32.totalorder %v1243_v43, %v1291_v32 }
 0x350   : > { %v1340_v37 = vsel %vm1339_vm10, %v3907_v10, %v1308_v9  ;;  %vm1417_vm15 = vmand %vm4138_vm6, %vm1401_vm0  ;;  %v1310_v45 = vsel %vm1309_vm9, %v1243_v43, %v1291_v32  ;;  %v1292_v10 = vsel %vm5175_vm8, 1073741824, %v1264_v16 }
 0x351   : > { %vm1402_vm2 = vcmp.lt.s32.totalorder %v1340_v37, 1073741824  ;;  %v1434_v63 = vadd.s32 1, %v1340_v37  ;;  %vm5176_vm10 = vmmov %vm5167_vm13  ;;  %v4179_v8 = vsel %vm1417_vm15, %v1433_v41, %v2590_v8   ;;  %vm1341_vm7 = vcmp.lt.s32.totalorder %v3912_v42, %v1310_v45  ;;  %v1266_v7 = vpop.permute.xlu0 %1265 }
 0x352   : > { %v4176_v9 = vsel %vm5176_vm10, 1073741824, %v1232_v39  ;;  %v5177_v51 = vmov %v4179_v8  ;;  %vm1418_vm3 = vmand %vm4152_vm14, %vm1402_vm2  ;;  %vm1311_vm13 = vcmp.lt.s32.totalorder %v1244_v13, %v1292_v10  ;;  %v1342_v32 = vsel %vm1341_vm7, %v3912_v42, %v1310_v45 }
 0x353   : > { %v4185_v36 = vsel %vm1418_vm3, %v1434_v63, %v2586_v36   ;;  %v1312_v16 = vsel %vm1311_vm13, %v1244_v13, %v1292_v10  ;;  %v1293_v39 = vsel %vm5175_vm8, 1073741824, %v1266_v7  ;;  %v1268_v37 = vpop.permute.xlu1 %1267  ;;  %vm1403_vm6 = vcmp.lt.s32.totalorder %v1342_v32, 1073741824  ;;  %vm5182_vm13 = vmmov %vm5176_vm10  ;;  %1465 = vst [vmem:[#allocation9] sm:$0xff] (%p4442_p1), %v5177_v51 }
 0x354   : > { %v5178_v43 = vmov %v4185_v36  ;;  %v1435_v41 = vadd.s32 1, %v1342_v32  ;;  %vm5179_vm14 = vcmp.ne.f32.partialorder %v3166_v26, 0.0  ;;  %vm1343_vm9 = vcmp.lt.s32.totalorder %v3925_v50, %v1312_v16  ;;  %vm1419_vm2 = vmand %vm4165_vm4, %vm1403_vm6 }
 0x355   : > { %vm4194_vm0 = vmand %vm5179_vm14, %vm1372_vm1  ;;  %vm1313_vm15 = vcmp.lt.s32.totalorder %v1245_v40, %v1293_v39  ;;  %v4202_v13 = vsel %vm5182_vm13, 1073741824, %v4088_v14  ;;  %v1344_v36 = vsel %vm1343_vm9, %v3925_v50, %v1312_v16  ;;  %vm1377_vm1 = vcmp.eq.s32.totalorder %v2558_v56, 0  ;;  %v1270_v50 = vpop.permute.xlu0 %1269  ;;  %1466 = vst [vmem:[#allocation9 + $0x8] sm:$0xff] (%p4442_p1), %v5178_v43 }
 0x356   : > { %v1314_v42 = vsel %vm1313_vm15, %v1245_v40, %v1293_v39  ;;  %vm5183_vm10 = vmmov %vm5175_vm8  ;;  %v4211_v12 = vsel %vm1419_vm2, %v1435_v41, %v2582_v12   ;;  %vm1404_vm3 = vcmp.lt.s32.totalorder %v1344_v36, 1073741824  ;;  %v1436_v45 = vadd.s32 1, %v1344_v36 }
 0x357   : > { %v1294_v18 = vsel %vm5183_vm10, 1073741824, %v1268_v37  ;;  %v5184_v63 = vmov %v4211_v12  ;;  %vm5185_vm7 = vcmp.ne.f32.partialorder %v3190_v23, 0.0  ;;  %vm1345_vm4 = vcmp.lt.s32.totalorder %v3935_v57, %v1314_v42  ;;  %vm5188_vm14 = vmmov %vm5182_vm13  ;;  %v1272_v10 = vpop.permute.xlu1 %1271 }
 0x358   : > { %vm4217_vm8 = vmand %vm5185_vm7, %vm1373_vm12  ;;  %vm1378_vm6 = vcmp.eq.s32.totalorder %v2554_v4, 0  ;;  %v4226_v40 = vsel %vm5188_vm14, 1073741824, %v4090_v28  ;;  %v1346_v12 = vsel %vm1345_vm4, %v3935_v57, %v1314_v42  ;;  %vm1315_vm12 = vcmp.lt.s32.totalorder %v4119_v22, %v1294_v18  ;;  %1467 = vst [vmem:[#allocation9 + $0x10] sm:$0xff] (%p4442_p1), %v5184_v63 }
 0x359   : > { %vm1420_vm9 = vmand %vm4194_vm0, %vm1404_vm3  ;;  %vm1379_vm13 = vcmp.eq.s32.totalorder %v2550_v34, 0  ;;  %vm1405_vm2 = vcmp.lt.s32.totalorder %v1346_v12, 1073741824  ;;  %v1437_v32 = vadd.s32 1, %v1346_v12  ;;  %v1316_v57 = vsel %vm1315_vm12, %v4119_v22, %v1294_v18  ;;  %v1274_v41 = vpop.permute.xlu0 %1273 }
 0x35a   : > { %vm5189_vm15 = vmmov %vm5183_vm10  ;;  %v4236_v38 = vsel %vm1420_vm9, %v1436_v45, %v2578_v38   ;;  %vm5191_vm10 = vcmp.ne.f32.partialorder %v3230_v61, 0.0  ;;  %vm1347_vm4 = vcmp.lt.s32.totalorder %v3945_v19, %v1316_v57  ;;  %v1482_v11 = vcvt.s32.f32 (%p4442_p1), %v5178_v43 }
 0x35b   : > { %v1295_v3 = vsel %vm5189_vm15, 1073741824, %v1270_v50  ;;  %v5190_v7 = vmov %v4236_v38  ;;  %vm4242_vm0 = vmand %vm5191_vm10, %vm1374_vm11  ;;  %v1348_v22 = vsel %vm1347_vm4, %v3945_v19, %v1316_v57  ;;  %vm5197_vm11 = vcmp.ne.f32.partialorder %v3215_v0, 0.0 }
 0x35c   : > { %vm5194_vm3 = vmmov %vm5188_vm14  ;;  %vm1317_vm14 = vcmp.lt.s32.totalorder %v4123_v6, %v1295_v3  ;;  %v1438_v8 = vadd.s32 1, %v1348_v22  ;;  %1468 = vst [vmem:[#allocation9 + $0x18] sm:$0xff] (%p4442_p1), %v5190_v7 }
 0x35d   : > { %v4250_v16 = vsel %vm5194_vm3, 1073741824, %v4092_v47  ;;  %vm1421_vm7 = vmand %vm4217_vm8, %vm1405_vm2  ;;  %v1318_v37 = vsel %vm1317_vm14, %v4123_v6, %v1295_v3  ;;  %vm1406_vm2 = vcmp.lt.s32.totalorder %v1348_v22, 1073741824  ;;  %vm5200_vm3 = vcmp.eq.s32.totalorder %v2562_v55, 0  ;;  %v1276_v6 = vpop.permute.xlu1 %1275  ;;  %v1278_v50 = vpop.permute.xlu0 %1277 }
 0x35e   : > { %vm5195_vm9 = vmmov %vm5189_vm15  ;;  %v4259_v24 = vsel %vm1421_vm7, %v1437_v32, %v2574_v24   ;;  %vm1380_vm15 = vcmp.eq.s32.totalorder %v2546_v59, 0  ;;  %vm1349_vm10 = vcmp.lt.s32.totalorder %v3958_v52, %v1318_v37  ;;  %vm5201_vm7 = vcmp.ne.f32.partialorder %v3232_v62, 0.0 }
 0x35f   : > { %v1296_v38 = vsel %vm5195_vm9, 1073741824, %v1272_v10  ;;  %v5196_v39 = vmov %v4259_v24  ;;  %vm4266_vm12 = vmand %vm5197_vm11, %vm1375_vm5  ;;  %v1350_v36 = vsel %vm1349_vm10, %v3958_v52, %v1318_v37  ;;  %v1297_v42 = vsel %vm5195_vm9, 1073741824, %v1274_v41 }
 0x360   : > { %vm1319_vm8 = vcmp.lt.s32.totalorder %v4128_v27, %v1296_v38  ;;  %vm4278_vm4 = vmand %vm5201_vm7, %vm5200_vm3  ;;  %vm1381_vm3 = vcmp.eq.s32.totalorder %v2542_v46, 0  ;;  %vm1321_vm10 = vcmp.lt.s32.totalorder %v4145_v30, %v1297_v42  ;;  %1469 = vst [vmem:[#allocation9 + $0x20] sm:$0xff] (%p4442_p1), %v5196_v39  ;;  %v1485_v2 = vcvt.s32.f32 (%p4442_p1), %v5196_v39 }
 0x361   : > { %v1320_v19 = vsel %vm1319_vm8, %v4128_v27, %v1296_v38  ;;  %vm1422_vm5 = vmand %vm4242_vm0, %vm1406_vm2  ;;  %vm1407_vm8 = vcmp.lt.s32.totalorder %v1350_v36, 1073741824  ;;  %v1439_v27 = vadd.s32 1, %v1350_v36  ;;  %v1280_v10 = vpop.permute.xlu1 %1279 }
 0x362   : > { %vm1351_vm14 = vcmp.lt.s32.totalorder %v3977_v25, %v1320_v19  ;;  %vm5204_vm11 = vmmov %vm5195_vm9  ;;  %v4293_v5 = vsel %vm1422_vm5, %v1438_v8, %v2570_v5   ;;  %vm1382_vm9 = vcmp.eq.s32.totalorder %v2538_v29, 0 }
 0x363   : > { %v1298_v18 = vsel %vm5204_vm11, 1073741824, %v1276_v6  ;;  %v5205_v45 = vmov %v4293_v5  ;;  %v1352_v14 = vsel %vm1351_vm14, %v3977_v25, %v1320_v19  ;;  %vm1423_vm0 = vmand %vm4266_vm12, %vm1407_vm8  ;;  %v1322_v5 = vsel %vm1321_vm10, %v4145_v30, %v1297_v42 }
 0x364   : > { %vm1408_vm2 = vcmp.lt.s32.totalorder %v1352_v14, 1073741824  ;;  %v1440_v52 = vadd.s32 1, %v1352_v14  ;;  %vm1323_vm7 = vcmp.lt.s32.totalorder %v4132_v48, %v1298_v18  ;;  %v4302_v54 = vsel %vm1423_vm0, %v1439_v27, %v2566_v54   ;;  %vm5207_vm12 = vmmov %vm5204_vm11  ;;  %v5228_v27 = vld [vmem:[#allocation30_spill] sm:$0xff]  ;;  %1470 = vst [vmem:[#allocation9 + $0x28] sm:$0xff] (%p4442_p1), %v5205_v45 }
 0x365   : > { %v5206_v3 = vmov %v4302_v54  ;;  %vm1424_vm5 = vmand %vm4278_vm4, %vm1408_vm2  ;;  %v1324_v25 = vsel %vm1323_vm7, %v4132_v48, %v1298_v18  ;;  %v1299_v12 = vsel %vm5207_vm12, 1073741824, %v1278_v50  ;;  %vm5209_vm14 = vcmp.ne.f32.partialorder %v3383_v31, 0.0  ;;  %v1284_v37 = vpop.permute.xlu1 %1283  ;;  %v5230_v14 = vld [vmem:[#allocation42_spill] sm:$0xff]  ;;  %v5238_v54 = vld [vmem:[#allocation43_spill] sm:$0xff] }
 0x366   : > { %v4311_v55 = vsel %vm1424_vm5, %v1440_v52, %v2562_v55   ;;  %vm4317_vm11 = vmand %vm5209_vm14, %vm1377_vm1  ;;  %vm1353_vm4 = vcmp.lt.s32.totalorder %v4004_v58, %v1322_v5  ;;  %vm1355_vm8 = vcmp.lt.s32.totalorder %v4002_v15, %v1324_v25  ;;  %vm1325_vm0 = vcmp.lt.s32.totalorder %v4202_v13, %v1299_v12  ;;  %1471 = vst [vmem:[#allocation9 + $0x30] sm:$0xff] (%p4442_p1), %v5206_v3 }
 0x367   : > { %v5208_v32 = vmov %v4311_v55  ;;  %vm1383_vm2 = vcmp.eq.s32.totalorder %v2534_v1, 0  ;;  %v1354_v48 = vsel %vm1353_vm4, %v4004_v58, %v1322_v5  ;;  %vm5212_vm10 = vcmp.ne.f32.partialorder %v3381_v53, 0.0  ;;  %vm5215_vm1 = vmmov %vm5207_vm12  ;;  %v5240_v55 = vld [vmem:[#allocation33_spill] sm:$0xff] }
 0x368   : > { %vm4330_vm7 = vmand %vm5212_vm10, %vm1378_vm6  ;;  %v1356_v30 = vsel %vm1355_vm8, %v4002_v15, %v1324_v25  ;;  %v1326_v28 = vsel %vm1325_vm0, %v4202_v13, %v1299_v12  ;;  %v1300_v57 = vsel %vm5215_vm1, 1073741824, %v1280_v10  ;;  %vm1409_vm12 = vcmp.lt.s32.totalorder %v1354_v48, 1073741824  ;;  %v1282_v15 = vpop.permute.xlu0 %1281  ;;  %v5234_v25 = vld [vmem:[#allocation31_spill] sm:$0xff]  ;;  %1472 = vst [vmem:[#allocation9 + $0x38] sm:$0xff] (%p4442_p1), %v5208_v32 }
 0x369   : > { %v1441_v38 = vadd.s32 1, %v1354_v48  ;;  %vm1410_vm14 = vcmp.lt.s32.totalorder %v1356_v30, 1073741824  ;;  %v1442_v58 = vadd.s32 1, %v1356_v30  ;;  %vm5216_vm6 = vcmp.ne.f32.partialorder %v3413_v49, 0.0  ;;  %vm1425_vm0 = vmand %vm4317_vm11, %vm1409_vm12  ;;  %v1288_v52 = vpop.permute.xlu1 %1287 }
 0x36a   : > { %vm4343_vm4 = vmand %vm5216_vm6, %vm1379_vm13  ;;  %vm5219_vm8 = vcmp.eq.s32.totalorder %v3012_v20, 0  ;;  %vm1357_vm10 = vcmp.lt.s32.totalorder %v4025_v60, %v1326_v28  ;;  %vm1327_vm1 = vcmp.lt.s32.totalorder %v4176_v9, %v1300_v57  ;;  %vm5220_vm5 = vcmp.eq.s32.totalorder %v3012_v20, 127 }
 0x36b   : > { %v1255_v13 = vsel %vm5219_vm8, 1073741824, %v4094_v35  ;;  %v1301_v47 = vsel %vm5220_vm5, 1073741824, %v1282_v15  ;;  %v4357_v56 = vsel %vm1425_vm0, %v1441_v38, %v2558_v56   ;;  %vm1426_vm13 = vmand %vm4330_vm7, %vm1410_vm14  ;;  %v1358_v8 = vsel %vm1357_vm10, %v4025_v60, %v1326_v28  ;;  %v5244_v38 = vld [vmem:[#allocation44_spill] sm:$0xff] }
 0x36c   : > { %v5221_v41 = vmov %v4357_v56  ;;  %v1328_v35 = vsel %vm1327_vm1, %v4176_v9, %v1300_v57  ;;  %vm1329_vm11 = vcmp.lt.s32.totalorder %v4226_v40, %v1301_v47  ;;  %v4365_v4 = vsel %vm1426_vm13, %v1442_v58, %v2554_v4   ;;  %v5224_v56 = vld [vmem:[#allocation46_spill] sm:$0xff]  ;;  %v1286_v36 = vpop.permute.xlu0 %1285  ;;  %v5246_v58 = vld [vmem:[#allocation32_spill] sm:$0xff] }
 0x36d   : > { %v5222_v19 = vmov %v4365_v4  ;;  %vm1411_vm12 = vcmp.lt.s32.totalorder %v1358_v8, 1073741824  ;;  %v1443_v24 = vadd.s32 1, %v1358_v8  ;;  %vm5223_vm5 = vcmp.ne.f32.partialorder %v3418_v17, 0.0  ;;  %1473 = vst [vmem:[#allocation9 + $0x40] sm:$0xff] (%p4442_p1), %v5221_v41 }
 0x36e   : > { %vm1396_vm6 = vmand %vm5223_vm5, %vm1380_vm15  ;;  %vm1359_vm8 = vcmp.lt.s32.totalorder %v4023_v33, %v1328_v35  ;;  %vm5225_vm7 = vcmp.eq.s32.totalorder %v3012_v20, 0  ;;  %v1330_v4 = vsel %vm1329_vm11, %v4226_v40, %v1301_v47  ;;  %vm5226_vm0 = vcmp.eq.s32.totalorder %v3012_v20, 127  ;;  %1474 = vst [vmem:[#allocation9 + $0x48] sm:$0xff] (%p4442_p1), %v5222_v19 }
 0x36f   : > { %v1256_v60 = vsel %vm5225_vm7, 1073741824, %v5224_v56  ;;  %vm1427_vm14 = vmand %vm4343_vm4, %vm1411_vm12  ;;  %v1360_v9 = vsel %vm1359_vm8, %v4023_v33, %v1328_v35  ;;  %v1302_v6 = vsel %vm5226_vm0, 1073741824, %v1284_v37  ;;  %vm5229_vm10 = vcmp.ne.f32.partialorder %v5228_v27, 0.0 }
 0x370   : > { %v4382_v34 = vsel %vm1427_vm14, %v1443_v24, %v2550_v34   ;;  %vm1412_vm15 = vcmp.lt.s32.totalorder %v1360_v9, 1073741824  ;;  %v1444_v18 = vadd.s32 1, %v1360_v9  ;;  %vm1397_vm1 = vmand %vm5229_vm10, %vm1381_vm3  ;;  %vm1361_vm4 = vcmp.lt.s32.totalorder %v5230_v14, %v1330_v4 }
 0x371   : > { %v5227_v42 = vmov %v4382_v34  ;;  %vm1428_vm13 = vmand %vm1396_vm6, %vm1412_vm15  ;;  %v1362_v33 = vsel %vm1361_vm4, %v5230_v14, %v1330_v4  ;;  %vm1331_vm11 = vcmp.lt.s32.totalorder %v4250_v16, %v1302_v6  ;;  %vm5235_vm3 = vcmp.ne.f32.partialorder %v5234_v25, 0.0 }
 0x372   : > { %vm5231_vm12 = vmmov %vm5226_vm0  ;;  %v4396_v59 = vsel %vm1428_vm13, %v1444_v18, %v2546_v59   ;;  %vm1413_vm8 = vcmp.lt.s32.totalorder %v1362_v33, 1073741824  ;;  %v1445_v5 = vadd.s32 1, %v1362_v33  ;;  %v1332_v10 = vsel %vm1331_vm11, %v4250_v16, %v1302_v6  ;;  %1475 = vst [vmem:[#allocation9 + $0x50] sm:$0xff] (%p4442_p1), %v5227_v42 }
 0x373   : > { %v1303_v40 = vsel %vm5231_vm12, 1073741824, %v1286_v36  ;;  %vm5232_vm5 = vmmov %vm5226_vm0  ;;  %v5233_v50 = vmov %v4396_v59  ;;  %vm1363_vm14 = vcmp.lt.s32.totalorder %v5238_v54, %v1332_v10  ;;  %vm5241_vm10 = vcmp.ne.f32.partialorder %v5240_v55, 0.0 }
 0x374   : > { %v1304_v34 = vsel %vm5232_vm5, 1073741824, %v1288_v52  ;;  %vm4402_vm6 = vmand %vm5235_vm3, %vm1382_vm9  ;;  %vm1333_vm0 = vcmp.lt.s32.totalorder %v1255_v13, %v1303_v40  ;;  %v1364_v59 = vsel %vm1363_vm14, %v5238_v54, %v1332_v10  ;;  %vm5245_vm13 = vcmp.eq.s32.totalorder %v2530_v21, 0  ;;  %1476 = vst [vmem:[#allocation9 + $0x58] sm:$0xff] (%p4442_p1), %v5233_v50 }
 0x375   : > { %vm1429_vm7 = vmand %vm1397_vm1, %vm1413_vm8  ;;  %vm1335_vm15 = vcmp.lt.s32.totalorder %v1256_v60, %v1304_v34  ;;  %v1334_v28 = vsel %vm1333_vm0, %v1255_v13, %v1303_v40  ;;  %vm1414_vm1 = vcmp.lt.s32.totalorder %v1364_v59, 1073741824  ;;  %v1446_v57 = vadd.s32 1, %v1364_v59 }
 0x376   : > { %v4409_v46 = vsel %vm1429_vm7, %v1445_v5, %v2542_v46   ;;  %vm4416_vm9 = vmand %vm5241_vm10, %vm1383_vm2  ;;  %v1336_v16 = vsel %vm1335_vm15, %v1256_v60, %v1304_v34  ;;  %vm1365_vm4 = vcmp.lt.s32.totalorder %v5244_v38, %v1334_v28  ;;  %vm5247_vm11 = vcmp.ne.f32.partialorder %v5246_v58, 0.0 }
 0x377   : > { %v5239_v48 = vmov %v4409_v46  ;;  %vm1400_vm12 = vmand %vm5247_vm11, %vm5245_vm13  ;;  %v5248_v46 = vld [vmem:[#allocation45_spill] sm:$0xff]  ;;  %v1366_v22 = vsel %vm1365_vm4, %v5244_v38, %v1334_v28  ;;  %v5257_v59 = vmov %v5233_v50  ;;  %v5258_v34 = vmov %v5227_v42 }
 0x378   : > { %vm1367_vm5 = vcmp.lt.s32.totalorder %v5248_v46, %v1336_v16  ;;  %vm1430_vm8 = vmand %vm4402_vm6, %vm1414_vm1  ;;  %vm1415_vm2 = vcmp.lt.s32.totalorder %v1366_v22, 1073741824  ;;  %v1447_v47 = vadd.s32 1, %v1366_v22  ;;  %v5259_v4 = vmov %v5222_v19  ;;  %1477 = vst [vmem:[#allocation9 + $0x60] sm:$0xff] (%p4442_p1), %v5239_v48 }
 0x379   : > { %v1368_v15 = vsel %vm1367_vm5, %v5248_v46, %v1336_v16  ;;  %v4431_v29 = vsel %vm1430_vm8, %v1446_v57, %v2538_v29   ;;  %vm1431_vm7 = vmand %vm4416_vm9, %vm1415_vm2  ;;  %v5256_v46 = vmov %v5239_v48  ;;  %v5260_v56 = vmov %v5221_v41 }
 0x37a   : > { %v5249_v13 = vmov %v4431_v29  ;;  %vm1416_vm3 = vcmp.lt.s32.totalorder %v1368_v15, 1073741824  ;;  %v1448_v37 = vadd.s32 1, %v1368_v15  ;;  %v4436_v1 = vsel %vm1431_vm7, %v1447_v47, %v2534_v1   ;;  %999 = sbr.rel (!%p4442_p1) target bundleno = 679 (0x2a7), region = 83 }
 0x37b   : > { %v5250_v35 = vmov %v4436_v1  ;;  %vm1432_vm14 = vmand %vm1400_vm12, %vm1416_vm3  ;;  %v5255_v29 = vmov %v5249_v13  ;;  %v5261_v55 = vmov %v5208_v32  ;;  %v5262_v54 = vmov %v5206_v3  ;;  %1478 = vst [vmem:[#allocation9 + $0x68] sm:$0xff] (%p4442_p1), %v5249_v13 }
 0x37c   : > { %v4439_v21 = vsel %vm1432_vm14, %v1448_v37, %v2530_v21   ;;  %v5254_v1 = vmov %v5250_v35  ;;  %v5263_v5 = vmov %v5205_v45  ;;  %v5264_v24 = vmov %v5196_v39  ;;  %1479 = vst [vmem:[#allocation9 + $0x70] sm:$0xff] (%p4442_p1), %v5250_v35 }
 0x37d   : > { %v5251_v60 = vmov %v4439_v21  ;;  %v5265_v38 = vmov %v5190_v7  ;;  %v5266_v12 = vmov %v5184_v63  ;;  %v5267_v36 = vmov %v5178_v43 }
 0x37e   : > { %v5253_v21 = vmov %v5251_v60  ;;  %v5268_v8 = vmov %v5177_v51  ;;  %v1481_v9 = vcvt.s32.f32 (%p4442_p1), %v5177_v51  ;;  %1480 = vst [vmem:[#allocation9 + $0x78] sm:$0xff] (%p4442_p1), %v5251_v60  ;;  %v1484_v20 = vcvt.s32.f32 (%p4442_p1), %v5190_v7 }
 0x37f   :  { %v1483_v8 = vcvt.s32.f32 %v5184_v63  ;;  %v1486_v44 = vcvt.s32.f32 %v5205_v45  ;;  %v1488_v26 = vcvt.s32.f32 %v5208_v32  ;;  %v1487_v23 = vcvt.s32.f32 %v5206_v3 }
 0x380   :  { %1497 = vmax.xlane.f32.xlu0 %v1481_v9  ;;  %v1490_v0 = vcvt.s32.f32 %v5222_v19  ;;  %v1489_v61 = vcvt.s32.f32 %v5221_v41  ;;  %v1492_v62 = vcvt.s32.f32 %v5233_v50  ;;  %v1491_v53 = vcvt.s32.f32 %v5227_v42 }
 0x381   :  { %1501 = vmax.xlane.f32.xlu1 %v1483_v8  ;;  %v1494_v31 = vcvt.s32.f32 %v5249_v13  ;;  %v1493_v49 = vcvt.s32.f32 %v5239_v48  ;;  %v1496_v17 = vcvt.s32.f32 %v5251_v60  ;;  %v1495_v29 = vcvt.s32.f32 %v5250_v35 }
 0x382   :  { %vm1551_vm6 = vcmp.lt.s32.totalorder %v5178_v43, 5  ;;  %vm1550_vm0 = vcmp.lt.s32.totalorder %v5177_v51, 5  ;;  %vm1553_vm15 = vcmp.lt.s32.totalorder %v5190_v7, 5  ;;  %vm1552_vm10 = vcmp.lt.s32.totalorder %v5184_v63, 5 }
 0x383   :  { %vm1555_vm9 = vcmp.lt.s32.totalorder %v5205_v45, 5  ;;  %vm1554_vm1 = vcmp.lt.s32.totalorder %v5196_v39, 5  ;;  %vm1557_vm4 = vcmp.lt.s32.totalorder %v5208_v32, 5  ;;  %vm1556_vm13 = vcmp.lt.s32.totalorder %v5206_v3, 5 }
 0x384   :  { %1499 = vmax.xlane.f32.xlu0 %v1482_v11  ;;  %vm1559_vm11 = vcmp.lt.s32.totalorder %v5222_v19, 5  ;;  %vm1558_vm12 = vcmp.lt.s32.totalorder %v5221_v41, 5  ;;  %vm1561_vm5 = vcmp.lt.s32.totalorder %v5233_v50, 5  ;;  %vm1560_vm8 = vcmp.lt.s32.totalorder %v5227_v42, 5 }
 0x385   :  { %1503 = vmax.xlane.f32.xlu1 %v1484_v20  ;;  %vm1563_vm2 = vcmp.lt.s32.totalorder %v5249_v13, 5  ;;  %vm1562_vm3 = vcmp.lt.s32.totalorder %v5239_v48, 5  ;;  %vm1565_vm7 = vcmp.lt.s32.totalorder %v5251_v60, 5  ;;  %vm1564_vm14 = vcmp.lt.s32.totalorder %v5250_v35, 5 }
 0x388   :  { %1505 = vmax.xlane.f32.xlu0 %v1485_v2 }
 0x389   :  { %1507 = vmax.xlane.f32.xlu1 %v1486_v44 }
 0x38c   :  { %1509 = vmax.xlane.f32.xlu0 %v1487_v23 }
 0x38d   :  { %1511 = vmax.xlane.f32.xlu1 %v1488_v26 }
 0x390   :  { %1513 = vmax.xlane.f32.xlu0 %v1489_v61 }
 0x391   :  { %1515 = vmax.xlane.f32.xlu1 %v1490_v0 }
 0x394   :  { %1517 = vmax.xlane.f32.xlu0 %v1491_v53 }
 0x395   :  { %1519 = vmax.xlane.f32.xlu1 %v1492_v62 }
 0x398   :  { %1521 = vmax.xlane.f32.xlu0 %v1493_v49 }
 0x399   :  { %1523 = vmax.xlane.f32.xlu1 %v1494_v31 }
 0x39c   :  { %1525 = vmax.xlane.f32.xlu0 %v1495_v29 }
 0x39d   :  { %1527 = vmax.xlane.f32.xlu1 %v1496_v17 }
 0x409   :  { %v1498_v21 = vpop.xlane.xlu0 %1497 }
 0x40a   :  { %v1502_v1 = vpop.xlane.xlu1 %1501 }
 0x40d   :  { %v1500_v56 = vpop.xlane.xlu0 %1499 }
 0x40e   :  { %v1504_v24 = vpop.xlane.xlu1 %1503 }
 0x411   :  { %v1506_v6 = vpop.xlane.xlu0 %1505 }
 0x412   :  { %v1508_v4 = vpop.xlane.xlu1 %1507  ;;  %v1529_v34 = vmax.f32 %v1498_v21, %v1506_v6 }
 0x413   :  { %v1530_v40 = vmax.f32 %v1500_v56, %v1508_v4 }
 0x415   :  { %v1510_v18 = vpop.xlane.xlu0 %1509 }
 0x416   :  { %v1512_v36 = vpop.xlane.xlu1 %1511  ;;  %v1531_v10 = vmax.f32 %v1502_v1, %v1510_v18 }
 0x417   :  { %v1532_v12 = vmax.f32 %v1504_v24, %v1512_v36 }
 0x419   :  { %v1514_v14 = vpop.xlane.xlu0 %1513 }
 0x41a   :  { %v1516_v27 = vpop.xlane.xlu1 %1515  ;;  %v1533_v59 = vmax.f32 %v1529_v34, %v1514_v14 }
 0x41b   :  { %v1534_v54 = vmax.f32 %v1530_v40, %v1516_v27 }
 0x41d   :  { %v1518_v33 = vpop.xlane.xlu0 %1517 }
 0x41e   :  { %v1520_v52 = vpop.xlane.xlu1 %1519  ;;  %v1535_v30 = vmax.f32 %v1531_v10, %v1518_v33 }
 0x41f   :  { %v1536_v55 = vmax.f32 %v1532_v12, %v1520_v52 }
 0x421   :  { %v1522_v25 = vpop.xlane.xlu0 %1521 }
 0x422   :  { %v1524_v5 = vpop.xlane.xlu1 %1523  ;;  %v1537_v16 = vmax.f32 %v1533_v59, %v1522_v25 }
 0x423   :  { %v1538_v28 = vmax.f32 %v1534_v54, %v1524_v5 }
 0x425   :  { %v1526_v38 = vpop.xlane.xlu0 %1525  ;;  %v1541_v22 = vmax.f32 %v1537_v16, %v1538_v28 }
 0x426   :  { %v1528_v57 = vpop.xlane.xlu1 %1527  ;;  %v1539_v46 = vmax.f32 %v1535_v30, %v1526_v38 }
 0x427   :  { %v1540_v58 = vmax.f32 %v1536_v55, %v1528_v57 }
 0x429   :  { %v1542_v15 = vmax.f32 %v1539_v46, %v1540_v58 }
 0x42b   :  { %v1543_v47 = vmax.f32 %v1541_v22, %v1542_v15 }
 0x42d   :  { %v1544_v37 = vrot.slane %v1543_v47, 4 }
 0x42f   :  { %v1545_v56 = vmax.f32 %v1543_v47, %v1544_v37 }
 0x431   :  { %v1546_v21 = vrot.slane %v1545_v56, 2 }
 0x433   :  { %v1547_v4 = vmax.f32 %v1545_v56, %v1546_v21 }
 0x435   :  { %v1548_v6 = vrot.slane %v1547_v4, 1 }
 0x437   :  { %v1549_v24 = vmax.f32 %v1547_v4, %v1548_v6 }
 0x439   :  { %v1567_v1 = vsub.f32 %v1549_v24, %v1482_v11  ;;  %v1566_v36 = vsub.f32 %v1549_v24, %v1481_v9  ;;  %v1569_v14 = vsub.f32 %v1549_v24, %v1484_v20  ;;  %v1568_v52 = vsub.f32 %v1549_v24, %v1483_v8 }
 0x43a   :  { %v1571_v9 = vsub.f32 %v1549_v24, %v1486_v44  ;;  %v1570_v20 = vsub.f32 %v1549_v24, %v1485_v2  ;;  %v1573_v8 = vsub.f32 %v1549_v24, %v1488_v26  ;;  %v1572_v11 = vsub.f32 %v1549_v24, %v1487_v23 }
 0x43b   :  { %v4568_v18 = vsel %vm1551_vm6, 0.0, %v1567_v1  ;;  %v4570_v27 = vsel %vm1550_vm0, 0.0, %v1566_v36  ;;  %v4580_v51 = vsel %vm1553_vm15, 0.0, %v1569_v14  ;;  %v4582_v43 = vsel %vm1552_vm10, 0.0, %v1568_v52 }
 0x43c   :  { %1600 = vadd.xlane.f32.xlu1 %v4568_v18  ;;  %1598 = vadd.xlane.f32.xlu0 %v4570_v27  ;;  %v4592_v7 = vsel %vm1555_vm9, 0.0, %v1571_v9  ;;  %v4594_v63 = vsel %vm1554_vm1, 0.0, %v1570_v20  ;;  %v4604_v45 = vsel %vm1557_vm4, 0.0, %v1573_v8  ;;  %v4606_v39 = vsel %vm1556_vm13, 0.0, %v1572_v11 }
 0x43d   :  { %v1575_v44 = vsub.f32 %v1549_v24, %v1490_v0  ;;  %v1574_v2 = vsub.f32 %v1549_v24, %v1489_v61  ;;  %v1577_v26 = vsub.f32 %v1549_v24, %v1492_v62  ;;  %v1576_v23 = vsub.f32 %v1549_v24, %v1491_v53 }
 0x43e   :  { %v1579_v0 = vsub.f32 %v1549_v24, %v1494_v31  ;;  %v1578_v61 = vsub.f32 %v1549_v24, %v1493_v49  ;;  %v1581_v62 = vsub.f32 %v1549_v24, %v1496_v17  ;;  %v1580_v53 = vsub.f32 %v1549_v24, %v1495_v29 }
 0x43f   :  { %v4616_v32 = vsel %vm1559_vm11, 0.0, %v1575_v44  ;;  %v4618_v3 = vsel %vm1558_vm12, 0.0, %v1574_v2  ;;  %v4628_v19 = vsel %vm1561_vm5, 0.0, %v1577_v26  ;;  %v4630_v41 = vsel %vm1560_vm8, 0.0, %v1576_v23 }
 0x440   :  { %1604 = vadd.xlane.f32.xlu1 %v4580_v51  ;;  %1602 = vadd.xlane.f32.xlu0 %v4582_v43  ;;  %v4640_v50 = vsel %vm1563_vm2, 0.0, %v1579_v0  ;;  %v4642_v42 = vsel %vm1562_vm3, 0.0, %v1578_v61  ;;  %v4652_v13 = vsel %vm1565_vm7, 0.0, %v1581_v62  ;;  %v4654_v48 = vsel %vm1564_vm14, 0.0, %v1580_v53 }
 0x444   :  { %1608 = vadd.xlane.f32.xlu1 %v4592_v7  ;;  %1606 = vadd.xlane.f32.xlu0 %v4594_v63 }
 0x448   :  { %1612 = vadd.xlane.f32.xlu1 %v4604_v45  ;;  %1610 = vadd.xlane.f32.xlu0 %v4606_v39 }
 0x44c   :  { %1616 = vadd.xlane.f32.xlu1 %v4616_v32  ;;  %1614 = vadd.xlane.f32.xlu0 %v4618_v3 }
 0x450   :  { %1620 = vadd.xlane.f32.xlu1 %v4628_v19  ;;  %1618 = vadd.xlane.f32.xlu0 %v4630_v41 }
 0x454   :  { %1624 = vadd.xlane.f32.xlu1 %v4640_v50  ;;  %1622 = vadd.xlane.f32.xlu0 %v4642_v42 }
 0x458   :  { %1628 = vadd.xlane.f32.xlu1 %v4652_v13  ;;  %1626 = vadd.xlane.f32.xlu0 %v4654_v48 }
 0x4c5   :  { %v1601_v31 = vpop.xlane.xlu1 %1600  ;;  %v1599_v49 = vpop.xlane.xlu0 %1598 }
 0x4c6   :  { %v1630_v17 = vadd.f32 %v1601_v31, %v1599_v49 }
 0x4c9   :  { %v1605_v29 = vpop.xlane.xlu1 %1604  ;;  %v1603_v33 = vpop.xlane.xlu0 %1602 }
 0x4ca   :  { %v1631_v40 = vadd.f32 %v1630_v17, %v1603_v33  ;;  %v1690_v33 = vld [vmem:[#allocation7 + $0x18] sm:$0xff] }
 0x4cc   :  { %v1632_v34 = vadd.f32 %v1631_v40, %v1605_v29 }
 0x4cd   :  { %v1609_v5 = vpop.xlane.xlu1 %1608  ;;  %v1607_v25 = vpop.xlane.xlu0 %1606 }
 0x4ce   :  { %v1633_v60 = vadd.f32 %v1632_v34, %v1607_v25  ;;  %v1689_v25 = vld [vmem:[#allocation7 + $0x10] sm:$0xff] }
 0x4d0   :  { %v1634_v12 = vadd.f32 %v1633_v60, %v1609_v5 }
 0x4d1   :  { %v1613_v35 = vpop.xlane.xlu1 %1612  ;;  %v1611_v10 = vpop.xlane.xlu0 %1610 }
 0x4d2   :  { %v1635_v54 = vadd.f32 %v1634_v12, %v1611_v10 }
 0x4d4   :  { %v1636_v59 = vadd.f32 %v1635_v54, %v1613_v35 }
 0x4d5   :  { %v1617_v55 = vpop.xlane.xlu1 %1616  ;;  %v1615_v30 = vpop.xlane.xlu0 %1614 }
 0x4d6   :  { %v1637_v28 = vadd.f32 %v1636_v59, %v1615_v30 }
 0x4d8   :  { %v1638_v16 = vadd.f32 %v1637_v28, %v1617_v55 }
 0x4d9   :  { %v1621_v57 = vpop.xlane.xlu1 %1620  ;;  %v1619_v38 = vpop.xlane.xlu0 %1618 }
 0x4da   :  { %v1639_v58 = vadd.f32 %v1638_v16, %v1619_v38  ;;  %v1692_v16 = vld [vmem:[#allocation7 + $0x28] sm:$0xff] }
 0x4dc   :  { %v1640_v46 = vadd.f32 %v1639_v58, %v1621_v57  ;;  %v1691_v58 = vld [vmem:[#allocation7 + $0x20] sm:$0xff] }
 0x4dd   :  { %v1625_v22 = vpop.xlane.xlu1 %1624  ;;  %v1623_v15 = vpop.xlane.xlu0 %1622 }
 0x4de   :  { %v1641_v47 = vadd.f32 %v1640_v46, %v1623_v15 }
 0x4e0   :  { %v1642_v37 = vadd.f32 %v1641_v47, %v1625_v22 }
 0x4e1   :  { %v1627_v56 = vpop.xlane.xlu0 %1626  ;;  %v1629_v4 = vpop.xlane.xlu1 %1628 }
 0x4e2   :  { %v1643_v21 = vadd.f32 %v1642_v37, %v1627_v56 }
 0x4e4   :  { %v1644_v6 = vadd.f32 %v1643_v21, %v1629_v4  ;;  %v1694_v21 = vld [vmem:[#allocation7 + $0x38] sm:$0xff] }
 0x4e6   :  { %v1645_v24 = vrot.slane %v1644_v6, 4 }
 0x4e8   :  { %v1646_v1 = vadd.f32 %v1645_v24, %v1644_v6  ;;  %v1693_v24 = vld [vmem:[#allocation7 + $0x30] sm:$0xff] }
 0x4ea   :  { %v1647_v36 = vrot.slane %v1646_v1, 2 }
 0x4ec   :  { %v1648_v14 = vadd.f32 %v1647_v36, %v1646_v1 }
 0x4ee   :  { %v1649_v52 = vrot.slane %v1648_v14, 1 }
 0x4f0   :  { %v1650_v9 = vadd.f32 %v1649_v52, %v1648_v14 }
 0x4f2   :  { %2256 = vrcp.f32 %v1650_v9  ;;  %vm1651_vm6 = vcmp.gt.f32.partialorder %v1650_v9, 0.0 }
 0x4ff   :  { %v2257_v20 = vpop.eup %2256 }
 0x500   :  { %v1654_v8 = vsel %vm1651_vm6, %v2257_v20, 0.0 }
 0x501   :  { %v4659_v11 = vmul.f32 %v1654_v8, %v4568_v18  ;;  %v4662_v44 = vmul.f32 %v1654_v8, %v4570_v27  ;;  %v4665_v2 = vmul.f32 %v1654_v8, %v4580_v51  ;;  %v4668_v26 = vmul.f32 %v1654_v8, %v4582_v43 }
 0x502   :  { %v4671_v23 = vmul.f32 %v1654_v8, %v4592_v7  ;;  %v4674_v0 = vmul.f32 %v1654_v8, %v4594_v63  ;;  %v4677_v61 = vmul.f32 %v1654_v8, %v4604_v45  ;;  %v4680_v18 = vmul.f32 %v1654_v8, %v4606_v39 }
 0x503   :  { %vm1704_vm0 = vcmp.gt.f32.partialorder %v4659_v11, 0.0  ;;  %1672 = vst [vmem:[#allocation11 + $0x8] sm:$0xff] %v4659_v11  ;;  %vm1703_vm15 = vcmp.gt.f32.partialorder %v4662_v44, 0.0  ;;  %1671 = vst [vmem:[#allocation11] sm:$0xff] %v4662_v44  ;;  %vm1706_vm10 = vcmp.gt.f32.partialorder %v4665_v2, 0.0  ;;  %vm1705_vm9 = vcmp.gt.f32.partialorder %v4668_v26, 0.0 }
 0x504   :  { %1674 = vst [vmem:[#allocation11 + $0x18] sm:$0xff] %v4665_v2  ;;  %1673 = vst [vmem:[#allocation11 + $0x10] sm:$0xff] %v4668_v26  ;;  %v1720_v27 = vsel %vm1704_vm0, %v4659_v11, 1.0  ;;  %v1719_v51 = vsel %vm1703_vm15, %v4662_v44, 1.0  ;;  %v1722_v43 = vsel %vm1706_vm10, %v4665_v2, 1.0  ;;  %v1721_v7 = vsel %vm1705_vm9, %v4668_v26, 1.0 }
 0x505   :  { %1676 = vst [vmem:[#allocation11 + $0x28] sm:$0xff] %v4671_v23  ;;  %1675 = vst [vmem:[#allocation11 + $0x20] sm:$0xff] %v4674_v0  ;;  %2258 = vrcp.f32 %v1720_v27  ;;  %vm1708_vm1 = vcmp.gt.f32.partialorder %v4671_v23, 0.0  ;;  %vm1707_vm4 = vcmp.gt.f32.partialorder %v4674_v0, 0.0  ;;  %vm1710_vm13 = vcmp.gt.f32.partialorder %v4677_v61, 0.0  ;;  %v1695_v44 = vld [vmem:[#allocation7 + $0x40] sm:$0xff] }
 0x506   :  { %1678 = vst [vmem:[#allocation11 + $0x38] sm:$0xff] %v4677_v61  ;;  %1677 = vst [vmem:[#allocation11 + $0x30] sm:$0xff] %v4680_v18  ;;  %2260 = vrcp.f32 %v1719_v51  ;;  %v1724_v63 = vsel %vm1708_vm1, %v4671_v23, 1.0  ;;  %v1723_v45 = vsel %vm1707_vm4, %v4674_v0, 1.0  ;;  %v4716_v39 = vmul.f32 %v1654_v8, %v4616_v32  ;;  %v1698_v51 = vld [vmem:[#allocation7 + $0x58] sm:$0xff] }
 0x507   :  { %2262 = vrcp.f32 %v1722_v43  ;;  %v4719_v62 = vmul.f32 %v1654_v8, %v4618_v3  ;;  %vm1709_vm11 = vcmp.gt.f32.partialorder %v4680_v18, 0.0  ;;  %v4723_v53 = vmul.f32 %v1654_v8, %v4628_v19 }
 0x508   :  { %2264 = vrcp.f32 %v1721_v7  ;;  %v4726_v31 = vmul.f32 %v1654_v8, %v4630_v41  ;;  %1680 = vst [vmem:[#allocation11 + $0x48] sm:$0xff] %v4716_v39  ;;  %v4731_v32 = vmul.f32 %v1654_v8, %v4640_v50  ;;  %v1726_v3 = vsel %vm1710_vm13, %v4677_v61, 1.0  ;;  %v1697_v7 = vld [vmem:[#allocation7 + $0x50] sm:$0xff] }
 0x509   :  { %2266 = vrcp.f32 %v1724_v63  ;;  %1679 = vst [vmem:[#allocation11 + $0x40] sm:$0xff] %v4719_v62  ;;  %1682 = vst [vmem:[#allocation11 + $0x58] sm:$0xff] %v4723_v53  ;;  %v1725_v19 = vsel %vm1709_vm11, %v4680_v18, 1.0  ;;  %vm1712_vm12 = vcmp.gt.f32.partialorder %v4716_v39, 0.0  ;;  %vm1711_vm5 = vcmp.gt.f32.partialorder %v4719_v62, 0.0 }
 0x50a   :  { %2268 = vrcp.f32 %v1723_v45  ;;  %1681 = vst [vmem:[#allocation11 + $0x50] sm:$0xff] %v4726_v31  ;;  %1684 = vst [vmem:[#allocation11 + $0x68] sm:$0xff] %v4731_v32  ;;  %v4745_v41 = vmul.f32 %v1654_v8, %v4642_v42  ;;  %v4748_v50 = vmul.f32 %v1654_v8, %v4652_v13  ;;  %v4751_v49 = vmul.f32 %v1654_v8, %v4654_v48  ;;  %v1688_v42 = vld [vmem:[#allocation7 + $0x8] sm:$0xff]  ;;  %v1687_v13 = vld [vmem:[#allocation7] sm:$0xff] }
 0x50b   :  { %2270 = vrcp.f32 %v1726_v3  ;;  %v1728_v17 = vsel %vm1712_vm12, %v4716_v39, 1.0  ;;  %v1727_v29 = vsel %vm1711_vm5, %v4719_v62, 1.0  ;;  %vm1714_vm8 = vcmp.gt.f32.partialorder %v4723_v53, 0.0  ;;  %v1696_v8 = vld [vmem:[#allocation7 + $0x48] sm:$0xff] }
 0x50c   :  { %2272 = vrcp.f32 %v1725_v19  ;;  %1683 = vst [vmem:[#allocation11 + $0x60] sm:$0xff] %v4745_v41  ;;  %1686 = vst [vmem:[#allocation11 + $0x78] sm:$0xff] %v4748_v50  ;;  %vm1713_vm2 = vcmp.gt.f32.partialorder %v4726_v31, 0.0  ;;  %v1730_v40 = vsel %vm1714_vm8, %v4723_v53, 1.0  ;;  %vm1716_vm3 = vcmp.gt.f32.partialorder %v4731_v32, 0.0  ;;  %v1700_v19 = vld [vmem:[#allocation7 + $0x68] sm:$0xff] }
 0x50d   :  { %1685 = vst [vmem:[#allocation11 + $0x70] sm:$0xff] %v4751_v49  ;;  %2274 = vrcp.f32 %v1728_v17  ;;  %v1729_v60 = vsel %vm1713_vm2, %v4726_v31, 1.0  ;;  %vm1715_vm7 = vcmp.gt.f32.partialorder %v4745_v41, 0.0  ;;  %v1732_v57 = vsel %vm1716_vm3, %v4731_v32, 1.0 }
 0x50e   :  { %2276 = vrcp.f32 %v1727_v29  ;;  %v1731_v46 = vsel %vm1715_vm7, %v4745_v41, 1.0  ;;  %vm1718_vm14 = vcmp.gt.f32.partialorder %v4748_v50, 0.0  ;;  %vm1717_vm6 = vcmp.gt.f32.partialorder %v4751_v49, 0.0  ;;  %v1699_v29 = vld [vmem:[#allocation7 + $0x60] sm:$0xff] }
 0x50f   :  { %2278 = vrcp.f32 %v1730_v40  ;;  %v1734_v4 = vsel %vm1718_vm14, %v4748_v50, 1.0  ;;  %v1733_v1 = vsel %vm1717_vm6, %v4751_v49, 1.0 }
 0x510   :  { %2280 = vrcp.f32 %v1729_v60 }
 0x511   :  { %2282 = vrcp.f32 %v1732_v57 }
 0x512   :  { %v2259_v48 = vpop.eup %2258  ;;  %2284 = vrcp.f32 %v1731_v46 }
 0x513   :  { %v2261_v34 = vpop.eup %2260  ;;  %v1738_v5 = vmul.f32 %v2259_v48, %v1688_v42  ;;  %2286 = vrcp.f32 %v1734_v4 }
 0x514   :  { %v2263_v12 = vpop.eup %2262  ;;  %v1736_v35 = vmul.f32 %v2261_v34, %v1687_v13  ;;  %2288 = vrcp.f32 %v1733_v1  ;;  %v1701_v34 = vld [vmem:[#allocation7 + $0x70] sm:$0xff] }
 0x515   :  { %v2265_v10 = vpop.eup %2264  ;;  %v4774_v54 = vsel %vm1704_vm0, %v1738_v5, 3e+38  ;;  %v1742_v59 = vmul.f32 %v2263_v12, %v1690_v33  ;;  %v1702_v33 = vld [vmem:[#allocation7 + $0x78] sm:$0xff] }
 0x516   :  { %v2267_v55 = vpop.eup %2266  ;;  %1785 = vmin.xlane.f32.xlu1 %v4774_v54  ;;  %v4779_v30 = vsel %vm1703_vm15, %v1736_v35, 3e+38  ;;  %v1740_v28 = vmul.f32 %v2265_v10, %v1689_v25 }
 0x517   :  { %v2269_v38 = vpop.eup %2268  ;;  %1783 = vmin.xlane.f32.xlu0 %v4779_v30  ;;  %v4792_v22 = vsel %vm1706_vm10, %v1742_v59, 3e+38  ;;  %v1746_v15 = vmul.f32 %v2267_v55, %v1692_v16 }
 0x518   :  { %v2271_v47 = vpop.eup %2270  ;;  %v4797_v37 = vsel %vm1705_vm9, %v1740_v28, 3e+38  ;;  %v1744_v56 = vmul.f32 %v2269_v38, %v1691_v58 }
 0x519   :  { %v2273_v6 = vpop.eup %2272  ;;  %v4808_v36 = vsel %vm1708_vm1, %v1746_v15, 3e+38  ;;  %v1750_v14 = vmul.f32 %v2271_v47, %v1694_v21 }
 0x51a   :  { %1789 = vmin.xlane.f32.xlu1 %v4792_v22  ;;  %v2275_v52 = vpop.eup %2274  ;;  %v4813_v9 = vsel %vm1707_vm4, %v1744_v56, 3e+38  ;;  %v1748_v20 = vmul.f32 %v2273_v6, %v1693_v24 }
 0x51b   :  { %1787 = vmin.xlane.f32.xlu0 %v4797_v37  ;;  %v2277_v11 = vpop.eup %2276  ;;  %v4818_v2 = vsel %vm1710_vm13, %v1750_v14, 3e+38  ;;  %v1754_v26 = vmul.f32 %v2275_v52, %v1696_v8 }
 0x51c   :  { %v2279_v23 = vpop.eup %2278  ;;  %v4823_v0 = vsel %vm1709_vm11, %v1748_v20, 3e+38  ;;  %v1752_v27 = vmul.f32 %v2277_v11, %v1695_v44 }
 0x51d   :  { %v2281_v43 = vpop.eup %2280  ;;  %v4828_v63 = vsel %vm1712_vm12, %v1754_v26, 3e+38  ;;  %v1758_v61 = vmul.f32 %v2279_v23, %v1698_v51 }
 0x51e   :  { %1793 = vmin.xlane.f32.xlu1 %v4808_v36  ;;  %v2283_v45 = vpop.eup %2282  ;;  %v4833_v3 = vsel %vm1711_vm5, %v1752_v27, 3e+38  ;;  %v1756_v18 = vmul.f32 %v2281_v43, %v1697_v7 }
 0x51f   :  { %1791 = vmin.xlane.f32.xlu0 %v4813_v9  ;;  %v2285_v17 = vpop.eup %2284  ;;  %v4838_v42 = vsel %vm1714_vm8, %v1758_v61, 3e+38  ;;  %v1762_v39 = vmul.f32 %v2283_v45, %v1700_v19  ;;  %v5269_v19 = vld [vmem:[#allocation22_spill] sm:$0xff] }
 0x520   :  { %v2287_v13 = vpop.eup %2286  ;;  %v4843_v48 = vsel %vm1713_vm2, %v1756_v18, 3e+38  ;;  %v1760_v62 = vmul.f32 %v2285_v17, %v1699_v29  ;;  %v5270_v17 = vcvt.s32.f32 %v5269_v19 }
 0x521   :  { %v2289_v40 = vpop.eup %2288  ;;  %v4848_v5 = vsel %vm1716_vm3, %v1762_v39, 3e+38  ;;  %v1766_v53 = vmul.f32 %v2287_v13, %v1702_v33  ;;  %v5271_v39 = vld [vmem:[#allocation23_spill] sm:$0xff]  ;;  %v5273_v33 = vld [vmem:[#allocation25_spill] sm:$0xff] }
 0x522   :  { %1797 = vmin.xlane.f32.xlu1 %v4818_v2  ;;  %v4853_v25 = vsel %vm1715_vm7, %v1760_v62, 3e+38  ;;  %v1764_v31 = vmul.f32 %v2289_v40, %v1701_v34  ;;  %v5272_v13 = vcvt.s32.f32 %v5271_v39  ;;  %v5274_v40 = vcvt.s32.f32 %v5273_v33 }
 0x523   :  { %1795 = vmin.xlane.f32.xlu0 %v4823_v0  ;;  %v4858_v60 = vsel %vm1718_vm14, %v1766_v53, 3e+38  ;;  %v5275_v53 = vld [vmem:[#allocation24_spill] sm:$0xff] }
 0x524   :  { %v4863_v32 = vsel %vm1717_vm6, %v1764_v31, 3e+38  ;;  %v5276_v31 = vcvt.s32.f32 %v5275_v53 }
 0x526   :  { %1801 = vmin.xlane.f32.xlu1 %v4828_v63 }
 0x527   :  { %1799 = vmin.xlane.f32.xlu0 %v4833_v3 }
 0x52a   :  { %1805 = vmin.xlane.f32.xlu1 %v4838_v42 }
 0x52b   :  { %1803 = vmin.xlane.f32.xlu0 %v4843_v48 }
 0x52e   :  { %1809 = vmin.xlane.f32.xlu1 %v4848_v5 }
 0x52f   :  { %1807 = vmin.xlane.f32.xlu0 %v4853_v25 }
 0x532   :  { %1813 = vmin.xlane.f32.xlu1 %v4858_v60 }
 0x533   :  { %1811 = vmin.xlane.f32.xlu0 %v4863_v32 }
 0x59f   :  { %v1786_v12 = vpop.xlane.xlu1 %1785 }
 0x5a0   :  { %v1784_v35 = vpop.xlane.xlu0 %1783 }
 0x5a3   :  { %v1790_v41 = vpop.xlane.xlu1 %1789 }
 0x5a4   :  { %v1788_v10 = vpop.xlane.xlu0 %1787 }
 0x5a7   :  { %v1794_v59 = vpop.xlane.xlu1 %1793 }
 0x5a8   :  { %v1792_v55 = vpop.xlane.xlu0 %1791  ;;  %v1816_v46 = vmin.f32 %v1786_v12, %v1794_v59 }
 0x5a9   :  { %v1815_v15 = vmin.f32 %v1784_v35, %v1792_v55 }
 0x5ab   :  { %v1798_v28 = vpop.xlane.xlu1 %1797 }
 0x5ac   :  { %v1796_v16 = vpop.xlane.xlu0 %1795  ;;  %v1818_v49 = vmin.f32 %v1790_v41, %v1798_v28  ;;  %v5279_v41 = vld [vmem:[#allocation26_spill] sm:$0xff]  ;;  %v5283_v28 = vld [vmem:[#allocation28_spill] sm:$0xff] }
 0x5ad   :  { %v1817_v21 = vmin.f32 %v1788_v10, %v1796_v16  ;;  %v5280_v10 = vcvt.s32.f32 %v5279_v41  ;;  %v5284_v16 = vcvt.s32.f32 %v5283_v28 }
 0x5af   :  { %v1802_v57 = vpop.xlane.xlu1 %1801 }
 0x5b0   :  { %v1800_v50 = vpop.xlane.xlu0 %1799  ;;  %v1820_v4 = vmin.f32 %v1816_v46, %v1802_v57 }
 0x5b1   :  { %v1819_v6 = vmin.f32 %v1815_v15, %v1800_v50 }
 0x5b3   :  { %v1806_v38 = vpop.xlane.xlu1 %1805 }
 0x5b4   :  { %v1804_v58 = vpop.xlane.xlu0 %1803  ;;  %v1822_v24 = vmin.f32 %v1818_v49, %v1806_v38  ;;  %v5287_v38 = vld [vmem:[#allocation35_spill] sm:$0xff] }
 0x5b5   :  { %v1821_v1 = vmin.f32 %v1817_v21, %v1804_v58  ;;  %v5288_v58 = vcvt.s32.f32 %v5287_v38 }
 0x5b7   :  { %v1810_v47 = vpop.xlane.xlu1 %1809 }
 0x5b8   :  { %v1808_v56 = vpop.xlane.xlu0 %1807  ;;  %v1824_v14 = vmin.f32 %v1820_v4, %v1810_v47  ;;  %v5291_v47 = vld [vmem:[#allocation37_spill] sm:$0xff]  ;;  %v5295_v4 = vld [vmem:[#allocation39_spill] sm:$0xff] }
 0x5b9   :  { %v1823_v52 = vmin.f32 %v1819_v6, %v1808_v56  ;;  %v5292_v49 = vcvt.s32.f32 %v5291_v47  ;;  %v5296_v6 = vcvt.s32.f32 %v5295_v4 }
 0x5bb   :  { %v1814_v20 = vpop.xlane.xlu1 %1813  ;;  %v1827_v26 = vmin.f32 %v1823_v52, %v1824_v14  ;;  %v5299_v14 = vld [vmem:[#allocation41_spill] sm:$0xff] }
 0x5bc   :  { %v1826_v8 = vmin.f32 %v1822_v24, %v1814_v20  ;;  %v1812_v11 = vpop.xlane.xlu0 %1811  ;;  %v5300_v52 = vcvt.s32.f32 %v5299_v14 }
 0x5bd   :  { %v1825_v44 = vmin.f32 %v1821_v1, %v1812_v11 }
 0x5bf   :  { %v1828_v23 = vmin.f32 %v1825_v44, %v1826_v8 }
 0x5c1   :  { %v1829_v27 = vmin.f32 %v1827_v26, %v1828_v23 }
 0x5c3   :  { %v1830_v51 = vrot.slane %v1829_v27, 4 }
 0x5c5   :  { %v1831_v43 = vmin.f32 %v1829_v27, %v1830_v51 }
 0x5c7   :  { %v1832_v7 = vrot.slane %v1831_v43, 2 }
 0x5c9   :  { %v1833_v61 = vmin.f32 %v1831_v43, %v1832_v7 }
 0x5cb   :  { %v1834_v45 = vrot.slane %v1833_v61, 1 }
 0x5cd   :  { %v1835_v18 = vmin.f32 %v1833_v61, %v1834_v45 }
 0x5cf   :  { %vm1837_vm0 = vcmp.eq.f32.partialorder %v4774_v54, %v1835_v18  ;;  %vm1836_vm15 = vcmp.eq.f32.partialorder %v4779_v30, %v1835_v18  ;;  %vm1839_vm10 = vcmp.eq.f32.partialorder %v4792_v22, %v1835_v18  ;;  %vm1838_vm9 = vcmp.eq.f32.partialorder %v4797_v37, %v1835_v18  ;;  %v5277_v30 = vld [vmem:[#allocation27_spill] sm:$0xff]  ;;  %v5281_v37 = vld [vmem:[#allocation29_spill] sm:$0xff] }
 0x5d0   :  { %v1853_v29 = vsel %vm1837_vm0, %v5270_v17, 3e+38  ;;  %v1852_v62 = vsel %vm1836_vm15, %v5272_v13, 3e+38  ;;  %v1855_v34 = vsel %vm1839_vm10, %v5274_v40, 3e+38  ;;  %vm1841_vm1 = vcmp.eq.f32.partialorder %v4808_v36, %v1835_v18 }
 0x5d1   :  { %1870 = vmin.xlane.f32.xlu1 %v1853_v29  ;;  %1868 = vmin.xlane.f32.xlu0 %v1852_v62  ;;  %v1854_v54 = vsel %vm1838_vm9, %v5276_v31, 3e+38  ;;  %vm1840_vm4 = vcmp.eq.f32.partialorder %v4813_v9, %v1835_v18  ;;  %v5278_v12 = vcvt.s32.f32 %v5277_v30  ;;  %vm1843_vm13 = vcmp.eq.f32.partialorder %v4818_v2, %v1835_v18  ;;  %v5285_v9 = vld [vmem:[#allocation34_spill] sm:$0xff] }
 0x5d2   :  { %v1856_v22 = vsel %vm1840_vm4, %v5280_v10, 3e+38  ;;  %vm1842_vm11 = vcmp.eq.f32.partialorder %v4823_v0, %v1835_v18  ;;  %v5282_v59 = vcvt.s32.f32 %v5281_v37  ;;  %vm1845_vm12 = vcmp.eq.f32.partialorder %v4828_v63, %v1835_v18  ;;  %v5289_v0 = vld [vmem:[#allocation36_spill] sm:$0xff] }
 0x5d3   :  { %v1857_v35 = vsel %vm1841_vm1, %v5278_v12, 3e+38  ;;  %v1858_v36 = vsel %vm1842_vm11, %v5284_v16, 3e+38  ;;  %vm1844_vm5 = vcmp.eq.f32.partialorder %v4833_v3, %v1835_v18  ;;  %v5286_v57 = vcvt.s32.f32 %v5285_v9  ;;  %v5293_v3 = vld [vmem:[#allocation38_spill] sm:$0xff] }
 0x5d4   :  { %v1859_v55 = vsel %vm1843_vm13, %v5282_v59, 3e+38  ;;  %v1860_v2 = vsel %vm1844_vm5, %v5288_v58, 3e+38  ;;  %vm1847_vm8 = vcmp.eq.f32.partialorder %v4838_v42, %v1835_v18  ;;  %vm1846_vm2 = vcmp.eq.f32.partialorder %v4843_v48, %v1835_v18  ;;  %v5297_v48 = vld [vmem:[#allocation40_spill] sm:$0xff] }
 0x5d5   :  { %1874 = vmin.xlane.f32.xlu1 %v1855_v34  ;;  %1872 = vmin.xlane.f32.xlu0 %v1854_v54  ;;  %v1861_v50 = vsel %vm1845_vm12, %v5286_v57, 3e+38  ;;  %v5290_v46 = vcvt.s32.f32 %v5289_v0  ;;  %v1862_v63 = vsel %vm1846_vm2, %v5292_v49, 3e+38  ;;  %vm1849_vm3 = vcmp.eq.f32.partialorder %v4848_v5, %v1835_v18 }
 0x5d6   :  { %vm1848_vm7 = vcmp.eq.f32.partialorder %v4853_v25, %v1835_v18  ;;  %v5294_v56 = vcvt.s32.f32 %v5293_v3  ;;  %vm1851_vm14 = vcmp.eq.f32.partialorder %v4858_v60, %v1835_v18  ;;  %vm1850_vm6 = vcmp.eq.f32.partialorder %v4863_v32, %v1835_v18 }
 0x5d7   :  { %v1863_v15 = vsel %vm1847_vm8, %v5290_v46, 3e+38  ;;  %v1864_v42 = vsel %vm1848_vm7, %v5296_v6, 3e+38  ;;  %v5298_v24 = vcvt.s32.f32 %v5297_v48  ;;  %v1866_v5 = vsel %vm1850_vm6, %v5300_v52, 3e+38 }
 0x5d8   :  { %v1865_v21 = vsel %vm1849_vm3, %v5294_v56, 3e+38 }
 0x5d9   :  { %1878 = vmin.xlane.f32.xlu1 %v1857_v35  ;;  %1876 = vmin.xlane.f32.xlu0 %v1856_v22  ;;  %v1867_v1 = vsel %vm1851_vm14, %v5298_v24, 3e+38 }
 0x5dd   :  { %1882 = vmin.xlane.f32.xlu1 %v1859_v55  ;;  %1880 = vmin.xlane.f32.xlu0 %v1858_v36 }
 0x5e1   :  { %1886 = vmin.xlane.f32.xlu1 %v1861_v50  ;;  %1884 = vmin.xlane.f32.xlu0 %v1860_v2 }
 0x5e5   :  { %1890 = vmin.xlane.f32.xlu1 %v1863_v15  ;;  %1888 = vmin.xlane.f32.xlu0 %v1862_v63 }
 0x5e9   :  { %1894 = vmin.xlane.f32.xlu1 %v1865_v21  ;;  %1892 = vmin.xlane.f32.xlu0 %v1864_v42 }
 0x5ed   :  { %1898 = vmin.xlane.f32.xlu1 %v1867_v1  ;;  %1896 = vmin.xlane.f32.xlu0 %v1866_v5 }
 0x5ee   :  { %2361 = shalt.err (!%p2358_p6)
}
 0x5ef   :  { %1946 = dma.vmem_to_hbm [thread:$0]  %s1941_s22, 2048, %s4943_s4, [#allocation10], %s2598_s29, %s2598_s29, %s2599_s30  }
 0x5f0   :  { %s2370_s28 = scalar_lea.vmem %s1966_s24, 16  ;;  %s2374_s8 = scalar_lea.vmem %s1966_s24, 32 }
 0x5f1   :  { %p2371_p7 = scmp.ne.s32.totalorder %s1966_s24, %s2370_s28  ;;  %p2375_p8 = scmp.lt.s32.totalorder %s1966_s24, %s1966_s24 }
 0x5f2   :  { %p2376_p9 = scmp.lt.s32.totalorder %s2374_s8, %s2370_s28 }
 0x5f4   :  { %p2377_p10 = por %p2376_p9, %p2375_p8 }
 0x5f6   :  { %p2378_p11 = pnand %p2377_p10, %p2371_p7 }
 0x5f8   :  { %2381 = shalt.err (!%p2378_p11)
}
 0x5f9   :  { %1968 = dma.vmem_to_hbm [thread:$0]  %s1966_s24, 16, %s4945_s6, [#allocation13]  }
 0x5fa   :  { %s2609_s11 = smov [#allocation8]   ;;  %s2610_s13 = smov [#allocation11]  }
 0x5fb   :  { %s1928_s12 = sshll.u32 %s2609_s11, 4  ;;  %s1952_s14 = sshll.u32 %s2610_s13, 4  ;;  %s1929_s12 = int_to_ptr.vmem [resolvable:$true] %s1928_s12  ;;  %s1953_s14 = int_to_ptr.vmem [resolvable:$true] %s1952_s14 }
 0x5fc   :  { %s2390_s15 = scalar_lea.vmem %s1929_s12, 2048  ;;  %p2395_p13 = scmp.lt.s32.totalorder %s1929_s12, %s1929_s12 }
 0x5fd   :  { %p2391_p12 = scmp.ne.s32.totalorder %s1929_s12, %s2390_s15  ;;  %p2396_p0 = scmp.lt.s32.totalorder %s2390_s15, %s2390_s15 }
 0x5ff   :  { %p2397_p1 = por %p2396_p0, %p2395_p13 }
 0x601   :  { %p2398_p2 = pnand %p2397_p1, %p2391_p12 }
 0x603   :  { %2401 = shalt.err (!%p2398_p2)
}
 0x604   :  { %1934 = dma.vmem_to_hbm [thread:$0]  %s1929_s12, 2048, %s4942_s3, [#allocation4], %s2598_s29, %s2598_s29, %s2599_s30  }
 0x605   :  { %s2410_s6 = scalar_lea.vmem %s1953_s14, 2048  ;;  %p2415_p4 = scmp.lt.s32.totalorder %s1953_s14, %s1953_s14 }
 0x606   :  { %p2411_p3 = scmp.ne.s32.totalorder %s1953_s14, %s2410_s6  ;;  %p2416_p5 = scmp.lt.s32.totalorder %s2410_s6, %s2410_s6 }
 0x608   :  { %p2417_p6 = por %p2416_p5, %p2415_p4 }
 0x60a   :  { %p2418_p7 = pnand %p2417_p6, %p2411_p3 }
 0x60c   :  { %2421 = shalt.err (!%p2418_p7)
}
 0x60d   :  { %1958 = dma.vmem_to_hbm [thread:$0]  %s1953_s14, 2048, %s4944_s5, [#allocation10], %s2598_s29, %s2598_s29, %s2599_s30   ;;  %vm5301_vm0 = vcmask 0  }
 0x60e   :  { %s2611_s3 = smov [#allocation14]  }
 0x60f   :  { %s1975_s5 = sshll.u32 %s2611_s3, 4  ;;  %s1976_s5 = int_to_ptr.vmem [resolvable:$true] %s1975_s5 }
 0x610   :  { %s2430_s29 = scalar_lea.vmem %s1976_s5, 16  ;;  %s2434_s30 = scalar_lea.vmem %s1976_s5, 32 }
 0x611   :  { %p2431_p8 = scmp.ne.s32.totalorder %s1976_s5, %s2430_s29  ;;  %p2435_p9 = scmp.lt.s32.totalorder %s1976_s5, %s1976_s5 }
 0x612   :  { %p2436_p10 = scmp.lt.s32.totalorder %s2434_s30, %s2430_s29 }
 0x614   :  { %p2437_p11 = por %p2436_p10, %p2435_p9 }
 0x616   :  { %p2438_p12 = pnand %p2437_p11, %p2431_p8 }
 0x65a   :  { %v1871_v25 = vpop.xlane.xlu1 %1870  ;;  %v1869_v60 = vpop.xlane.xlu0 %1868 }
 0x65e   :  { %v1875_v32 = vpop.xlane.xlu1 %1874  ;;  %v1873_v20 = vpop.xlane.xlu0 %1872 }
 0x662   :  { %v1879_v8 = vpop.xlane.xlu1 %1878  ;;  %v1877_v11 = vpop.xlane.xlu0 %1876 }
 0x663   :  { %v1901_v7 = vmin.f32 %v1871_v25, %v1879_v8  ;;  %v1900_v61 = vmin.f32 %v1869_v60, %v1877_v11 }
 0x666   :  { %v1883_v44 = vpop.xlane.xlu1 %1882  ;;  %v1881_v26 = vpop.xlane.xlu0 %1880 }
 0x667   :  { %v1903_v19 = vmin.f32 %v1875_v32, %v1883_v44  ;;  %v1902_v17 = vmin.f32 %v1873_v20, %v1881_v26 }
 0x66a   :  { %v1887_v23 = vpop.xlane.xlu1 %1886  ;;  %v1885_v27 = vpop.xlane.xlu0 %1884 }
 0x66b   :  { %v1905_v29 = vmin.f32 %v1901_v7, %v1887_v23  ;;  %v1904_v39 = vmin.f32 %v1900_v61, %v1885_v27 }
 0x66e   :  { %v1891_v51 = vpop.xlane.xlu1 %1890  ;;  %v1889_v43 = vpop.xlane.xlu0 %1888 }
 0x66f   :  { %v1907_v13 = vmin.f32 %v1903_v19, %v1891_v51  ;;  %v1906_v62 = vmin.f32 %v1902_v17, %v1889_v43 }
 0x672   :  { %v1895_v45 = vpop.xlane.xlu1 %1894  ;;  %v1893_v18 = vpop.xlane.xlu0 %1892 }
 0x673   :  { %v1909_v33 = vmin.f32 %v1905_v29, %v1895_v45  ;;  %v1908_v40 = vmin.f32 %v1904_v39, %v1893_v18 }
 0x675   :  { %v1912_v30 = vmin.f32 %v1908_v40, %v1909_v33 }
 0x676   :  { %v1899_v34 = vpop.xlane.xlu1 %1898  ;;  %v1897_v53 = vpop.xlane.xlu0 %1896 }
 0x677   :  { %v1911_v31 = vmin.f32 %v1907_v13, %v1899_v34  ;;  %v1910_v54 = vmin.f32 %v1906_v62, %v1897_v53 }
 0x679   :  { %v1913_v12 = vmin.f32 %v1910_v54, %v1911_v31 }
 0x67b   :  { %v1914_v35 = vmin.f32 %v1912_v30, %v1913_v12 }
 0x67d   :  { %v1915_v41 = vrot.slane %v1914_v35, 4 }
 0x67f   :  { %v1916_v10 = vmin.f32 %v1914_v35, %v1915_v41 }
 0x681   :  { %v1917_v22 = vrot.slane %v1916_v10, 2 }
 0x683   :  { %v1918_v37 = vmin.f32 %v1916_v10, %v1917_v22 }
 0x685   :  { %v1919_v59 = vrot.slane %v1918_v37, 1 }
 0x687   :  { %v1920_v55 = vmin.f32 %v1918_v37, %v1919_v59 }
 0x689   :  { %v2070_v28 = vtrunc.f32 %v1920_v55 }
 0x68b   :  { %v2071_v16 = vcvt.f32.s32 %v2070_v28 }
 0x68d   :  { %1922 = vst.msk [vmem:[#allocation14] sm:$0x1] %vm5301_vm0, %v2071_v16 }
 0x68e   :  { %2441 = shalt.err (!%p2438_p12)
}
 0x68f   :  { %1978 = dma.vmem_to_hbm [thread:$0]  %s1976_s5, 16, %s4946_s7, [#allocation13]  }
 0x690   :  { %2522 = dma.done.wait [#allocation4], 2048  }
 0x691   :  { %2523 = vsyncadd [#allocation4], 4294965248 }
 0x692   :  { %2524 = dma.done.wait [#allocation10], 4096  }
 0x693   :  { %2525 = vsyncadd [#allocation10], 4294963200 }
 0x694   :  { %2526 = dma.done.wait [#allocation13], 32  }
 0x695   :  { %2527 = vsyncadd [#allocation13], 4294967264 }
 0x696   :  { %1994 = vsyncpa [#allocation3], 1 }
 0x697   :  { %1995 = vsyncpa [#allocation6], 1 }
 0x698   :  { %1996 = vsyncpa [#allocation4], 1 }
 0x699   :  { %1997 = vsyncpa [#allocation10], 1 }
 0x69a   :  { %1998 = vsyncpa [#allocation13], 1 }

</bundles_post_ra>
